<compile_context>
chip_gen: v7x
topology: tpu7x:2x2x1
jax: 0.10.0
libtpu: 0.0.40
codegen_flags: <defaults>
</compile_context>

<pallas_src>
import functools

import jax
import jax.numpy as jnp
from jax import lax
from jax.experimental import pallas as pl
from jax.experimental.pallas import tpu as pltpu
import numpy as np

_LANE = 128     # f32 lane width
_SUBLANE = 8    # f32 sublane width

# PyTorch LSTM gate order is [i, f, g, o]; we pack columns as [i, f, o, g] so
# one sigmoid covers a contiguous (B, 3H) slice and one tanh covers (B, H).
_GATE_PERM = np.array([0, 1, 3, 2])


# ----------------------------------------------------------------------------
# Small helpers
# ----------------------------------------------------------------------------

def _round_up(x, m):
    return ((x + m - 1) // m) * m


def _pick_row_tile(total, max_tile):
    """Largest divisor of `total` that is a multiple of 8 and <= max_tile."""
    t = min(total, max_tile)
    t -= t % _SUBLANE
    t = max(t, _SUBLANE)
    while total % t:
        t -= _SUBLANE
    return t


def _pick_col_tile(total, max_tile):
    """Largest divisor of `total` that is a multiple of 128 and <= max_tile."""
    t = min(total, max_tile)
    t = (t // _LANE) * _LANE
    t = max(t, _LANE)
    while total % t:
        t -= _LANE
    return t


def _pick_t_tile(T, max_tile):
    """Prefer a divisor of T (no per-step padding mask); else pad the tail."""
    cap = max(1, min(max_tile, T))
    for cand in range(cap, max(1, cap // 2) - 1, -1):
        if T % cand == 0:
            return cand
    return cap


def _vmem_capacity():
    try:
        info = pltpu.get_tpu_info()
        cap = getattr(info, "vmem_capacity_bytes", None)
        if cap:
            return int(cap)
    except Exception:
        pass
    return 64 << 20   # conservative default (v7x per-core VMEM)


# ----------------------------------------------------------------------------
# Pallas kernels
# ----------------------------------------------------------------------------

def _matmul_bias_kernel(x_ref, w_ref, b_ref, o_ref):
    """o = x @ w + b.  x:(TN,K)  w:(K,TV)  b:(1,TV)  o:(TN,TV)."""
    x = x_ref[...].astype(w_ref.dtype)
    o_ref[...] = (jnp.dot(x, w_ref[...], preferred_element_type=jnp.float32)
                  + b_ref[...])


def _lstm_layer_kernel(x_ref, wih_hbm, whh_hbm, b_ref, h0_ref, c0_ref,
                       y_ref, hT_ref, cT_ref,
                       wih_sc, whh_sc, g_sc, dma_sem,
                       *, hidden_dim, t_tile, seq_len, needs_mask, unroll):
    """One LSTM layer over one time chunk, with the x->gate matmul fused in.

    x_ref   : (t_tile, Bp, Ein)   streamed embedding / prev-layer hidden chunk
    wih_hbm : (Ein, 4Hp)          input->gate weight (stays in HBM, pl.ANY)
    whh_hbm : (Hp, 4Hp)           hidden->gate weight (stays in HBM, pl.ANY)
    b_ref   : (1, 4Hp)            fused bias (b_ih + b_hh), resident
    h0/c0   : (Bp, Hp)            initial states (read on chunk 0 only)
    y_ref   : (t_tile, Bp, Hp)    per-timestep hidden outputs, streamed
    hT/cT   : (Bp, Hp)            resident outputs; double as the h/c carry
    wih_sc, whh_sc : VMEM single-buffered weight residents (DMA'd on chunk 0)
    g_sc    : (t_tile, Bp, 4Hp)   chunk gate pre-activations
    Gate column order is [i | f | o | g], each block padded to Hp.
    """
    H = hidden_dim
    chunk = pl.program_id(0)

    @pl.when(chunk == 0)
    def _init():
        # Single-buffered resident weights: one DMA, reused by every chunk.
        cp_ih = pltpu.make_async_copy(wih_hbm, wih_sc, dma_sem.at[0])
        cp_hh = pltpu.make_async_copy(whh_hbm, whh_sc, dma_sem.at[1])
        cp_ih.start()
        cp_hh.start()
        cp_ih.wait()
        cp_hh.wait()
        # State carry lives directly in the resident (constant-index) outputs.
        hT_ref[...] = h0_ref[...]
        cT_ref[...] = c0_ref[...]

    # ---- fused input->gate projection for the whole chunk (big-M matmul) ----
    tb, Bp, Ein = x_ref.shape
    w_ih = wih_sc[...]
    gates_x = jnp.dot(x_ref[...].reshape(tb * Bp, Ein).astype(w_ih.dtype),
                      w_ih, preferred_element_type=jnp.float32) + b_ref[...]
    g_sc[...] = gates_x.reshape(tb, Bp, 4 * H)

    # ---- sequential recurrence over the chunk -------------------------------
    w_hh = whh_sc[...]
    chunk_start = chunk * t_tile

    def step(t, carry):
        h, c = carry
        gates = g_sc[t] + jnp.dot(h.astype(w_hh.dtype), w_hh,
                                  preferred_element_type=jnp.float32)
        sig = jax.nn.sigmoid(gates[:, :3 * H])        # [i | f | o] in one pass
        i_g = sig[:, 0 * H:1 * H]
        f_g = sig[:, 1 * H:2 * H]
        o_g = sig[:, 2 * H:3 * H]
        g_g = jnp.tanh(gates[:, 3 * H:4 * H])
        c_new = f_g * c + i_g * g_g
        h_new = o_g * jnp.tanh(c_new)
        if needs_mask:  # static: only when padded Tp != true seq_len
            valid = (chunk_start + t) < seq_len
            h_new = jnp.where(valid, h_new, h)
            c_new = jnp.where(valid, c_new, c)
        y_ref[t] = h_new
        return h_new, c_new

    h_fin, c_fin = lax.fori_loop(0, t_tile, step,
                                 (hT_ref[...], cT_ref[...]), unroll=unroll)
    hT_ref[...] = h_fin
    cT_ref[...] = c_fin


# ----------------------------------------------------------------------------
# pallas_call wrappers
# ----------------------------------------------------------------------------

def _lstm_layer(x, w_ih_t, w_hh_t, bias, h0, c0, *, t_tile, seq_len, vmem_cap):
    """Time-chunked single-layer LSTM with fused input projection."""
    Tp, Bp, Ein = x.shape
    G = w_ih_t.shape[1]
    Hp = h0.shape[-1]
    num_chunks = Tp // t_tile
    needs_mask = (Tp != seq_len)
    # Shorter unroll at large H: the per-step live set (gates + i/f/o/g + h/c)
    # already crowds the 64-vreg file; spills would sit on the serial chain.
    unroll = 2 if Hp >= 512 else (True if t_tile <= 8 else 4)

    wb = jnp.dtype(w_ih_t.dtype).itemsize
    vmem_need = (2 * t_tile * Bp * Ein * 4          # x chunk (double-buffered)
                 + 2 * t_tile * Bp * Hp * 4         # y chunk (double-buffered)
                 + t_tile * Bp * G * 4              # gate scratch
                 + (Ein + Hp) * G * wb              # single-buffered weights
                 + 2 * (4 * Bp * Hp * 4 + G * 4))   # h0/c0/hT/cT/bias
    vmem_limit = int(min(100 << 20,
                         max(32 << 20, vmem_need * 5 // 4 + (2 << 20))))

    kernel = functools.partial(
        _lstm_layer_kernel, hidden_dim=Hp, t_tile=t_tile,
        seq_len=seq_len, needs_mask=needs_mask, unroll=unroll)

    return pl.pallas_call(
        kernel,
        out_shape=(
            jax.ShapeDtypeStruct((Tp, Bp, Hp), jnp.float32),
            jax.ShapeDtypeStruct((Bp, Hp), jnp.float32),
            jax.ShapeDtypeStruct((Bp, Hp), jnp.float32),
        ),
        grid_spec=pltpu.PrefetchScalarGridSpec(
            num_scalar_prefetch=0,
            grid=(num_chunks,),
            in_specs=[
                pl.BlockSpec((t_tile, Bp, Ein), lambda t: (t, 0, 0)),
                pl.BlockSpec(memory_space=pl.ANY),        # W_ih stays in HBM
                pl.BlockSpec(memory_space=pl.ANY),        # W_hh stays in HBM
                pl.BlockSpec((1, G), lambda t: (0, 0)),   # fused bias, resident
                pl.BlockSpec((Bp, Hp), lambda t: (0, 0)),
                pl.BlockSpec((Bp, Hp), lambda t: (0, 0)),
            ],
            out_specs=(
                pl.BlockSpec((t_tile, Bp, Hp), lambda t: (t, 0, 0)),
                pl.BlockSpec((Bp, Hp), lambda t: (0, 0)),
                pl.BlockSpec((Bp, Hp), lambda t: (0, 0)),
            ),
            scratch_shapes=[
                pltpu.VMEM((Ein, G), w_ih_t.dtype),       # resident W_ih
                pltpu.VMEM((Hp, G), w_hh_t.dtype),        # resident W_hh
                pltpu.VMEM((t_tile, Bp, G), jnp.float32), # chunk gates
                pltpu.SemaphoreType.DMA((2,)),
            ],
        ),
        compiler_params=pltpu.CompilerParams(
            dimension_semantics=("arbitrary",),
            vmem_limit_bytes=vmem_limit),
    )(x, w_ih_t, w_hh_t, bias, h0, c0)


def _fc_projection(x_flat, w_t, bias, *, row_tile, col_tile):
    """Final projection to vocab, tiled over rows and vocab columns."""
    N, H = x_flat.shape
    V = w_t.shape[1]
    wb = jnp.dtype(w_t.dtype).itemsize
    vmem_need = 2 * (row_tile * H * 4 + H * col_tile * wb
                     + col_tile * 4 + row_tile * col_tile * 4)
    vmem_limit = int(min(100 << 20,
                         max(32 << 20, vmem_need * 5 // 4 + (2 << 20))))
    # TODO(synk): on v7x, mark the row axis CORE_PARALLEL / split via core_map
    # to use both TensorCores explicitly.
    return pl.pallas_call(
        _matmul_bias_kernel,
        out_shape=jax.ShapeDtypeStruct((N, V), jnp.float32),
        grid_spec=pltpu.PrefetchScalarGridSpec(
            num_scalar_prefetch=0,
            grid=(N // row_tile, V // col_tile),
            in_specs=[
                pl.BlockSpec((row_tile, H), lambda i, j: (i, 0)),
                pl.BlockSpec((H, col_tile), lambda i, j: (0, j)),
                pl.BlockSpec((1, col_tile), lambda i, j: (0, j)),
            ],
            out_specs=pl.BlockSpec((row_tile, col_tile), lambda i, j: (i, j)),
        ),
        compiler_params=pltpu.CompilerParams(
            dimension_semantics=("parallel", "parallel"),
            vmem_limit_bytes=vmem_limit),
    )(x_flat, w_t, bias)


# ----------------------------------------------------------------------------
# Parameter packing (transpose + gate-reorder + zero-pad to hardware tiles)
# ----------------------------------------------------------------------------

def prepare_params(raw, *, embedding_dim, hidden_dim, vocab_size,
                   matmul_dtype=jnp.float32):
    """matmul_dtype=jnp.bfloat16 halves weight VMEM/HBM traffic on all TPU
    generations; accumulation / gates / states stay float32 in the kernels."""
    E, H, V = embedding_dim, hidden_dim, vocab_size
    Ep = _round_up(E, _LANE)
    Hp = _round_up(H, _LANE)
    Vp = _round_up(V, _LANE)

    def pack_gate_w(w, in_dim, in_dim_p):
        # w: (4H, in_dim) PyTorch layout, gate blocks [i; f; g; o].
        # -> (in_dim_p, 4Hp) with columns [i|f|o|g], each block lane-padded.
        w4 = w.T.reshape(in_dim, 4, H)[:, _GATE_PERM, :]
        w4 = jnp.pad(w4, ((0, in_dim_p - in_dim), (0, 0), (0, Hp - H)))
        return w4.reshape(in_dim_p, 4 * Hp).astype(matmul_dtype)

    packed = {
        "dims": dict(E=E, H=H, V=V, Ep=Ep, Hp=Hp, Vp=Vp),
        "embedding": jnp.pad(raw["embedding"], ((0, 0), (0, Ep - E))),
        "lstm": [],
        "fc": {},
    }
    for layer, lp in enumerate(raw["lstm"]):
        in_dim = E if layer == 0 else H
        in_dim_p = Ep if layer == 0 else Hp
        b = (lp["b_ih"] + lp["b_hh"]).reshape(4, H)[_GATE_PERM, :]
        b = jnp.pad(b, ((0, 0), (0, Hp - H))).reshape(1, 4 * Hp)
        packed["lstm"].append({
            "w_ih_t": pack_gate_w(lp["w_ih"], in_dim, in_dim_p),
            "w_hh_t": pack_gate_w(lp["w_hh"], H, Hp),
            "bias": b.astype(jnp.float32),
        })
    w_fc_t = jnp.pad(raw["fc"]["w"].T, ((0, Hp - H), (0, Vp - V)))
    b_fc = jnp.pad(raw["fc"]["b"], (0, Vp - V))[None, :]
    packed["fc"]["w_t"] = w_fc_t.astype(matmul_dtype)
    packed["fc"]["b"] = b_fc.astype(jnp.float32)
    return packed


# ----------------------------------------------------------------------------
# Forward pass (mirrors language_model.forward)
# ----------------------------------------------------------------------------

def language_model_forward(packed, input_ids, hidden, *, t_tile_max=None):
    dims = packed["dims"]
    H, V = dims["H"], dims["V"]
    Hp, Vp = dims["Hp"], dims["Vp"]

    h0_all, c0_all = hidden
    num_layers, B, _ = h0_all.shape
    T = input_ids.shape[1]

    vmem_cap = _vmem_capacity()
    Bp = _round_up(B, _SUBLANE)
    if t_tile_max is None:
        # Smaller time chunks on low-VMEM parts (v7x: 64 MiB physical).
        t_tile_max = 32 if vmem_cap < (100 << 20) else 64
    t_tile = _pick_t_tile(T, t_tile_max)
    num_chunks = pl.cdiv(T, t_tile)
    Tp = num_chunks * t_tile

    # Embedding gather + padded time-major layout (plain-JAX glue).
    emb = jnp.take(packed["embedding"], input_ids, axis=0)       # (B, T, Ep)
    x = jnp.transpose(emb, (1, 0, 2))                            # (T, B, Ep)
    x = jnp.pad(x, ((0, Tp - T), (0, Bp - B), (0, 0)))           # (Tp, Bp, Ep)

    h0_p = jnp.pad(h0_all, ((0, 0), (0, Bp - B), (0, Hp - H)))
    c0_p = jnp.pad(c0_all, ((0, 0), (0, Bp - B), (0, Hp - H)))

    # TODO(synk): fuse all layers into one pallas_call (stacked weights) and,
    # on v7x, wavefront-pipeline layer l / layer l+1 across the two TensorCores.
    h_finals, c_finals = [], []
    for layer in range(num_layers):
        lp = packed["lstm"][layer]
        x, h_t, c_t = _lstm_layer(x, lp["w_ih_t"], lp["w_hh_t"], lp["bias"],
                                  h0_p[layer], c0_p[layer],
                                  t_tile=t_tile, seq_len=T, vmem_cap=vmem_cap)
        h_finals.append(h_t[:B, :H])
        c_finals.append(c_t[:B, :H])

    # Final projection: only the true T*B tokens go through the big FC matmul
    # (both time- and batch-padding stripped before the matmul).
    N = T * B
    Np = _round_up(N, _SUBLANE)
    y = x[:T, :B, :].reshape(N, Hp)
    y = jnp.pad(y, ((0, Np - N), (0, 0)))
    max_row = 1024 if vmem_cap >= (100 << 20) else 512   # v5e/v6e vs v7x
    row_tile = _pick_row_tile(Np, max_row)
    col_tile = _pick_col_tile(Vp, 512)
    logits = _fc_projection(y, packed["fc"]["w_t"], packed["fc"]["b"],
                            row_tile=row_tile, col_tile=col_tile)
    logits = logits[:N, :V].reshape(T, B, V)
    prediction = jnp.transpose(logits, (1, 0, 2))                # (B, T, V)

    h_n = jnp.stack(h_finals, axis=0)
    c_n = jnp.stack(c_finals, axis=0)
    return prediction, (h_n, c_n)


# ----------------------------------------------------------------------------
# Deterministic parameter init (PyTorch-shaped) and pure-JAX reference
# ----------------------------------------------------------------------------

def init_params(key, vocab_size, embedding_dim, hidden_dim, no_layers):
    keys = jax.random.split(key, 1 + 4 * no_layers + 2)
    k = 1.0 / np.sqrt(hidden_dim)
    params = {
        "embedding": jax.random.normal(
            keys[0], (vocab_size, embedding_dim), jnp.float32),
        "lstm": [],
        "fc": {},
    }
    idx = 1
    for layer in range(no_layers):
        in_dim = embedding_dim if layer == 0 else hidden_dim
        w_ih = jax.random.uniform(keys[idx], (4 * hidden_dim, in_dim),
                                  jnp.float32, -k, k); idx += 1
        w_hh = jax.random.uniform(keys[idx], (4 * hidden_dim, hidden_dim),
                                  jnp.float32, -k, k); idx += 1
        b_ih = jax.random.uniform(keys[idx], (4 * hidden_dim,),
                                  jnp.float32, -k, k); idx += 1
        b_hh = jax.random.uniform(keys[idx], (4 * hidden_dim,),
                                  jnp.float32, -k, k); idx += 1
        params["lstm"].append(dict(w_ih=w_ih, w_hh=w_hh, b_ih=b_ih, b_hh=b_hh))
    w_fc = jax.random.uniform(keys[idx], (vocab_size, hidden_dim),
                              jnp.float32, -k, k); idx += 1
    b_fc = jax.random.uniform(keys[idx], (vocab_size,),
                              jnp.float32, -k, k)
    params["fc"] = dict(w=w_fc, b=b_fc)
    return params


def reference_forward(params, input_ids, hidden):
    h0_all, c0_all = hidden
    H = h0_all.shape[-1]
    x = jnp.take(params["embedding"], input_ids, axis=0)         # (B, T, E)
    h_finals, c_finals = [], []
    for layer, lp in enumerate(params["lstm"]):
        h, c = h0_all[layer], c0_all[layer]
        w_ih_t, w_hh_t = lp["w_ih"].T, lp["w_hh"].T
        bias = (lp["b_ih"] + lp["b_hh"])[None, :]
        outs = []
        for t in range(x.shape[1]):
            gates = x[:, t, :] @ w_ih_t + h @ w_hh_t + bias
            i_g = jax.nn.sigmoid(gates[:, 0 * H:1 * H])
            f_g = jax.nn.sigmoid(gates[:, 1 * H:2 * H])
            g_g = jnp.tanh(gates[:, 2 * H:3 * H])
            o_g = jax.nn.sigmoid(gates[:, 3 * H:4 * H])
            c = f_g * c + i_g * g_g
            h = o_g * jnp.tanh(c)
            outs.append(h)
        x = jnp.stack(outs, axis=1)                               # (B, T, H)
        h_finals.append(h)
        c_finals.append(c)
    pred = x @ params["fc"]["w"].T + params["fc"]["b"][None, :]
    return pred, (jnp.stack(h_finals, 0), jnp.stack(c_finals, 0))


# ----------------------------------------------------------------------------
# Main
# ----------------------------------------------------------------------------

if __name__ == "__main__":
    vocab_size, embedding_dim, hidden_dim, no_layers = 32, 16, 32, 2
    batch, seq = 2, 8

    key = jax.random.PRNGKey(0)
    k_params, k_ids = jax.random.split(key)

    raw_params = init_params(k_params, vocab_size, embedding_dim,
                             hidden_dim, no_layers)
    input_ids = jax.random.randint(k_ids, (batch, seq), 0, vocab_size,
                                   dtype=jnp.int32)
    # init_hidden(batch_size, device)
    hidden = (jnp.zeros((no_layers, batch, hidden_dim), jnp.float32),
              jnp.zeros((no_layers, batch, hidden_dim), jnp.float32))

    pred_ref, (h_ref, c_ref) = reference_forward(raw_params, input_ids, hidden)

    # ---- f32 weights: strict parity with the PyTorch/f32 reference ---------
    packed_f32 = prepare_params(raw_params, embedding_dim=embedding_dim,
                                hidden_dim=hidden_dim, vocab_size=vocab_size,
                                matmul_dtype=jnp.float32)
    fwd_f32 = jax.jit(functools.partial(language_model_forward, packed_f32))
    prediction, (h_n, c_n) = fwd_f32(input_ids, hidden)
    jax.block_until_ready((prediction, h_n, c_n))

    np.testing.assert_allclose(np.asarray(prediction), np.asarray(pred_ref),
                               rtol=1e-4, atol=1e-4)
    np.testing.assert_allclose(np.asarray(h_n), np.asarray(h_ref),
                               rtol=1e-4, atol=1e-4)
    np.testing.assert_allclose(np.asarray(c_n), np.asarray(c_ref),
                               rtol=1e-4, atol=1e-4)

    # ---- bf16 weights (production path): f32 accumulation, f32 h/c ---------
    packed_bf16 = prepare_params(raw_params, embedding_dim=embedding_dim,
                                 hidden_dim=hidden_dim, vocab_size=vocab_size,
                                 matmul_dtype=jnp.bfloat16)
    fwd_bf16 = jax.jit(functools.partial(language_model_forward, packed_bf16))
    pred16, (h16, c16) = fwd_bf16(input_ids, hidden)
    jax.block_until_ready((pred16, h16, c16))
    np.testing.assert_allclose(np.asarray(pred16), np.asarray(pred_ref),
                               rtol=5e-2, atol=1e-1)

    assert prediction.shape == (batch, seq, vocab_size)
    assert h_n.shape == (no_layers, batch, hidden_dim)
    assert c_n.shape == (no_layers, batch, hidden_dim)

    print("KERNEL_OK")
</pallas_src>

<mosaic_0001>
module attributes {stable_mosaic.version = 11 : i64} {
  func.func @_matmul_bias_kernel(%arg0: i32, %arg1: i32, %arg2: memref<16x128xf32, #tpu.memory_space<vmem>>, %arg3: memref<128x128xf32, #tpu.memory_space<vmem>>, %arg4: memref<1x128xf32, #tpu.memory_space<vmem>>, %arg5: memref<16x128xf32, #tpu.memory_space<vmem>>) attributes {dimension_semantics = [#tpu.dimension_semantics<parallel>, #tpu.dimension_semantics<parallel>], iteration_bounds = array<i64: 1, 1>, scalar_prefetch = 0 : i64, scratch_operands = 0 : i64, tpu.core_type = #tpu.core_type<tc>, window_params = [{transform_indices = @transform_0, window_bounds = array<i64: 16, 128>}, {transform_indices = @transform_1, window_bounds = array<i64: 128, 128>}, {transform_indices = @transform_2, window_bounds = array<i64: 1, 128>}, {transform_indices = @transform_3, window_bounds = array<i64: 16, 128>}]} {
    %c0 = arith.constant 0 : index
    %c0_0 = arith.constant 0 : index
    %0 = vector.load %arg2[%c0, %c0_0] : memref<16x128xf32, #tpu.memory_space<vmem>>, vector<16x128xf32>
    %c0_1 = arith.constant 0 : index
    %c0_2 = arith.constant 0 : index
    %1 = vector.load %arg3[%c0_1, %c0_2] : memref<128x128xf32, #tpu.memory_space<vmem>>, vector<128x128xf32>
    %cst = arith.constant dense<0.000000e+00> : vector<16x128xf32>
    %2 = tpu.matmul %0, %1, %cst {dimension_numbers = #tpu.dot_dimension_numbers<[1], [0], [0], [1], [0, 0, 1, 1], [], []>} : vector<16x128xf32>, vector<128x128xf32>, vector<16x128xf32> -> vector<16x128xf32>
    %c0_3 = arith.constant 0 : index
    %c0_4 = arith.constant 0 : index
    %3 = vector.load %arg4[%c0_3, %c0_4] : memref<1x128xf32, #tpu.memory_space<vmem>>, vector<1x128xf32>
    %4 = vector.broadcast %3 : vector<1x128xf32> to vector<16x128xf32>
    %5 = arith.addf %2, %4 : vector<16x128xf32>
    %c0_5 = arith.constant 0 : index
    %c0_6 = arith.constant 0 : index
    %6 = vector.load %arg5[%c0_5, %c0_6] : memref<16x128xf32, #tpu.memory_space<vmem>>, vector<16x128xf32>
    tpu.vector_store %arg5[%c0_5, %c0_6], %5 {strides = array<i32>} : memref<16x128xf32, #tpu.memory_space<vmem>>, vector<16x128xf32>,
    return
  }
  func.func @transform_0(%arg0: i32, %arg1: i32) -> (i32, i32) {
    %c0_i32 = arith.constant 0 : i32
    %c0_i32_0 = arith.constant 0 : i32
    return %arg0, %c0_i32 : i32, i32
  }
  func.func @transform_1(%arg0: i32, %arg1: i32) -> (i32, i32) {
    %c0_i32 = arith.constant 0 : i32
    %c0_i32_0 = arith.constant 0 : i32
    return %c0_i32, %arg1 : i32, i32
  }
  func.func @transform_2(%arg0: i32, %arg1: i32) -> (i32, i32) {
    %c0_i32 = arith.constant 0 : i32
    %c0_i32_0 = arith.constant 0 : i32
    return %c0_i32, %arg1 : i32, i32
  }
  func.func @transform_3(%arg0: i32, %arg1: i32) -> (i32, i32) {
    %c0_i32 = arith.constant 0 : i32
    return %arg0, %arg1 : i32, i32
  }
}

module attributes {stable_mosaic.version = 11 : i64} {
  func.func @_lstm_layer_kernel(%arg0: i32, %arg1: memref<8x8x128xf32, #tpu.memory_space<vmem>>, %arg2: memref<128x512xf32, #tpu.memory_space<any>>, %arg3: memref<128x512xf32, #tpu.memory_space<any>>, %arg4: memref<1x512xf32, #tpu.memory_space<vmem>>, %arg5: memref<8x128xf32, #tpu.memory_space<vmem>>, %arg6: memref<8x128xf32, #tpu.memory_space<vmem>>, %arg7: memref<8x8x128xf32, #tpu.memory_space<vmem>>, %arg8: memref<8x128xf32, #tpu.memory_space<vmem>>, %arg9: memref<8x128xf32, #tpu.memory_space<vmem>>, %arg10: memref<128x512xf32, #tpu.memory_space<vmem>>, %arg11: memref<128x512xf32, #tpu.memory_space<vmem>>, %arg12: memref<8x8x512xf32, #tpu.memory_space<vmem>>, %arg13: memref<2x!tpu.dma_semaphore, #tpu.memory_space<semaphore_mem>>) attributes {dimension_semantics = [#tpu.dimension_semantics<arbitrary>], iteration_bounds = array<i64: 1>, scalar_prefetch = 0 : i64, scratch_operands = 4 : i64, tpu.core_type = #tpu.core_type<tc>, window_params = [{transform_indices = @transform_0, window_bounds = array<i64: 8, 8, 128>}, {}, {}, {pipeline_mode = #tpu.pipeline_mode<synchronous>, transform_indices = @transform_3, window_bounds = array<i64: 1, 512>}, {pipeline_mode = #tpu.pipeline_mode<synchronous>, transform_indices = @transform_4, window_bounds = array<i64: 8, 128>}, {pipeline_mode = #tpu.pipeline_mode<synchronous>, transform_indices = @transform_5, window_bounds = array<i64: 8, 128>}, {transform_indices = @transform_6, window_bounds = array<i64: 8, 8, 128>}, {pipeline_mode = #tpu.pipeline_mode<synchronous>, transform_indices = @transform_7, window_bounds = array<i64: 8, 128>}, {pipeline_mode = #tpu.pipeline_mode<synchronous>, transform_indices = @transform_8, window_bounds = array<i64: 8, 128>}]} {
    %c0_i32 = arith.constant 0 : i32
    %0 = arith.cmpi eq, %arg0, %c0_i32 : i32
    %1 = arith.extui %0 : i1 to i32
    %c0_i32_0 = arith.constant 0 : i32
    %2 = arith.cmpi ne, %1, %c0_i32_0 : i32
    scf.if %2 {
      %c0_i32_69 = arith.constant 0 : i32
      %217 = tpu.memref_slice %arg13[%c0_i32_69] : memref<2x!tpu.dma_semaphore, #tpu.memory_space<semaphore_mem>> -> memref<1x!tpu.dma_semaphore, #tpu.memory_space<semaphore_mem>>
      %218 = tpu.memref_squeeze %217 : memref<1x!tpu.dma_semaphore, #tpu.memory_space<semaphore_mem>> -> memref<!tpu.dma_semaphore, #tpu.memory_space<semaphore_mem>>
      tpu.enqueue_dma source(%arg2 : memref<128x512xf32, #tpu.memory_space<any>>) target(%arg10 : memref<128x512xf32, #tpu.memory_space<vmem>>) target_semaphore(%218 : memref<!tpu.dma_semaphore, #tpu.memory_space<semaphore_mem>>)
      %c1_i32_70 = arith.constant 1 : i32
      %219 = tpu.memref_slice %arg13[%c1_i32_70] : memref<2x!tpu.dma_semaphore, #tpu.memory_space<semaphore_mem>> -> memref<1x!tpu.dma_semaphore, #tpu.memory_space<semaphore_mem>>
      %220 = tpu.memref_squeeze %219 : memref<1x!tpu.dma_semaphore, #tpu.memory_space<semaphore_mem>> -> memref<!tpu.dma_semaphore, #tpu.memory_space<semaphore_mem>>
      tpu.enqueue_dma source(%arg3 : memref<128x512xf32, #tpu.memory_space<any>>) target(%arg11 : memref<128x512xf32, #tpu.memory_space<vmem>>) target_semaphore(%220 : memref<!tpu.dma_semaphore, #tpu.memory_space<semaphore_mem>>)
      %c0_i32_71 = arith.constant 0 : i32
      %221 = tpu.memref_slice %arg13[%c0_i32_71] : memref<2x!tpu.dma_semaphore, #tpu.memory_space<semaphore_mem>> -> memref<1x!tpu.dma_semaphore, #tpu.memory_space<semaphore_mem>>
      %222 = tpu.memref_squeeze %221 : memref<1x!tpu.dma_semaphore, #tpu.memory_space<semaphore_mem>> -> memref<!tpu.dma_semaphore, #tpu.memory_space<semaphore_mem>>
      tpu.wait_dma2 semaphore(%222 : memref<!tpu.dma_semaphore, #tpu.memory_space<semaphore_mem>>) src(%arg2 : memref<128x512xf32, #tpu.memory_space<any>>) dst(%arg10 : memref<128x512xf32, #tpu.memory_space<vmem>>)
      %c1_i32_72 = arith.constant 1 : i32
      %223 = tpu.memref_slice %arg13[%c1_i32_72] : memref<2x!tpu.dma_semaphore, #tpu.memory_space<semaphore_mem>> -> memref<1x!tpu.dma_semaphore, #tpu.memory_space<semaphore_mem>>
      %224 = tpu.memref_squeeze %223 : memref<1x!tpu.dma_semaphore, #tpu.memory_space<semaphore_mem>> -> memref<!tpu.dma_semaphore, #tpu.memory_space<semaphore_mem>>
      tpu.wait_dma2 semaphore(%224 : memref<!tpu.dma_semaphore, #tpu.memory_space<semaphore_mem>>) src(%arg3 : memref<128x512xf32, #tpu.memory_space<any>>) dst(%arg11 : memref<128x512xf32, #tpu.memory_space<vmem>>)
      %c0_73 = arith.constant 0 : index
      %c0_74 = arith.constant 0 : index
      %225 = vector.load %arg5[%c0_73, %c0_74] : memref<8x128xf32, #tpu.memory_space<vmem>>, vector<8x128xf32>
      %c0_75 = arith.constant 0 : index
      %c0_76 = arith.constant 0 : index
      %226 = vector.load %arg8[%c0_75, %c0_76] : memref<8x128xf32, #tpu.memory_space<vmem>>, vector<8x128xf32>
      tpu.vector_store %arg8[%c0_75, %c0_76], %225 {strides = array<i32>} : memref<8x128xf32, #tpu.memory_space<vmem>>, vector<8x128xf32>,
      %c0_77 = arith.constant 0 : index
      %c0_78 = arith.constant 0 : index
      %227 = vector.load %arg6[%c0_77, %c0_78] : memref<8x128xf32, #tpu.memory_space<vmem>>, vector<8x128xf32>
      %c0_79 = arith.constant 0 : index
      %c0_80 = arith.constant 0 : index
      %228 = vector.load %arg9[%c0_79, %c0_80] : memref<8x128xf32, #tpu.memory_space<vmem>>, vector<8x128xf32>
      tpu.vector_store %arg9[%c0_79, %c0_80], %227 {strides = array<i32>} : memref<8x128xf32, #tpu.memory_space<vmem>>, vector<8x128xf32>,
    } else {
    }
    %c0 = arith.constant 0 : index
    %c0_1 = arith.constant 0 : index
    %3 = vector.load %arg10[%c0, %c0_1] : memref<128x512xf32, #tpu.memory_space<vmem>>, vector<128x512xf32>
    %c0_2 = arith.constant 0 : index
    %c0_3 = arith.constant 0 : index
    %c0_4 = arith.constant 0 : index
    %4 = vector.load %arg1[%c0_2, %c0_3, %c0_4] : memref<8x8x128xf32, #tpu.memory_space<vmem>>, vector<8x8x128xf32>
    %5 = vector.shape_cast %4 : vector<8x8x128xf32> to vector<64x128xf32>
    %cst = arith.constant dense<0.000000e+00> : vector<64x512xf32>
    %6 = tpu.matmul %5, %3, %cst {dimension_numbers = #tpu.dot_dimension_numbers<[1], [0], [0], [1], [0, 0, 1, 1], [], []>} : vector<64x128xf32>, vector<128x512xf32>, vector<64x512xf32> -> vector<64x512xf32>
    %c0_5 = arith.constant 0 : index
    %c0_6 = arith.constant 0 : index
    %7 = vector.load %arg4[%c0_5, %c0_6] : memref<1x512xf32, #tpu.memory_space<vmem>>, vector<1x512xf32>
    %8 = vector.broadcast %7 : vector<1x512xf32> to vector<64x512xf32>
    %9 = arith.addf %6, %8 : vector<64x512xf32>
    %10 = vector.shape_cast %9 : vector<64x512xf32> to vector<8x8x512xf32>
    %c0_7 = arith.constant 0 : index
    %c0_8 = arith.constant 0 : index
    %c0_9 = arith.constant 0 : index
    %11 = vector.load %arg12[%c0_7, %c0_8, %c0_9] : memref<8x8x512xf32, #tpu.memory_space<vmem>>, vector<8x8x512xf32>
    tpu.vector_store %arg12[%c0_7, %c0_8, %c0_9], %10 {strides = array<i32>} : memref<8x8x512xf32, #tpu.memory_space<vmem>>, vector<8x8x512xf32>,
    %c0_10 = arith.constant 0 : index
    %c0_11 = arith.constant 0 : index
    %12 = vector.load %arg11[%c0_10, %c0_11] : memref<128x512xf32, #tpu.memory_space<vmem>>, vector<128x512xf32>
    %c0_12 = arith.constant 0 : index
    %c0_13 = arith.constant 0 : index
    %13 = vector.load %arg8[%c0_12, %c0_13] : memref<8x128xf32, #tpu.memory_space<vmem>>, vector<8x128xf32>
    %c0_14 = arith.constant 0 : index
    %c0_15 = arith.constant 0 : index
    %14 = vector.load %arg9[%c0_14, %c0_15] : memref<8x128xf32, #tpu.memory_space<vmem>>, vector<8x128xf32>
    %c0_i32_16 = arith.constant 0 : i32
    %15 = arith.index_cast %c0_i32_16 : i32 to index
    %c0_17 = arith.constant 0 : index
    %c0_18 = arith.constant 0 : index
    %16 = vector.load %arg12[%15, %c0_17, %c0_18] : memref<8x8x512xf32, #tpu.memory_space<vmem>>, vector<1x8x512xf32>
    %17 = vector.shape_cast %16 : vector<1x8x512xf32> to vector<8x512xf32>
    %cst_19 = arith.constant dense<0.000000e+00> : vector<8x512xf32>
    %18 = tpu.matmul %13, %12, %cst_19 {dimension_numbers = #tpu.dot_dimension_numbers<[1], [0], [0], [1], [0, 0, 1, 1], [], []>} : vector<8x128xf32>, vector<128x512xf32>, vector<8x512xf32> -> vector<8x512xf32>
    %19 = arith.addf %17, %18 : vector<8x512xf32>
    %20 = vector.extract_strided_slice %19 {offsets = [0, 0], sizes = [8, 384], strides = [1, 1]} : vector<8x512xf32> to vector<8x384xf32>
    %21 = arith.negf %20 : vector<8x384xf32>
    %22 = math.exp %21 : vector<8x384xf32>
    %cst_20 = arith.constant 1.000000e+00 : f32
    %23 = vector.broadcast %cst_20 : f32 to vector<8x384xf32>
    %24 = arith.addf %23, %22 : vector<8x384xf32>
    %25 = arith.divf %23, %24 : vector<8x384xf32>
    %26 = vector.extract_strided_slice %25 {offsets = [0, 0], sizes = [8, 128], strides = [1, 1]} : vector<8x384xf32> to vector<8x128xf32>
    %27 = vector.extract_strided_slice %25 {offsets = [0, 128], sizes = [8, 128], strides = [1, 1]} : vector<8x384xf32> to vector<8x128xf32>
    %28 = vector.extract_strided_slice %25 {offsets = [0, 256], sizes = [8, 128], strides = [1, 1]} : vector<8x384xf32> to vector<8x128xf32>
    %29 = vector.extract_strided_slice %19 {offsets = [0, 384], sizes = [8, 128], strides = [1, 1]} : vector<8x512xf32> to vector<8x128xf32>
    %30 = math.tanh %29 : vector<8x128xf32>
    %31 = arith.mulf %27, %14 : vector<8x128xf32>
    %32 = arith.mulf %26, %30 : vector<8x128xf32>
    %33 = arith.addf %31, %32 : vector<8x128xf32>
    %34 = math.tanh %33 : vector<8x128xf32>
    %35 = arith.mulf %28, %34 : vector<8x128xf32>
    %36 = arith.index_cast %c0_i32_16 : i32 to index
    %c0_21 = arith.constant 0 : index
    %c0_22 = arith.constant 0 : index
    %37 = vector.load %arg7[%36, %c0_21, %c0_22] : memref<8x8x128xf32, #tpu.memory_space<vmem>>, vector<1x8x128xf32>
    %38 = vector.shape_cast %37 : vector<1x8x128xf32> to vector<8x128xf32>
    %39 = vector.shape_cast %35 : vector<8x128xf32> to vector<1x8x128xf32>
    tpu.vector_store %arg7[%36, %c0_21, %c0_22], %39 {strides = array<i32>} : memref<8x8x128xf32, #tpu.memory_space<vmem>>, vector<1x8x128xf32>,
    %c1_i32 = arith.constant 1 : i32
    %40 = arith.index_cast %c1_i32 : i32 to index
    %c0_23 = arith.constant 0 : index
    %c0_24 = arith.constant 0 : index
    %41 = vector.load %arg12[%40, %c0_23, %c0_24] : memref<8x8x512xf32, #tpu.memory_space<vmem>>, vector<1x8x512xf32>
    %42 = vector.shape_cast %41 : vector<1x8x512xf32> to vector<8x512xf32>
    %cst_25 = arith.constant dense<0.000000e+00> : vector<8x512xf32>
    %43 = tpu.matmul %35, %12, %cst_25 {dimension_numbers = #tpu.dot_dimension_numbers<[1], [0], [0], [1], [0, 0, 1, 1], [], []>} : vector<8x128xf32>, vector<128x512xf32>, vector<8x512xf32> -> vector<8x512xf32>
    %44 = arith.addf %42, %43 : vector<8x512xf32>
    %45 = vector.extract_strided_slice %44 {offsets = [0, 0], sizes = [8, 384], strides = [1, 1]} : vector<8x512xf32> to vector<8x384xf32>
    %46 = arith.negf %45 : vector<8x384xf32>
    %47 = math.exp %46 : vector<8x384xf32>
    %cst_26 = arith.constant 1.000000e+00 : f32
    %48 = vector.broadcast %cst_26 : f32 to vector<8x384xf32>
    %49 = arith.addf %48, %47 : vector<8x384xf32>
    %50 = arith.divf %48, %49 : vector<8x384xf32>
    %51 = vector.extract_strided_slice %50 {offsets = [0, 0], sizes = [8, 128], strides = [1, 1]} : vector<8x384xf32> to vector<8x128xf32>
    %52 = vector.extract_strided_slice %50 {offsets = [0, 128], sizes = [8, 128], strides = [1, 1]} : vector<8x384xf32> to vector<8x128xf32>
    %53 = vector.extract_strided_slice %50 {offsets = [0, 256], sizes = [8, 128], strides = [1, 1]} : vector<8x384xf32> to vector<8x128xf32>
    %54 = vector.extract_strided_slice %44 {offsets = [0, 384], sizes = [8, 128], strides = [1, 1]} : vector<8x512xf32> to vector<8x128xf32>
    %55 = math.tanh %54 : vector<8x128xf32>
    %56 = arith.mulf %52, %33 : vector<8x128xf32>
    %57 = arith.mulf %51, %55 : vector<8x128xf32>
    %58 = arith.addf %56, %57 : vector<8x128xf32>
    %59 = math.tanh %58 : vector<8x128xf32>
    %60 = arith.mulf %53, %59 : vector<8x128xf32>
    %61 = arith.index_cast %c1_i32 : i32 to index
    %c0_27 = arith.constant 0 : index
    %c0_28 = arith.constant 0 : index
    %62 = vector.load %arg7[%61, %c0_27, %c0_28] : memref<8x8x128xf32, #tpu.memory_space<vmem>>, vector<1x8x128xf32>
    %63 = vector.shape_cast %62 : vector<1x8x128xf32> to vector<8x128xf32>
    %64 = vector.shape_cast %60 : vector<8x128xf32> to vector<1x8x128xf32>
    tpu.vector_store %arg7[%61, %c0_27, %c0_28], %64 {strides = array<i32>} : memref<8x8x128xf32, #tpu.memory_space<vmem>>, vector<1x8x128xf32>,
    %c2_i32 = arith.constant 2 : i32
    %65 = arith.index_cast %c2_i32 : i32 to index
    %c0_29 = arith.constant 0 : index
    %c0_30 = arith.constant 0 : index
    %66 = vector.load %arg12[%65, %c0_29, %c0_30] : memref<8x8x512xf32, #tpu.memory_space<vmem>>, vector<1x8x512xf32>
    %67 = vector.shape_cast %66 : vector<1x8x512xf32> to vector<8x512xf32>
    %cst_31 = arith.constant dense<0.000000e+00> : vector<8x512xf32>
    %68 = tpu.matmul %60, %12, %cst_31 {dimension_numbers = #tpu.dot_dimension_numbers<[1], [0], [0], [1], [0, 0, 1, 1], [], []>} : vector<8x128xf32>, vector<128x512xf32>, vector<8x512xf32> -> vector<8x512xf32>
    %69 = arith.addf %67, %68 : vector<8x512xf32>
    %70 = vector.extract_strided_slice %69 {offsets = [0, 0], sizes = [8, 384], strides = [1, 1]} : vector<8x512xf32> to vector<8x384xf32>
    %71 = arith.negf %70 : vector<8x384xf32>
    %72 = math.exp %71 : vector<8x384xf32>
    %cst_32 = arith.constant 1.000000e+00 : f32
    %73 = vector.broadcast %cst_32 : f32 to vector<8x384xf32>
    %74 = arith.addf %73, %72 : vector<8x384xf32>
    %75 = arith.divf %73, %74 : vector<8x384xf32>
    %76 = vector.extract_strided_slice %75 {offsets = [0, 0], sizes = [8, 128], strides = [1, 1]} : vector<8x384xf32> to vector<8x128xf32>
    %77 = vector.extract_strided_slice %75 {offsets = [0, 128], sizes = [8, 128], strides = [1, 1]} : vector<8x384xf32> to vector<8x128xf32>
    %78 = vector.extract_strided_slice %75 {offsets = [0, 256], sizes = [8, 128], strides = [1, 1]} : vector<8x384xf32> to vector<8x128xf32>
    %79 = vector.extract_strided_slice %69 {offsets = [0, 384], sizes = [8, 128], strides = [1, 1]} : vector<8x512xf32> to vector<8x128xf32>
    %80 = math.tanh %79 : vector<8x128xf32>
    %81 = arith.mulf %77, %58 : vector<8x128xf32>
    %82 = arith.mulf %76, %80 : vector<8x128xf32>
    %83 = arith.addf %81, %82 : vector<8x128xf32>
    %84 = math.tanh %83 : vector<8x128xf32>
    %85 = arith.mulf %78, %84 : vector<8x128xf32>
    %86 = arith.index_cast %c2_i32 : i32 to index
    %c0_33 = arith.constant 0 : index
    %c0_34 = arith.constant 0 : index
    %87 = vector.load %arg7[%86, %c0_33, %c0_34] : memref<8x8x128xf32, #tpu.memory_space<vmem>>, vector<1x8x128xf32>
    %88 = vector.shape_cast %87 : vector<1x8x128xf32> to vector<8x128xf32>
    %89 = vector.shape_cast %85 : vector<8x128xf32> to vector<1x8x128xf32>
    tpu.vector_store %arg7[%86, %c0_33, %c0_34], %89 {strides = array<i32>} : memref<8x8x128xf32, #tpu.memory_space<vmem>>, vector<1x8x128xf32>,
    %c3_i32 = arith.constant 3 : i32
    %90 = arith.index_cast %c3_i32 : i32 to index
    %c0_35 = arith.constant 0 : index
    %c0_36 = arith.constant 0 : index
    %91 = vector.load %arg12[%90, %c0_35, %c0_36] : memref<8x8x512xf32, #tpu.memory_space<vmem>>, vector<1x8x512xf32>
    %92 = vector.shape_cast %91 : vector<1x8x512xf32> to vector<8x512xf32>
    %cst_37 = arith.constant dense<0.000000e+00> : vector<8x512xf32>
    %93 = tpu.matmul %85, %12, %cst_37 {dimension_numbers = #tpu.dot_dimension_numbers<[1], [0], [0], [1], [0, 0, 1, 1], [], []>} : vector<8x128xf32>, vector<128x512xf32>, vector<8x512xf32> -> vector<8x512xf32>
    %94 = arith.addf %92, %93 : vector<8x512xf32>
    %95 = vector.extract_strided_slice %94 {offsets = [0, 0], sizes = [8, 384], strides = [1, 1]} : vector<8x512xf32> to vector<8x384xf32>
    %96 = arith.negf %95 : vector<8x384xf32>
    %97 = math.exp %96 : vector<8x384xf32>
    %cst_38 = arith.constant 1.000000e+00 : f32
    %98 = vector.broadcast %cst_38 : f32 to vector<8x384xf32>
    %99 = arith.addf %98, %97 : vector<8x384xf32>
    %100 = arith.divf %98, %99 : vector<8x384xf32>
    %101 = vector.extract_strided_slice %100 {offsets = [0, 0], sizes = [8, 128], strides = [1, 1]} : vector<8x384xf32> to vector<8x128xf32>
    %102 = vector.extract_strided_slice %100 {offsets = [0, 128], sizes = [8, 128], strides = [1, 1]} : vector<8x384xf32> to vector<8x128xf32>
    %103 = vector.extract_strided_slice %100 {offsets = [0, 256], sizes = [8, 128], strides = [1, 1]} : vector<8x384xf32> to vector<8x128xf32>
    %104 = vector.extract_strided_slice %94 {offsets = [0, 384], sizes = [8, 128], strides = [1, 1]} : vector<8x512xf32> to vector<8x128xf32>
    %105 = math.tanh %104 : vector<8x128xf32>
    %106 = arith.mulf %102, %83 : vector<8x128xf32>
    %107 = arith.mulf %101, %105 : vector<8x128xf32>
    %108 = arith.addf %106, %107 : vector<8x128xf32>
    %109 = math.tanh %108 : vector<8x128xf32>
    %110 = arith.mulf %103, %109 : vector<8x128xf32>
    %111 = arith.index_cast %c3_i32 : i32 to index
    %c0_39 = arith.constant 0 : index
    %c0_40 = arith.constant 0 : index
    %112 = vector.load %arg7[%111, %c0_39, %c0_40] : memref<8x8x128xf32, #tpu.memory_space<vmem>>, vector<1x8x128xf32>
    %113 = vector.shape_cast %112 : vector<1x8x128xf32> to vector<8x128xf32>
    %114 = vector.shape_cast %110 : vector<8x128xf32> to vector<1x8x128xf32>
    tpu.vector_store %arg7[%111, %c0_39, %c0_40], %114 {strides = array<i32>} : memref<8x8x128xf32, #tpu.memory_space<vmem>>, vector<1x8x128xf32>,
    %c4_i32 = arith.constant 4 : i32
    %115 = arith.index_cast %c4_i32 : i32 to index
    %c0_41 = arith.constant 0 : index
    %c0_42 = arith.constant 0 : index
    %116 = vector.load %arg12[%115, %c0_41, %c0_42] : memref<8x8x512xf32, #tpu.memory_space<vmem>>, vector<1x8x512xf32>
    %117 = vector.shape_cast %116 : vector<1x8x512xf32> to vector<8x512xf32>
    %cst_43 = arith.constant dense<0.000000e+00> : vector<8x512xf32>
    %118 = tpu.matmul %110, %12, %cst_43 {dimension_numbers = #tpu.dot_dimension_numbers<[1], [0], [0], [1], [0, 0, 1, 1], [], []>} : vector<8x128xf32>, vector<128x512xf32>, vector<8x512xf32> -> vector<8x512xf32>
    %119 = arith.addf %117, %118 : vector<8x512xf32>
    %120 = vector.extract_strided_slice %119 {offsets = [0, 0], sizes = [8, 384], strides = [1, 1]} : vector<8x512xf32> to vector<8x384xf32>
    %121 = arith.negf %120 : vector<8x384xf32>
    %122 = math.exp %121 : vector<8x384xf32>
    %cst_44 = arith.constant 1.000000e+00 : f32
    %123 = vector.broadcast %cst_44 : f32 to vector<8x384xf32>
    %124 = arith.addf %123, %122 : vector<8x384xf32>
    %125 = arith.divf %123, %124 : vector<8x384xf32>
    %126 = vector.extract_strided_slice %125 {offsets = [0, 0], sizes = [8, 128], strides = [1, 1]} : vector<8x384xf32> to vector<8x128xf32>
    %127 = vector.extract_strided_slice %125 {offsets = [0, 128], sizes = [8, 128], strides = [1, 1]} : vector<8x384xf32> to vector<8x128xf32>
    %128 = vector.extract_strided_slice %125 {offsets = [0, 256], sizes = [8, 128], strides = [1, 1]} : vector<8x384xf32> to vector<8x128xf32>
    %129 = vector.extract_strided_slice %119 {offsets = [0, 384], sizes = [8, 128], strides = [1, 1]} : vector<8x512xf32> to vector<8x128xf32>
    %130 = math.tanh %129 : vector<8x128xf32>
    %131 = arith.mulf %127, %108 : vector<8x128xf32>
    %132 = arith.mulf %126, %130 : vector<8x128xf32>
    %133 = arith.addf %131, %132 : vector<8x128xf32>
    %134 = math.tanh %133 : vector<8x128xf32>
    %135 = arith.mulf %128, %134 : vector<8x128xf32>
    %136 = arith.index_cast %c4_i32 : i32 to index
    %c0_45 = arith.constant 0 : index
    %c0_46 = arith.constant 0 : index
    %137 = vector.load %arg7[%136, %c0_45, %c0_46] : memref<8x8x128xf32, #tpu.memory_space<vmem>>, vector<1x8x128xf32>
    %138 = vector.shape_cast %137 : vector<1x8x128xf32> to vector<8x128xf32>
    %139 = vector.shape_cast %135 : vector<8x128xf32> to vector<1x8x128xf32>
    tpu.vector_store %arg7[%136, %c0_45, %c0_46], %139 {strides = array<i32>} : memref<8x8x128xf32, #tpu.memory_space<vmem>>, vector<1x8x128xf32>,
    %c5_i32 = arith.constant 5 : i32
    %140 = arith.index_cast %c5_i32 : i32 to index
    %c0_47 = arith.constant 0 : index
    %c0_48 = arith.constant 0 : index
    %141 = vector.load %arg12[%140, %c0_47, %c0_48] : memref<8x8x512xf32, #tpu.memory_space<vmem>>, vector<1x8x512xf32>
    %142 = vector.shape_cast %141 : vector<1x8x512xf32> to vector<8x512xf32>
    %cst_49 = arith.constant dense<0.000000e+00> : vector<8x512xf32>
    %143 = tpu.matmul %135, %12, %cst_49 {dimension_numbers = #tpu.dot_dimension_numbers<[1], [0], [0], [1], [0, 0, 1, 1], [], []>} : vector<8x128xf32>, vector<128x512xf32>, vector<8x512xf32> -> vector<8x512xf32>
    %144 = arith.addf %142, %143 : vector<8x512xf32>
    %145 = vector.extract_strided_slice %144 {offsets = [0, 0], sizes = [8, 384], strides = [1, 1]} : vector<8x512xf32> to vector<8x384xf32>
    %146 = arith.negf %145 : vector<8x384xf32>
    %147 = math.exp %146 : vector<8x384xf32>
    %cst_50 = arith.constant 1.000000e+00 : f32
    %148 = vector.broadcast %cst_50 : f32 to vector<8x384xf32>
    %149 = arith.addf %148, %147 : vector<8x384xf32>
    %150 = arith.divf %148, %149 : vector<8x384xf32>
    %151 = vector.extract_strided_slice %150 {offsets = [0, 0], sizes = [8, 128], strides = [1, 1]} : vector<8x384xf32> to vector<8x128xf32>
    %152 = vector.extract_strided_slice %150 {offsets = [0, 128], sizes = [8, 128], strides = [1, 1]} : vector<8x384xf32> to vector<8x128xf32>
    %153 = vector.extract_strided_slice %150 {offsets = [0, 256], sizes = [8, 128], strides = [1, 1]} : vector<8x384xf32> to vector<8x128xf32>
    %154 = vector.extract_strided_slice %144 {offsets = [0, 384], sizes = [8, 128], strides = [1, 1]} : vector<8x512xf32> to vector<8x128xf32>
    %155 = math.tanh %154 : vector<8x128xf32>
    %156 = arith.mulf %152, %133 : vector<8x128xf32>
    %157 = arith.mulf %151, %155 : vector<8x128xf32>
    %158 = arith.addf %156, %157 : vector<8x128xf32>
    %159 = math.tanh %158 : vector<8x128xf32>
    %160 = arith.mulf %153, %159 : vector<8x128xf32>
    %161 = arith.index_cast %c5_i32 : i32 to index
    %c0_51 = arith.constant 0 : index
    %c0_52 = arith.constant 0 : index
    %162 = vector.load %arg7[%161, %c0_51, %c0_52] : memref<8x8x128xf32, #tpu.memory_space<vmem>>, vector<1x8x128xf32>
    %163 = vector.shape_cast %162 : vector<1x8x128xf32> to vector<8x128xf32>
    %164 = vector.shape_cast %160 : vector<8x128xf32> to vector<1x8x128xf32>
    tpu.vector_store %arg7[%161, %c0_51, %c0_52], %164 {strides = array<i32>} : memref<8x8x128xf32, #tpu.memory_space<vmem>>, vector<1x8x128xf32>,
    %c6_i32 = arith.constant 6 : i32
    %165 = arith.index_cast %c6_i32 : i32 to index
    %c0_53 = arith.constant 0 : index
    %c0_54 = arith.constant 0 : index
    %166 = vector.load %arg12[%165, %c0_53, %c0_54] : memref<8x8x512xf32, #tpu.memory_space<vmem>>, vector<1x8x512xf32>
    %167 = vector.shape_cast %166 : vector<1x8x512xf32> to vector<8x512xf32>
    %cst_55 = arith.constant dense<0.000000e+00> : vector<8x512xf32>
    %168 = tpu.matmul %160, %12, %cst_55 {dimension_numbers = #tpu.dot_dimension_numbers<[1], [0], [0], [1], [0, 0, 1, 1], [], []>} : vector<8x128xf32>, vector<128x512xf32>, vector<8x512xf32> -> vector<8x512xf32>
    %169 = arith.addf %167, %168 : vector<8x512xf32>
    %170 = vector.extract_strided_slice %169 {offsets = [0, 0], sizes = [8, 384], strides = [1, 1]} : vector<8x512xf32> to vector<8x384xf32>
    %171 = arith.negf %170 : vector<8x384xf32>
    %172 = math.exp %171 : vector<8x384xf32>
    %cst_56 = arith.constant 1.000000e+00 : f32
    %173 = vector.broadcast %cst_56 : f32 to vector<8x384xf32>
    %174 = arith.addf %173, %172 : vector<8x384xf32>
    %175 = arith.divf %173, %174 : vector<8x384xf32>
    %176 = vector.extract_strided_slice %175 {offsets = [0, 0], sizes = [8, 128], strides = [1, 1]} : vector<8x384xf32> to vector<8x128xf32>
    %177 = vector.extract_strided_slice %175 {offsets = [0, 128], sizes = [8, 128], strides = [1, 1]} : vector<8x384xf32> to vector<8x128xf32>
    %178 = vector.extract_strided_slice %175 {offsets = [0, 256], sizes = [8, 128], strides = [1, 1]} : vector<8x384xf32> to vector<8x128xf32>
    %179 = vector.extract_strided_slice %169 {offsets = [0, 384], sizes = [8, 128], strides = [1, 1]} : vector<8x512xf32> to vector<8x128xf32>
    %180 = math.tanh %179 : vector<8x128xf32>
    %181 = arith.mulf %177, %158 : vector<8x128xf32>
    %182 = arith.mulf %176, %180 : vector<8x128xf32>
    %183 = arith.addf %181, %182 : vector<8x128xf32>
    %184 = math.tanh %183 : vector<8x128xf32>
    %185 = arith.mulf %178, %184 : vector<8x128xf32>
    %186 = arith.index_cast %c6_i32 : i32 to index
    %c0_57 = arith.constant 0 : index
    %c0_58 = arith.constant 0 : index
    %187 = vector.load %arg7[%186, %c0_57, %c0_58] : memref<8x8x128xf32, #tpu.memory_space<vmem>>, vector<1x8x128xf32>
    %188 = vector.shape_cast %187 : vector<1x8x128xf32> to vector<8x128xf32>
    %189 = vector.shape_cast %185 : vector<8x128xf32> to vector<1x8x128xf32>
    tpu.vector_store %arg7[%186, %c0_57, %c0_58], %189 {strides = array<i32>} : memref<8x8x128xf32, #tpu.memory_space<vmem>>, vector<1x8x128xf32>,
    %c7_i32 = arith.constant 7 : i32
    %190 = arith.index_cast %c7_i32 : i32 to index
    %c0_59 = arith.constant 0 : index
    %c0_60 = arith.constant 0 : index
    %191 = vector.load %arg12[%190, %c0_59, %c0_60] : memref<8x8x512xf32, #tpu.memory_space<vmem>>, vector<1x8x512xf32>
    %192 = vector.shape_cast %191 : vector<1x8x512xf32> to vector<8x512xf32>
    %cst_61 = arith.constant dense<0.000000e+00> : vector<8x512xf32>
    %193 = tpu.matmul %185, %12, %cst_61 {dimension_numbers = #tpu.dot_dimension_numbers<[1], [0], [0], [1], [0, 0, 1, 1], [], []>} : vector<8x128xf32>, vector<128x512xf32>, vector<8x512xf32> -> vector<8x512xf32>
    %194 = arith.addf %192, %193 : vector<8x512xf32>
    %195 = vector.extract_strided_slice %194 {offsets = [0, 0], sizes = [8, 384], strides = [1, 1]} : vector<8x512xf32> to vector<8x384xf32>
    %196 = arith.negf %195 : vector<8x384xf32>
    %197 = math.exp %196 : vector<8x384xf32>
    %cst_62 = arith.constant 1.000000e+00 : f32
    %198 = vector.broadcast %cst_62 : f32 to vector<8x384xf32>
    %199 = arith.addf %198, %197 : vector<8x384xf32>
    %200 = arith.divf %198, %199 : vector<8x384xf32>
    %201 = vector.extract_strided_slice %200 {offsets = [0, 0], sizes = [8, 128], strides = [1, 1]} : vector<8x384xf32> to vector<8x128xf32>
    %202 = vector.extract_strided_slice %200 {offsets = [0, 128], sizes = [8, 128], strides = [1, 1]} : vector<8x384xf32> to vector<8x128xf32>
    %203 = vector.extract_strided_slice %200 {offsets = [0, 256], sizes = [8, 128], strides = [1, 1]} : vector<8x384xf32> to vector<8x128xf32>
    %204 = vector.extract_strided_slice %194 {offsets = [0, 384], sizes = [8, 128], strides = [1, 1]} : vector<8x512xf32> to vector<8x128xf32>
    %205 = math.tanh %204 : vector<8x128xf32>
    %206 = arith.mulf %202, %183 : vector<8x128xf32>
    %207 = arith.mulf %201, %205 : vector<8x128xf32>
    %208 = arith.addf %206, %207 : vector<8x128xf32>
    %209 = math.tanh %208 : vector<8x128xf32>
    %210 = arith.mulf %203, %209 : vector<8x128xf32>
    %211 = arith.index_cast %c7_i32 : i32 to index
    %c0_63 = arith.constant 0 : index
    %c0_64 = arith.constant 0 : index
    %212 = vector.load %arg7[%211, %c0_63, %c0_64] : memref<8x8x128xf32, #tpu.memory_space<vmem>>, vector<1x8x128xf32>
    %213 = vector.shape_cast %212 : vector<1x8x128xf32> to vector<8x128xf32>
    %214 = vector.shape_cast %210 : vector<8x128xf32> to vector<1x8x128xf32>
    tpu.vector_store %arg7[%211, %c0_63, %c0_64], %214 {strides = array<i32>} : memref<8x8x128xf32, #tpu.memory_space<vmem>>, vector<1x8x128xf32>,
    %c8_i32 = arith.constant 8 : i32
    %c0_65 = arith.constant 0 : index
    %c0_66 = arith.constant 0 : index
    %215 = vector.load %arg8[%c0_65, %c0_66] : memref<8x128xf32, #tpu.memory_space<vmem>>, vector<8x128xf32>
    tpu.vector_store %arg8[%c0_65, %c0_66], %210 {strides = array<i32>} : memref<8x128xf32, #tpu.memory_space<vmem>>, vector<8x128xf32>,
    %c0_67 = arith.constant 0 : index
    %c0_68 = arith.constant 0 : index
    %216 = vector.load %arg9[%c0_67, %c0_68] : memref<8x128xf32, #tpu.memory_space<vmem>>, vector<8x128xf32>
    tpu.vector_store %arg9[%c0_67, %c0_68], %208 {strides = array<i32>} : memref<8x128xf32, #tpu.memory_space<vmem>>, vector<8x128xf32>,
    return
  }
  func.func @transform_0(%arg0: i32) -> (i32, i32, i32) {
    %c0_i32 = arith.constant 0 : i32
    %c0_i32_0 = arith.constant 0 : i32
    %c0_i32_1 = arith.constant 0 : i32
    return %arg0, %c0_i32, %c0_i32_0 : i32, i32, i32
  }
  func.func @transform_3(%arg0: i32) -> (i32, i32) {
    %c0_i32 = arith.constant 0 : i32
    %c0_i32_0 = arith.constant 0 : i32
    %c0_i32_1 = arith.constant 0 : i32
    return %c0_i32, %c0_i32_0 : i32, i32
  }
  func.func @transform_4(%arg0: i32) -> (i32, i32) {
    %c0_i32 = arith.constant 0 : i32
    %c0_i32_0 = arith.constant 0 : i32
    %c0_i32_1 = arith.constant 0 : i32
    return %c0_i32, %c0_i32_0 : i32, i32
  }
  func.func @transform_5(%arg0: i32) -> (i32, i32) {
    %c0_i32 = arith.constant 0 : i32
    %c0_i32_0 = arith.constant 0 : i32
    %c0_i32_1 = arith.constant 0 : i32
    return %c0_i32, %c0_i32_0 : i32, i32
  }
  func.func @transform_6(%arg0: i32) -> (i32, i32, i32) {
    %c0_i32 = arith.constant 0 : i32
    %c0_i32_0 = arith.constant 0 : i32
    %c0_i32_1 = arith.constant 0 : i32
    return %arg0, %c0_i32, %c0_i32_0 : i32, i32, i32
  }
  func.func @transform_7(%arg0: i32) -> (i32, i32) {
    %c0_i32 = arith.constant 0 : i32
    %c0_i32_0 = arith.constant 0 : i32
    %c0_i32_1 = arith.constant 0 : i32
    return %c0_i32, %c0_i32_0 : i32, i32
  }
  func.func @transform_8(%arg0: i32) -> (i32, i32) {
    %c0_i32 = arith.constant 0 : i32
    %c0_i32_0 = arith.constant 0 : i32
    %c0_i32_1 = arith.constant 0 : i32
    return %c0_i32, %c0_i32_0 : i32, i32
  }
}

module attributes {stable_mosaic.version = 11 : i64} {
  func.func @_lstm_layer_kernel(%arg0: i32, %arg1: memref<8x8x128xf32, #tpu.memory_space<vmem>>, %arg2: memref<128x512xf32, #tpu.memory_space<any>>, %arg3: memref<128x512xf32, #tpu.memory_space<any>>, %arg4: memref<1x512xf32, #tpu.memory_space<vmem>>, %arg5: memref<8x128xf32, #tpu.memory_space<vmem>>, %arg6: memref<8x128xf32, #tpu.memory_space<vmem>>, %arg7: memref<8x8x128xf32, #tpu.memory_space<vmem>>, %arg8: memref<8x128xf32, #tpu.memory_space<vmem>>, %arg9: memref<8x128xf32, #tpu.memory_space<vmem>>, %arg10: memref<128x512xf32, #tpu.memory_space<vmem>>, %arg11: memref<128x512xf32, #tpu.memory_space<vmem>>, %arg12: memref<8x8x512xf32, #tpu.memory_space<vmem>>, %arg13: memref<2x!tpu.dma_semaphore, #tpu.memory_space<semaphore_mem>>) attributes {dimension_semantics = [#tpu.dimension_semantics<arbitrary>], iteration_bounds = array<i64: 1>, scalar_prefetch = 0 : i64, scratch_operands = 4 : i64, tpu.core_type = #tpu.core_type<tc>, window_params = [{transform_indices = @transform_0, window_bounds = array<i64: 8, 8, 128>}, {}, {}, {pipeline_mode = #tpu.pipeline_mode<synchronous>, transform_indices = @transform_3, window_bounds = array<i64: 1, 512>}, {pipeline_mode = #tpu.pipeline_mode<synchronous>, transform_indices = @transform_4, window_bounds = array<i64: 8, 128>}, {pipeline_mode = #tpu.pipeline_mode<synchronous>, transform_indices = @transform_5, window_bounds = array<i64: 8, 128>}, {transform_indices = @transform_6, window_bounds = array<i64: 8, 8, 128>}, {pipeline_mode = #tpu.pipeline_mode<synchronous>, transform_indices = @transform_7, window_bounds = array<i64: 8, 128>}, {pipeline_mode = #tpu.pipeline_mode<synchronous>, transform_indices = @transform_8, window_bounds = array<i64: 8, 128>}]} {
    %c0_i32 = arith.constant 0 : i32
    %0 = arith.cmpi eq, %arg0, %c0_i32 : i32
    %1 = arith.extui %0 : i1 to i32
    %c0_i32_0 = arith.constant 0 : i32
    %2 = arith.cmpi ne, %1, %c0_i32_0 : i32
    scf.if %2 {
      %c0_i32_69 = arith.constant 0 : i32
      %217 = tpu.memref_slice %arg13[%c0_i32_69] : memref<2x!tpu.dma_semaphore, #tpu.memory_space<semaphore_mem>> -> memref<1x!tpu.dma_semaphore, #tpu.memory_space<semaphore_mem>>
      %218 = tpu.memref_squeeze %217 : memref<1x!tpu.dma_semaphore, #tpu.memory_space<semaphore_mem>> -> memref<!tpu.dma_semaphore, #tpu.memory_space<semaphore_mem>>
      tpu.enqueue_dma source(%arg2 : memref<128x512xf32, #tpu.memory_space<any>>) target(%arg10 : memref<128x512xf32, #tpu.memory_space<vmem>>) target_semaphore(%218 : memref<!tpu.dma_semaphore, #tpu.memory_space<semaphore_mem>>)
      %c1_i32_70 = arith.constant 1 : i32
      %219 = tpu.memref_slice %arg13[%c1_i32_70] : memref<2x!tpu.dma_semaphore, #tpu.memory_space<semaphore_mem>> -> memref<1x!tpu.dma_semaphore, #tpu.memory_space<semaphore_mem>>
      %220 = tpu.memref_squeeze %219 : memref<1x!tpu.dma_semaphore, #tpu.memory_space<semaphore_mem>> -> memref<!tpu.dma_semaphore, #tpu.memory_space<semaphore_mem>>
      tpu.enqueue_dma source(%arg3 : memref<128x512xf32, #tpu.memory_space<any>>) target(%arg11 : memref<128x512xf32, #tpu.memory_space<vmem>>) target_semaphore(%220 : memref<!tpu.dma_semaphore, #tpu.memory_space<semaphore_mem>>)
      %c0_i32_71 = arith.constant 0 : i32
      %221 = tpu.memref_slice %arg13[%c0_i32_71] : memref<2x!tpu.dma_semaphore, #tpu.memory_space<semaphore_mem>> -> memref<1x!tpu.dma_semaphore, #tpu.memory_space<semaphore_mem>>
      %222 = tpu.memref_squeeze %221 : memref<1x!tpu.dma_semaphore, #tpu.memory_space<semaphore_mem>> -> memref<!tpu.dma_semaphore, #tpu.memory_space<semaphore_mem>>
      tpu.wait_dma2 semaphore(%222 : memref<!tpu.dma_semaphore, #tpu.memory_space<semaphore_mem>>) src(%arg2 : memref<128x512xf32, #tpu.memory_space<any>>) dst(%arg10 : memref<128x512xf32, #tpu.memory_space<vmem>>)
      %c1_i32_72 = arith.constant 1 : i32
      %223 = tpu.memref_slice %arg13[%c1_i32_72] : memref<2x!tpu.dma_semaphore, #tpu.memory_space<semaphore_mem>> -> memref<1x!tpu.dma_semaphore, #tpu.memory_space<semaphore_mem>>
      %224 = tpu.memref_squeeze %223 : memref<1x!tpu.dma_semaphore, #tpu.memory_space<semaphore_mem>> -> memref<!tpu.dma_semaphore, #tpu.memory_space<semaphore_mem>>
      tpu.wait_dma2 semaphore(%224 : memref<!tpu.dma_semaphore, #tpu.memory_space<semaphore_mem>>) src(%arg3 : memref<128x512xf32, #tpu.memory_space<any>>) dst(%arg11 : memref<128x512xf32, #tpu.memory_space<vmem>>)
      %c0_73 = arith.constant 0 : index
      %c0_74 = arith.constant 0 : index
      %225 = vector.load %arg5[%c0_73, %c0_74] : memref<8x128xf32, #tpu.memory_space<vmem>>, vector<8x128xf32>
      %c0_75 = arith.constant 0 : index
      %c0_76 = arith.constant 0 : index
      %226 = vector.load %arg8[%c0_75, %c0_76] : memref<8x128xf32, #tpu.memory_space<vmem>>, vector<8x128xf32>
      tpu.vector_store %arg8[%c0_75, %c0_76], %225 {strides = array<i32>} : memref<8x128xf32, #tpu.memory_space<vmem>>, vector<8x128xf32>,
      %c0_77 = arith.constant 0 : index
      %c0_78 = arith.constant 0 : index
      %227 = vector.load %arg6[%c0_77, %c0_78] : memref<8x128xf32, #tpu.memory_space<vmem>>, vector<8x128xf32>
      %c0_79 = arith.constant 0 : index
      %c0_80 = arith.constant 0 : index
      %228 = vector.load %arg9[%c0_79, %c0_80] : memref<8x128xf32, #tpu.memory_space<vmem>>, vector<8x128xf32>
      tpu.vector_store %arg9[%c0_79, %c0_80], %227 {strides = array<i32>} : memref<8x128xf32, #tpu.memory_space<vmem>>, vector<8x128xf32>,
    } else {
    }
    %c0 = arith.constant 0 : index
    %c0_1 = arith.constant 0 : index
    %3 = vector.load %arg10[%c0, %c0_1] : memref<128x512xf32, #tpu.memory_space<vmem>>, vector<128x512xf32>
    %c0_2 = arith.constant 0 : index
    %c0_3 = arith.constant 0 : index
    %c0_4 = arith.constant 0 : index
    %4 = vector.load %arg1[%c0_2, %c0_3, %c0_4] : memref<8x8x128xf32, #tpu.memory_space<vmem>>, vector<8x8x128xf32>
    %5 = vector.shape_cast %4 : vector<8x8x128xf32> to vector<64x128xf32>
    %cst = arith.constant dense<0.000000e+00> : vector<64x512xf32>
    %6 = tpu.matmul %5, %3, %cst {dimension_numbers = #tpu.dot_dimension_numbers<[1], [0], [0], [1], [0, 0, 1, 1], [], []>} : vector<64x128xf32>, vector<128x512xf32>, vector<64x512xf32> -> vector<64x512xf32>
    %c0_5 = arith.constant 0 : index
    %c0_6 = arith.constant 0 : index
    %7 = vector.load %arg4[%c0_5, %c0_6] : memref<1x512xf32, #tpu.memory_space<vmem>>, vector<1x512xf32>
    %8 = vector.broadcast %7 : vector<1x512xf32> to vector<64x512xf32>
    %9 = arith.addf %6, %8 : vector<64x512xf32>
    %10 = vector.shape_cast %9 : vector<64x512xf32> to vector<8x8x512xf32>
    %c0_7 = arith.constant 0 : index
    %c0_8 = arith.constant 0 : index
    %c0_9 = arith.constant 0 : index
    %11 = vector.load %arg12[%c0_7, %c0_8, %c0_9] : memref<8x8x512xf32, #tpu.memory_space<vmem>>, vector<8x8x512xf32>
    tpu.vector_store %arg12[%c0_7, %c0_8, %c0_9], %10 {strides = array<i32>} : memref<8x8x512xf32, #tpu.memory_space<vmem>>, vector<8x8x512xf32>,
    %c0_10 = arith.constant 0 : index
    %c0_11 = arith.constant 0 : index
    %12 = vector.load %arg11[%c0_10, %c0_11] : memref<128x512xf32, #tpu.memory_space<vmem>>, vector<128x512xf32>
    %c0_12 = arith.constant 0 : index
    %c0_13 = arith.constant 0 : index
    %13 = vector.load %arg8[%c0_12, %c0_13] : memref<8x128xf32, #tpu.memory_space<vmem>>, vector<8x128xf32>
    %c0_14 = arith.constant 0 : index
    %c0_15 = arith.constant 0 : index
    %14 = vector.load %arg9[%c0_14, %c0_15] : memref<8x128xf32, #tpu.memory_space<vmem>>, vector<8x128xf32>
    %c0_i32_16 = arith.constant 0 : i32
    %15 = arith.index_cast %c0_i32_16 : i32 to index
    %c0_17 = arith.constant 0 : index
    %c0_18 = arith.constant 0 : index
    %16 = vector.load %arg12[%15, %c0_17, %c0_18] : memref<8x8x512xf32, #tpu.memory_space<vmem>>, vector<1x8x512xf32>
    %17 = vector.shape_cast %16 : vector<1x8x512xf32> to vector<8x512xf32>
    %cst_19 = arith.constant dense<0.000000e+00> : vector<8x512xf32>
    %18 = tpu.matmul %13, %12, %cst_19 {dimension_numbers = #tpu.dot_dimension_numbers<[1], [0], [0], [1], [0, 0, 1, 1], [], []>} : vector<8x128xf32>, vector<128x512xf32>, vector<8x512xf32> -> vector<8x512xf32>
    %19 = arith.addf %17, %18 : vector<8x512xf32>
    %20 = vector.extract_strided_slice %19 {offsets = [0, 0], sizes = [8, 384], strides = [1, 1]} : vector<8x512xf32> to vector<8x384xf32>
    %21 = arith.negf %20 : vector<8x384xf32>
    %22 = math.exp %21 : vector<8x384xf32>
    %cst_20 = arith.constant 1.000000e+00 : f32
    %23 = vector.broadcast %cst_20 : f32 to vector<8x384xf32>
    %24 = arith.addf %23, %22 : vector<8x384xf32>
    %25 = arith.divf %23, %24 : vector<8x384xf32>
    %26 = vector.extract_strided_slice %25 {offsets = [0, 0], sizes = [8, 128], strides = [1, 1]} : vector<8x384xf32> to vector<8x128xf32>
    %27 = vector.extract_strided_slice %25 {offsets = [0, 128], sizes = [8, 128], strides = [1, 1]} : vector<8x384xf32> to vector<8x128xf32>
    %28 = vector.extract_strided_slice %25 {offsets = [0, 256], sizes = [8, 128], strides = [1, 1]} : vector<8x384xf32> to vector<8x128xf32>
    %29 = vector.extract_strided_slice %19 {offsets = [0, 384], sizes = [8, 128], strides = [1, 1]} : vector<8x512xf32> to vector<8x128xf32>
    %30 = math.tanh %29 : vector<8x128xf32>
    %31 = arith.mulf %27, %14 : vector<8x128xf32>
    %32 = arith.mulf %26, %30 : vector<8x128xf32>
    %33 = arith.addf %31, %32 : vector<8x128xf32>
    %34 = math.tanh %33 : vector<8x128xf32>
    %35 = arith.mulf %28, %34 : vector<8x128xf32>
    %36 = arith.index_cast %c0_i32_16 : i32 to index
    %c0_21 = arith.constant 0 : index
    %c0_22 = arith.constant 0 : index
    %37 = vector.load %arg7[%36, %c0_21, %c0_22] : memref<8x8x128xf32, #tpu.memory_space<vmem>>, vector<1x8x128xf32>
    %38 = vector.shape_cast %37 : vector<1x8x128xf32> to vector<8x128xf32>
    %39 = vector.shape_cast %35 : vector<8x128xf32> to vector<1x8x128xf32>
    tpu.vector_store %arg7[%36, %c0_21, %c0_22], %39 {strides = array<i32>} : memref<8x8x128xf32, #tpu.memory_space<vmem>>, vector<1x8x128xf32>,
    %c1_i32 = arith.constant 1 : i32
    %40 = arith.index_cast %c1_i32 : i32 to index
    %c0_23 = arith.constant 0 : index
    %c0_24 = arith.constant 0 : index
    %41 = vector.load %arg12[%40, %c0_23, %c0_24] : memref<8x8x512xf32, #tpu.memory_space<vmem>>, vector<1x8x512xf32>
    %42 = vector.shape_cast %41 : vector<1x8x512xf32> to vector<8x512xf32>
    %cst_25 = arith.constant dense<0.000000e+00> : vector<8x512xf32>
    %43 = tpu.matmul %35, %12, %cst_25 {dimension_numbers = #tpu.dot_dimension_numbers<[1], [0], [0], [1], [0, 0, 1, 1], [], []>} : vector<8x128xf32>, vector<128x512xf32>, vector<8x512xf32> -> vector<8x512xf32>
    %44 = arith.addf %42, %43 : vector<8x512xf32>
    %45 = vector.extract_strided_slice %44 {offsets = [0, 0], sizes = [8, 384], strides = [1, 1]} : vector<8x512xf32> to vector<8x384xf32>
    %46 = arith.negf %45 : vector<8x384xf32>
    %47 = math.exp %46 : vector<8x384xf32>
    %cst_26 = arith.constant 1.000000e+00 : f32
    %48 = vector.broadcast %cst_26 : f32 to vector<8x384xf32>
    %49 = arith.addf %48, %47 : vector<8x384xf32>
    %50 = arith.divf %48, %49 : vector<8x384xf32>
    %51 = vector.extract_strided_slice %50 {offsets = [0, 0], sizes = [8, 128], strides = [1, 1]} : vector<8x384xf32> to vector<8x128xf32>
    %52 = vector.extract_strided_slice %50 {offsets = [0, 128], sizes = [8, 128], strides = [1, 1]} : vector<8x384xf32> to vector<8x128xf32>
    %53 = vector.extract_strided_slice %50 {offsets = [0, 256], sizes = [8, 128], strides = [1, 1]} : vector<8x384xf32> to vector<8x128xf32>
    %54 = vector.extract_strided_slice %44 {offsets = [0, 384], sizes = [8, 128], strides = [1, 1]} : vector<8x512xf32> to vector<8x128xf32>
    %55 = math.tanh %54 : vector<8x128xf32>
    %56 = arith.mulf %52, %33 : vector<8x128xf32>
    %57 = arith.mulf %51, %55 : vector<8x128xf32>
    %58 = arith.addf %56, %57 : vector<8x128xf32>
    %59 = math.tanh %58 : vector<8x128xf32>
    %60 = arith.mulf %53, %59 : vector<8x128xf32>
    %61 = arith.index_cast %c1_i32 : i32 to index
    %c0_27 = arith.constant 0 : index
    %c0_28 = arith.constant 0 : index
    %62 = vector.load %arg7[%61, %c0_27, %c0_28] : memref<8x8x128xf32, #tpu.memory_space<vmem>>, vector<1x8x128xf32>
    %63 = vector.shape_cast %62 : vector<1x8x128xf32> to vector<8x128xf32>
    %64 = vector.shape_cast %60 : vector<8x128xf32> to vector<1x8x128xf32>
    tpu.vector_store %arg7[%61, %c0_27, %c0_28], %64 {strides = array<i32>} : memref<8x8x128xf32, #tpu.memory_space<vmem>>, vector<1x8x128xf32>,
    %c2_i32 = arith.constant 2 : i32
    %65 = arith.index_cast %c2_i32 : i32 to index
    %c0_29 = arith.constant 0 : index
    %c0_30 = arith.constant 0 : index
    %66 = vector.load %arg12[%65, %c0_29, %c0_30] : memref<8x8x512xf32, #tpu.memory_space<vmem>>, vector<1x8x512xf32>
    %67 = vector.shape_cast %66 : vector<1x8x512xf32> to vector<8x512xf32>
    %cst_31 = arith.constant dense<0.000000e+00> : vector<8x512xf32>
    %68 = tpu.matmul %60, %12, %cst_31 {dimension_numbers = #tpu.dot_dimension_numbers<[1], [0], [0], [1], [0, 0, 1, 1], [], []>} : vector<8x128xf32>, vector<128x512xf32>, vector<8x512xf32> -> vector<8x512xf32>
    %69 = arith.addf %67, %68 : vector<8x512xf32>
    %70 = vector.extract_strided_slice %69 {offsets = [0, 0], sizes = [8, 384], strides = [1, 1]} : vector<8x512xf32> to vector<8x384xf32>
    %71 = arith.negf %70 : vector<8x384xf32>
    %72 = math.exp %71 : vector<8x384xf32>
    %cst_32 = arith.constant 1.000000e+00 : f32
    %73 = vector.broadcast %cst_32 : f32 to vector<8x384xf32>
    %74 = arith.addf %73, %72 : vector<8x384xf32>
    %75 = arith.divf %73, %74 : vector<8x384xf32>
    %76 = vector.extract_strided_slice %75 {offsets = [0, 0], sizes = [8, 128], strides = [1, 1]} : vector<8x384xf32> to vector<8x128xf32>
    %77 = vector.extract_strided_slice %75 {offsets = [0, 128], sizes = [8, 128], strides = [1, 1]} : vector<8x384xf32> to vector<8x128xf32>
    %78 = vector.extract_strided_slice %75 {offsets = [0, 256], sizes = [8, 128], strides = [1, 1]} : vector<8x384xf32> to vector<8x128xf32>
    %79 = vector.extract_strided_slice %69 {offsets = [0, 384], sizes = [8, 128], strides = [1, 1]} : vector<8x512xf32> to vector<8x128xf32>
    %80 = math.tanh %79 : vector<8x128xf32>
    %81 = arith.mulf %77, %58 : vector<8x128xf32>
    %82 = arith.mulf %76, %80 : vector<8x128xf32>
    %83 = arith.addf %81, %82 : vector<8x128xf32>
    %84 = math.tanh %83 : vector<8x128xf32>
    %85 = arith.mulf %78, %84 : vector<8x128xf32>
    %86 = arith.index_cast %c2_i32 : i32 to index
    %c0_33 = arith.constant 0 : index
    %c0_34 = arith.constant 0 : index
    %87 = vector.load %arg7[%86, %c0_33, %c0_34] : memref<8x8x128xf32, #tpu.memory_space<vmem>>, vector<1x8x128xf32>
    %88 = vector.shape_cast %87 : vector<1x8x128xf32> to vector<8x128xf32>
    %89 = vector.shape_cast %85 : vector<8x128xf32> to vector<1x8x128xf32>
    tpu.vector_store %arg7[%86, %c0_33, %c0_34], %89 {strides = array<i32>} : memref<8x8x128xf32, #tpu.memory_space<vmem>>, vector<1x8x128xf32>,
    %c3_i32 = arith.constant 3 : i32
    %90 = arith.index_cast %c3_i32 : i32 to index
    %c0_35 = arith.constant 0 : index
    %c0_36 = arith.constant 0 : index
    %91 = vector.load %arg12[%90, %c0_35, %c0_36] : memref<8x8x512xf32, #tpu.memory_space<vmem>>, vector<1x8x512xf32>
    %92 = vector.shape_cast %91 : vector<1x8x512xf32> to vector<8x512xf32>
    %cst_37 = arith.constant dense<0.000000e+00> : vector<8x512xf32>
    %93 = tpu.matmul %85, %12, %cst_37 {dimension_numbers = #tpu.dot_dimension_numbers<[1], [0], [0], [1], [0, 0, 1, 1], [], []>} : vector<8x128xf32>, vector<128x512xf32>, vector<8x512xf32> -> vector<8x512xf32>
    %94 = arith.addf %92, %93 : vector<8x512xf32>
    %95 = vector.extract_strided_slice %94 {offsets = [0, 0], sizes = [8, 384], strides = [1, 1]} : vector<8x512xf32> to vector<8x384xf32>
    %96 = arith.negf %95 : vector<8x384xf32>
    %97 = math.exp %96 : vector<8x384xf32>
    %cst_38 = arith.constant 1.000000e+00 : f32
    %98 = vector.broadcast %cst_38 : f32 to vector<8x384xf32>
    %99 = arith.addf %98, %97 : vector<8x384xf32>
    %100 = arith.divf %98, %99 : vector<8x384xf32>
    %101 = vector.extract_strided_slice %100 {offsets = [0, 0], sizes = [8, 128], strides = [1, 1]} : vector<8x384xf32> to vector<8x128xf32>
    %102 = vector.extract_strided_slice %100 {offsets = [0, 128], sizes = [8, 128], strides = [1, 1]} : vector<8x384xf32> to vector<8x128xf32>
    %103 = vector.extract_strided_slice %100 {offsets = [0, 256], sizes = [8, 128], strides = [1, 1]} : vector<8x384xf32> to vector<8x128xf32>
    %104 = vector.extract_strided_slice %94 {offsets = [0, 384], sizes = [8, 128], strides = [1, 1]} : vector<8x512xf32> to vector<8x128xf32>
    %105 = math.tanh %104 : vector<8x128xf32>
    %106 = arith.mulf %102, %83 : vector<8x128xf32>
    %107 = arith.mulf %101, %105 : vector<8x128xf32>
    %108 = arith.addf %106, %107 : vector<8x128xf32>
    %109 = math.tanh %108 : vector<8x128xf32>
    %110 = arith.mulf %103, %109 : vector<8x128xf32>
    %111 = arith.index_cast %c3_i32 : i32 to index
    %c0_39 = arith.constant 0 : index
    %c0_40 = arith.constant 0 : index
    %112 = vector.load %arg7[%111, %c0_39, %c0_40] : memref<8x8x128xf32, #tpu.memory_space<vmem>>, vector<1x8x128xf32>
    %113 = vector.shape_cast %112 : vector<1x8x128xf32> to vector<8x128xf32>
    %114 = vector.shape_cast %110 : vector<8x128xf32> to vector<1x8x128xf32>
    tpu.vector_store %arg7[%111, %c0_39, %c0_40], %114 {strides = array<i32>} : memref<8x8x128xf32, #tpu.memory_space<vmem>>, vector<1x8x128xf32>,
    %c4_i32 = arith.constant 4 : i32
    %115 = arith.index_cast %c4_i32 : i32 to index
    %c0_41 = arith.constant 0 : index
    %c0_42 = arith.constant 0 : index
    %116 = vector.load %arg12[%115, %c0_41, %c0_42] : memref<8x8x512xf32, #tpu.memory_space<vmem>>, vector<1x8x512xf32>
    %117 = vector.shape_cast %116 : vector<1x8x512xf32> to vector<8x512xf32>
    %cst_43 = arith.constant dense<0.000000e+00> : vector<8x512xf32>
    %118 = tpu.matmul %110, %12, %cst_43 {dimension_numbers = #tpu.dot_dimension_numbers<[1], [0], [0], [1], [0, 0, 1, 1], [], []>} : vector<8x128xf32>, vector<128x512xf32>, vector<8x512xf32> -> vector<8x512xf32>
    %119 = arith.addf %117, %118 : vector<8x512xf32>
    %120 = vector.extract_strided_slice %119 {offsets = [0, 0], sizes = [8, 384], strides = [1, 1]} : vector<8x512xf32> to vector<8x384xf32>
    %121 = arith.negf %120 : vector<8x384xf32>
    %122 = math.exp %121 : vector<8x384xf32>
    %cst_44 = arith.constant 1.000000e+00 : f32
    %123 = vector.broadcast %cst_44 : f32 to vector<8x384xf32>
    %124 = arith.addf %123, %122 : vector<8x384xf32>
    %125 = arith.divf %123, %124 : vector<8x384xf32>
    %126 = vector.extract_strided_slice %125 {offsets = [0, 0], sizes = [8, 128], strides = [1, 1]} : vector<8x384xf32> to vector<8x128xf32>
    %127 = vector.extract_strided_slice %125 {offsets = [0, 128], sizes = [8, 128], strides = [1, 1]} : vector<8x384xf32> to vector<8x128xf32>
    %128 = vector.extract_strided_slice %125 {offsets = [0, 256], sizes = [8, 128], strides = [1, 1]} : vector<8x384xf32> to vector<8x128xf32>
    %129 = vector.extract_strided_slice %119 {offsets = [0, 384], sizes = [8, 128], strides = [1, 1]} : vector<8x512xf32> to vector<8x128xf32>
    %130 = math.tanh %129 : vector<8x128xf32>
    %131 = arith.mulf %127, %108 : vector<8x128xf32>
    %132 = arith.mulf %126, %130 : vector<8x128xf32>
    %133 = arith.addf %131, %132 : vector<8x128xf32>
    %134 = math.tanh %133 : vector<8x128xf32>
    %135 = arith.mulf %128, %134 : vector<8x128xf32>
    %136 = arith.index_cast %c4_i32 : i32 to index
    %c0_45 = arith.constant 0 : index
    %c0_46 = arith.constant 0 : index
    %137 = vector.load %arg7[%136, %c0_45, %c0_46] : memref<8x8x128xf32, #tpu.memory_space<vmem>>, vector<1x8x128xf32>
    %138 = vector.shape_cast %137 : vector<1x8x128xf32> to vector<8x128xf32>
    %139 = vector.shape_cast %135 : vector<8x128xf32> to vector<1x8x128xf32>
    tpu.vector_store %arg7[%136, %c0_45, %c0_46], %139 {strides = array<i32>} : memref<8x8x128xf32, #tpu.memory_space<vmem>>, vector<1x8x128xf32>,
    %c5_i32 = arith.constant 5 : i32
    %140 = arith.index_cast %c5_i32 : i32 to index
    %c0_47 = arith.constant 0 : index
    %c0_48 = arith.constant 0 : index
    %141 = vector.load %arg12[%140, %c0_47, %c0_48] : memref<8x8x512xf32, #tpu.memory_space<vmem>>, vector<1x8x512xf32>
    %142 = vector.shape_cast %141 : vector<1x8x512xf32> to vector<8x512xf32>
    %cst_49 = arith.constant dense<0.000000e+00> : vector<8x512xf32>
    %143 = tpu.matmul %135, %12, %cst_49 {dimension_numbers = #tpu.dot_dimension_numbers<[1], [0], [0], [1], [0, 0, 1, 1], [], []>} : vector<8x128xf32>, vector<128x512xf32>, vector<8x512xf32> -> vector<8x512xf32>
    %144 = arith.addf %142, %143 : vector<8x512xf32>
    %145 = vector.extract_strided_slice %144 {offsets = [0, 0], sizes = [8, 384], strides = [1, 1]} : vector<8x512xf32> to vector<8x384xf32>
    %146 = arith.negf %145 : vector<8x384xf32>
    %147 = math.exp %146 : vector<8x384xf32>
    %cst_50 = arith.constant 1.000000e+00 : f32
    %148 = vector.broadcast %cst_50 : f32 to vector<8x384xf32>
    %149 = arith.addf %148, %147 : vector<8x384xf32>
    %150 = arith.divf %148, %149 : vector<8x384xf32>
    %151 = vector.extract_strided_slice %150 {offsets = [0, 0], sizes = [8, 128], strides = [1, 1]} : vector<8x384xf32> to vector<8x128xf32>
    %152 = vector.extract_strided_slice %150 {offsets = [0, 128], sizes = [8, 128], strides = [1, 1]} : vector<8x384xf32> to vector<8x128xf32>
    %153 = vector.extract_strided_slice %150 {offsets = [0, 256], sizes = [8, 128], strides = [1, 1]} : vector<8x384xf32> to vector<8x128xf32>
    %154 = vector.extract_strided_slice %144 {offsets = [0, 384], sizes = [8, 128], strides = [1, 1]} : vector<8x512xf32> to vector<8x128xf32>
    %155 = math.tanh %154 : vector<8x128xf32>
    %156 = arith.mulf %152, %133 : vector<8x128xf32>
    %157 = arith.mulf %151, %155 : vector<8x128xf32>
    %158 = arith.addf %156, %157 : vector<8x128xf32>
    %159 = math.tanh %158 : vector<8x128xf32>
    %160 = arith.mulf %153, %159 : vector<8x128xf32>
    %161 = arith.index_cast %c5_i32 : i32 to index
    %c0_51 = arith.constant 0 : index
    %c0_52 = arith.constant 0 : index
    %162 = vector.load %arg7[%161, %c0_51, %c0_52] : memref<8x8x128xf32, #tpu.memory_space<vmem>>, vector<1x8x128xf32>
    %163 = vector.shape_cast %162 : vector<1x8x128xf32> to vector<8x128xf32>
    %164 = vector.shape_cast %160 : vector<8x128xf32> to vector<1x8x128xf32>
    tpu.vector_store %arg7[%161, %c0_51, %c0_52], %164 {strides = array<i32>} : memref<8x8x128xf32, #tpu.memory_space<vmem>>, vector<1x8x128xf32>,
    %c6_i32 = arith.constant 6 : i32
    %165 = arith.index_cast %c6_i32 : i32 to index
    %c0_53 = arith.constant 0 : index
    %c0_54 = arith.constant 0 : index
    %166 = vector.load %arg12[%165, %c0_53, %c0_54] : memref<8x8x512xf32, #tpu.memory_space<vmem>>, vector<1x8x512xf32>
    %167 = vector.shape_cast %166 : vector<1x8x512xf32> to vector<8x512xf32>
    %cst_55 = arith.constant dense<0.000000e+00> : vector<8x512xf32>
    %168 = tpu.matmul %160, %12, %cst_55 {dimension_numbers = #tpu.dot_dimension_numbers<[1], [0], [0], [1], [0, 0, 1, 1], [], []>} : vector<8x128xf32>, vector<128x512xf32>, vector<8x512xf32> -> vector<8x512xf32>
    %169 = arith.addf %167, %168 : vector<8x512xf32>
    %170 = vector.extract_strided_slice %169 {offsets = [0, 0], sizes = [8, 384], strides = [1, 1]} : vector<8x512xf32> to vector<8x384xf32>
    %171 = arith.negf %170 : vector<8x384xf32>
    %172 = math.exp %171 : vector<8x384xf32>
    %cst_56 = arith.constant 1.000000e+00 : f32
    %173 = vector.broadcast %cst_56 : f32 to vector<8x384xf32>
    %174 = arith.addf %173, %172 : vector<8x384xf32>
    %175 = arith.divf %173, %174 : vector<8x384xf32>
    %176 = vector.extract_strided_slice %175 {offsets = [0, 0], sizes = [8, 128], strides = [1, 1]} : vector<8x384xf32> to vector<8x128xf32>
    %177 = vector.extract_strided_slice %175 {offsets = [0, 128], sizes = [8, 128], strides = [1, 1]} : vector<8x384xf32> to vector<8x128xf32>
    %178 = vector.extract_strided_slice %175 {offsets = [0, 256], sizes = [8, 128], strides = [1, 1]} : vector<8x384xf32> to vector<8x128xf32>
    %179 = vector.extract_strided_slice %169 {offsets = [0, 384], sizes = [8, 128], strides = [1, 1]} : vector<8x512xf32> to vector<8x128xf32>
    %180 = math.tanh %179 : vector<8x128xf32>
    %181 = arith.mulf %177, %158 : vector<8x128xf32>
    %182 = arith.mulf %176, %180 : vector<8x128xf32>
    %183 = arith.addf %181, %182 : vector<8x128xf32>
    %184 = math.tanh %183 : vector<8x128xf32>
    %185 = arith.mulf %178, %184 : vector<8x128xf32>
    %186 = arith.index_cast %c6_i32 : i32 to index
    %c0_57 = arith.constant 0 : index
    %c0_58 = arith.constant 0 : index
    %187 = vector.load %arg7[%186, %c0_57, %c0_58] : memref<8x8x128xf32, #tpu.memory_space<vmem>>, vector<1x8x128xf32>
    %188 = vector.shape_cast %187 : vector<1x8x128xf32> to vector<8x128xf32>
    %189 = vector.shape_cast %185 : vector<8x128xf32> to vector<1x8x128xf32>
    tpu.vector_store %arg7[%186, %c0_57, %c0_58], %189 {strides = array<i32>} : memref<8x8x128xf32, #tpu.memory_space<vmem>>, vector<1x8x128xf32>,
    %c7_i32 = arith.constant 7 : i32
    %190 = arith.index_cast %c7_i32 : i32 to index
    %c0_59 = arith.constant 0 : index
    %c0_60 = arith.constant 0 : index
    %191 = vector.load %arg12[%190, %c0_59, %c0_60] : memref<8x8x512xf32, #tpu.memory_space<vmem>>, vector<1x8x512xf32>
    %192 = vector.shape_cast %191 : vector<1x8x512xf32> to vector<8x512xf32>
    %cst_61 = arith.constant dense<0.000000e+00> : vector<8x512xf32>
    %193 = tpu.matmul %185, %12, %cst_61 {dimension_numbers = #tpu.dot_dimension_numbers<[1], [0], [0], [1], [0, 0, 1, 1], [], []>} : vector<8x128xf32>, vector<128x512xf32>, vector<8x512xf32> -> vector<8x512xf32>
    %194 = arith.addf %192, %193 : vector<8x512xf32>
    %195 = vector.extract_strided_slice %194 {offsets = [0, 0], sizes = [8, 384], strides = [1, 1]} : vector<8x512xf32> to vector<8x384xf32>
    %196 = arith.negf %195 : vector<8x384xf32>
    %197 = math.exp %196 : vector<8x384xf32>
    %cst_62 = arith.constant 1.000000e+00 : f32
    %198 = vector.broadcast %cst_62 : f32 to vector<8x384xf32>
    %199 = arith.addf %198, %197 : vector<8x384xf32>
    %200 = arith.divf %198, %199 : vector<8x384xf32>
    %201 = vector.extract_strided_slice %200 {offsets = [0, 0], sizes = [8, 128], strides = [1, 1]} : vector<8x384xf32> to vector<8x128xf32>
    %202 = vector.extract_strided_slice %200 {offsets = [0, 128], sizes = [8, 128], strides = [1, 1]} : vector<8x384xf32> to vector<8x128xf32>
    %203 = vector.extract_strided_slice %200 {offsets = [0, 256], sizes = [8, 128], strides = [1, 1]} : vector<8x384xf32> to vector<8x128xf32>
    %204 = vector.extract_strided_slice %194 {offsets = [0, 384], sizes = [8, 128], strides = [1, 1]} : vector<8x512xf32> to vector<8x128xf32>
    %205 = math.tanh %204 : vector<8x128xf32>
    %206 = arith.mulf %202, %183 : vector<8x128xf32>
    %207 = arith.mulf %201, %205 : vector<8x128xf32>
    %208 = arith.addf %206, %207 : vector<8x128xf32>
    %209 = math.tanh %208 : vector<8x128xf32>
    %210 = arith.mulf %203, %209 : vector<8x128xf32>
    %211 = arith.index_cast %c7_i32 : i32 to index
    %c0_63 = arith.constant 0 : index
    %c0_64 = arith.constant 0 : index
    %212 = vector.load %arg7[%211, %c0_63, %c0_64] : memref<8x8x128xf32, #tpu.memory_space<vmem>>, vector<1x8x128xf32>
    %213 = vector.shape_cast %212 : vector<1x8x128xf32> to vector<8x128xf32>
    %214 = vector.shape_cast %210 : vector<8x128xf32> to vector<1x8x128xf32>
    tpu.vector_store %arg7[%211, %c0_63, %c0_64], %214 {strides = array<i32>} : memref<8x8x128xf32, #tpu.memory_space<vmem>>, vector<1x8x128xf32>,
    %c8_i32 = arith.constant 8 : i32
    %c0_65 = arith.constant 0 : index
    %c0_66 = arith.constant 0 : index
    %215 = vector.load %arg8[%c0_65, %c0_66] : memref<8x128xf32, #tpu.memory_space<vmem>>, vector<8x128xf32>
    tpu.vector_store %arg8[%c0_65, %c0_66], %210 {strides = array<i32>} : memref<8x128xf32, #tpu.memory_space<vmem>>, vector<8x128xf32>,
    %c0_67 = arith.constant 0 : index
    %c0_68 = arith.constant 0 : index
    %216 = vector.load %arg9[%c0_67, %c0_68] : memref<8x128xf32, #tpu.memory_space<vmem>>, vector<8x128xf32>
    tpu.vector_store %arg9[%c0_67, %c0_68], %208 {strides = array<i32>} : memref<8x128xf32, #tpu.memory_space<vmem>>, vector<8x128xf32>,
    return
  }
  func.func @transform_0(%arg0: i32) -> (i32, i32, i32) {
    %c0_i32 = arith.constant 0 : i32
    %c0_i32_0 = arith.constant 0 : i32
    %c0_i32_1 = arith.constant 0 : i32
    return %arg0, %c0_i32, %c0_i32_0 : i32, i32, i32
  }
  func.func @transform_3(%arg0: i32) -> (i32, i32) {
    %c0_i32 = arith.constant 0 : i32
    %c0_i32_0 = arith.constant 0 : i32
    %c0_i32_1 = arith.constant 0 : i32
    return %c0_i32, %c0_i32_0 : i32, i32
  }
  func.func @transform_4(%arg0: i32) -> (i32, i32) {
    %c0_i32 = arith.constant 0 : i32
    %c0_i32_0 = arith.constant 0 : i32
    %c0_i32_1 = arith.constant 0 : i32
    return %c0_i32, %c0_i32_0 : i32, i32
  }
  func.func @transform_5(%arg0: i32) -> (i32, i32) {
    %c0_i32 = arith.constant 0 : i32
    %c0_i32_0 = arith.constant 0 : i32
    %c0_i32_1 = arith.constant 0 : i32
    return %c0_i32, %c0_i32_0 : i32, i32
  }
  func.func @transform_6(%arg0: i32) -> (i32, i32, i32) {
    %c0_i32 = arith.constant 0 : i32
    %c0_i32_0 = arith.constant 0 : i32
    %c0_i32_1 = arith.constant 0 : i32
    return %arg0, %c0_i32, %c0_i32_0 : i32, i32, i32
  }
  func.func @transform_7(%arg0: i32) -> (i32, i32) {
    %c0_i32 = arith.constant 0 : i32
    %c0_i32_0 = arith.constant 0 : i32
    %c0_i32_1 = arith.constant 0 : i32
    return %c0_i32, %c0_i32_0 : i32, i32
  }
  func.func @transform_8(%arg0: i32) -> (i32, i32) {
    %c0_i32 = arith.constant 0 : i32
    %c0_i32_0 = arith.constant 0 : i32
    %c0_i32_1 = arith.constant 0 : i32
    return %c0_i32, %c0_i32_0 : i32, i32
  }
}

</mosaic_0001>

<bundles_post_ra>
// kernel: language_model_forward.5
= control target key start
LH: loop header
LB: loop body
LE: loop exit
PB: predicated region body
PF: predicated region fallthrough
CT: control target
= control target key end

     0   :  { %s289_s1 = inlined_call_operand.vmem [shape: f32[128,128], index: 1, kind: input, shape index: {}]   ;;  %s290_s0 = inlined_call_operand.vmem [shape: f32[16,128], index: 0, kind: input, shape index: {}]   ;;  %s291_s2 = inlined_call_operand.vmem [shape: f32[1,128], index: 2, kind: input, shape index: {}]   ;;  %s292_s3 = inlined_call_operand.vmem [shape: f32[16,128], index: 3, kind: output, shape index: {}]  }
   0x1   :  { %v16_v0 = vld [vmem:[%s289_s1] sm:$0xff]  ;;  %v17_v1 = vld [vmem:[%s289_s1 + $0x8] sm:$0xff]  ;;  %v18_v2 = vld [vmem:[%s289_s1 + $0x10] sm:$0xff] }
   0x2   :  { %v174_v3 = vpack.c.bf16 %v17_v1, %v16_v0  ;;  %v19_v4 = vld [vmem:[%s289_s1 + $0x18] sm:$0xff]  ;;  %v20_v6 = vld [vmem:[%s289_s1 + $0x20] sm:$0xff]  ;;  %v21_v7 = vld [vmem:[%s289_s1 + $0x28] sm:$0xff] }
   0x3   :  { %v178_v5 = vpack.c.bf16 %v19_v4, %v18_v2  ;;  %v182_v8 = vpack.c.bf16 %v21_v7, %v20_v6  ;;  %v14_v9 = vld [vmem:[%s290_s0] sm:$0xff]  ;;  %v22_v10 = vld [vmem:[%s289_s1 + $0x30] sm:$0xff]  ;;  %v23_v11 = vld [vmem:[%s289_s1 + $0x38] sm:$0xff] }
   0x4   :  { %175 = vmatprep.subr.bf16.mxu0 %v174_v3  ;;  %171 = vmatprep.mubr.f32.mxu0 %v14_v9  ;;  %v186_v12 = vpack.c.bf16 %v23_v11, %v22_v10  ;;  %v24_v13 = vld [vmem:[%s289_s1 + $0x40] sm:$0xff]  ;;  %v25_v14 = vld [vmem:[%s289_s1 + $0x48] sm:$0xff]  ;;  %v26_v16 = vld [vmem:[%s289_s1 + $0x50] sm:$0xff] }
   0x5   :  { %177 = vmatpush3.bf16.msra.mxu0 %v174_v3  ;;  %v190_v15 = vpack.c.bf16 %v25_v14, %v24_v13  ;;  %v27_v17 = vld [vmem:[%s289_s1 + $0x58] sm:$0xff]  ;;  %v28_v19 = vld [vmem:[%s289_s1 + $0x60] sm:$0xff]  ;;  %v29_v20 = vld [vmem:[%s289_s1 + $0x68] sm:$0xff] }
   0x6   :  { %179 = vmatprep.subr.bf16.mxu0 %v178_v5  ;;  %v194_v18 = vpack.c.bf16 %v27_v17, %v26_v16  ;;  %v198_v21 = vpack.c.bf16 %v29_v20, %v28_v19  ;;  %v30_v22 = vld [vmem:[%s289_s1 + $0x70] sm:$0xff]  ;;  %v31_v23 = vld [vmem:[%s289_s1 + $0x78] sm:$0xff]  ;;  %v15_v25 = vld [vmem:[%s290_s0 + $0x8] sm:$0xff] }
   0x7   :  { %v202_v24 = vpack.c.bf16 %v31_v23, %v30_v22  ;;  %v120_v26 = vld [vmem:[%s291_s2] ss:$0 sm:$0xff] }
   0x9   :  { %181 = vmatpush3.bf16.msra.mxu0 %v178_v5 }
   0xa   :  { %183 = vmatprep.subr.bf16.mxu0 %v182_v8 }
   0xd   :  { %185 = vmatpush3.bf16.msra.mxu0 %v182_v8 }
   0xe   :  { %187 = vmatprep.subr.bf16.mxu0 %v186_v12 }
  0x11   :  { %189 = vmatpush3.bf16.msra.mxu0 %v186_v12 }
  0x12   :  { %191 = vmatprep.subr.bf16.mxu0 %v190_v15 }
  0x15   :  { %193 = vmatpush3.bf16.msra.mxu0 %v190_v15 }
  0x16   :  { %195 = vmatprep.subr.bf16.mxu0 %v194_v18 }
  0x19   :  { %197 = vmatpush3.bf16.msra.mxu0 %v194_v18 }
  0x1a   :  { %199 = vmatprep.subr.bf16.mxu0 %v198_v21 }
  0x1d   :  { %201 = vmatpush3.bf16.msra.mxu0 %v198_v21 }
  0x1e   :  { %203 = vmatprep.subr.bf16.mxu0 %v202_v24 }
  0x21   :  { %205 = vmatpush3.bf16.msra.mxu0 %v202_v24 }
  0x24   :  { %172 = vmatmul.mubr.f32.vlgmr.msra.gmra.mrb[0].mxu0 %v15_v25 }
  0xf7   :  { %v173_v27 = vpop.f32.mrb[0].mxu0 }
  0xf8   :  { %v111_v28 = vadd.f32 %v173_v27, %v120_v26  ;;  %v105_v29 = vpop.f32.mrb[1].mxu0 }
  0xf9   :  { %v106_v30 = vadd.f32 %v120_v26, %v105_v29 }
  0xfa   :  { %115 = vst [vmem:[%s292_s3 + $0x8] sm:$0xff] %v111_v28 }
  0xfb   :  { %114 = vst [vmem:[%s292_s3] sm:$0xff] %v106_v30 }

// kernel: language_model_forward.4
= control target key start
LH: loop header
LB: loop body
LE: loop exit
PB: predicated region body
PF: predicated region fallthrough
CT: control target
= control target key end

     0   :  { %s4347_s0 = inlined_call_operand.vmem [shape: f32[8,8,128], index: 0, kind: input, shape index: {}]   ;;  %s4348_s1 = inlined_call_operand.vmem [shape: f32[128,512], index: 1, kind: input, shape index: {}]   ;;  %s4349_s2 = inlined_call_operand.vmem [shape: f32[128,512], index: 2, kind: input, shape index: {}]   ;;  %s4350_s3 = inlined_call_operand.vmem [shape: f32[1,512], index: 3, kind: input, shape index: {}]   ;;  %s4351_s4 = inlined_call_operand.vmem [shape: f32[8,128], index: 4, kind: input, shape index: {}]   ;;  %s4352_s5 = inlined_call_operand.vmem [shape: f32[8,128], index: 5, kind: input, shape index: {}]   ;;  %s4353_s6 = inlined_call_operand.vmem [shape: f32[8,8,128], index: 6, kind: output, shape index: {0}]   ;;  %s4354_s7 = inlined_call_operand.vmem [shape: f32[8,128], index: 7, kind: output, shape index: {1}]   ;;  %s4355_s8 = inlined_call_operand.vmem [shape: f32[8,128], index: 8, kind: output, shape index: {2}]  }
   0x1   :  { %v3103_v0 = vld [vmem:[%s4348_s1] sm:$0xff]  ;;  %v3108_v1 = vld [vmem:[%s4348_s1 + $0x8] sm:$0xff]  ;;  %v3113_v2 = vld [vmem:[%s4348_s1 + $0x10] sm:$0xff] }
   0x2   :  { %v3118_v3 = vld [vmem:[%s4348_s1 + $0x18] sm:$0xff]  ;;  %v3123_v4 = vld [vmem:[%s4348_s1 + $0x20] sm:$0xff]  ;;  %v3128_v5 = vld [vmem:[%s4348_s1 + $0x28] sm:$0xff] }
   0x3   :  { %v3133_v6 = vld [vmem:[%s4348_s1 + $0x30] sm:$0xff]  ;;  %v3138_v7 = vld [vmem:[%s4348_s1 + $0x38] sm:$0xff]  ;;  %v3143_v8 = vld [vmem:[%s4348_s1 + $0x40] sm:$0xff] }
   0x4   :  { %v3148_v9 = vld [vmem:[%s4348_s1 + $0x48] sm:$0xff]  ;;  %v3153_v10 = vld [vmem:[%s4348_s1 + $0x50] sm:$0xff]  ;;  %v3158_v11 = vld [vmem:[%s4348_s1 + $0x58] sm:$0xff] }
   0x5   :  { %v3163_v12 = vld [vmem:[%s4348_s1 + $0x60] sm:$0xff]  ;;  %v3168_v13 = vld [vmem:[%s4348_s1 + $0x68] sm:$0xff]  ;;  %v3173_v14 = vld [vmem:[%s4348_s1 + $0x70] sm:$0xff] }
   0x6   :  { %v3178_v15 = vld [vmem:[%s4348_s1 + $0x78] sm:$0xff]  ;;  %v3183_v16 = vld [vmem:[%s4348_s1 + $0x80] sm:$0xff]  ;;  %v3188_v17 = vld [vmem:[%s4348_s1 + $0x88] sm:$0xff] }
   0x7   :  { %v3193_v18 = vld [vmem:[%s4348_s1 + $0x90] sm:$0xff]  ;;  %v3198_v19 = vld [vmem:[%s4348_s1 + $0x98] sm:$0xff]  ;;  %v3203_v20 = vld [vmem:[%s4348_s1 + $0xa0] sm:$0xff] }
   0x8   :  { %v3208_v21 = vld [vmem:[%s4348_s1 + $0xa8] sm:$0xff]  ;;  %v3213_v22 = vld [vmem:[%s4348_s1 + $0xb0] sm:$0xff]  ;;  %v3218_v23 = vld [vmem:[%s4348_s1 + $0xb8] sm:$0xff] }
   0x9   :  { %v3223_v24 = vld [vmem:[%s4348_s1 + $0xc0] sm:$0xff]  ;;  %v3228_v25 = vld [vmem:[%s4348_s1 + $0xc8] sm:$0xff]  ;;  %v3233_v26 = vld [vmem:[%s4348_s1 + $0xd0] sm:$0xff] }
   0xa   :  { %v3238_v27 = vld [vmem:[%s4348_s1 + $0xd8] sm:$0xff]  ;;  %v3243_v28 = vld [vmem:[%s4348_s1 + $0xe0] sm:$0xff]  ;;  %v3248_v29 = vld [vmem:[%s4348_s1 + $0xe8] sm:$0xff] }
   0xb   :  { %v3253_v30 = vld [vmem:[%s4348_s1 + $0xf0] sm:$0xff]  ;;  %v3258_v31 = vld [vmem:[%s4348_s1 + $0xf8] sm:$0xff]  ;;  %v3263_v32 = vld [vmem:[%s4348_s1 + $0x100] sm:$0xff] }
   0xc   :  { %v3268_v33 = vld [vmem:[%s4348_s1 + $0x108] sm:$0xff]  ;;  %v3273_v34 = vld [vmem:[%s4348_s1 + $0x110] sm:$0xff]  ;;  %v3278_v35 = vld [vmem:[%s4348_s1 + $0x118] sm:$0xff] }
   0xd   :  { %v3283_v36 = vld [vmem:[%s4348_s1 + $0x120] sm:$0xff]  ;;  %v3288_v37 = vld [vmem:[%s4348_s1 + $0x128] sm:$0xff]  ;;  %v3293_v38 = vld [vmem:[%s4348_s1 + $0x130] sm:$0xff] }
   0xe   :  { %v3298_v39 = vld [vmem:[%s4348_s1 + $0x138] sm:$0xff]  ;;  %v3303_v40 = vld [vmem:[%s4348_s1 + $0x140] sm:$0xff]  ;;  %v3308_v41 = vld [vmem:[%s4348_s1 + $0x148] sm:$0xff] }
   0xf   :  { %v3313_v42 = vld [vmem:[%s4348_s1 + $0x150] sm:$0xff]  ;;  %v3318_v43 = vld [vmem:[%s4348_s1 + $0x158] sm:$0xff]  ;;  %v3323_v44 = vld [vmem:[%s4348_s1 + $0x160] sm:$0xff] }
  0x10   :  { %v3328_v45 = vld [vmem:[%s4348_s1 + $0x168] sm:$0xff]  ;;  %v3333_v46 = vld [vmem:[%s4348_s1 + $0x170] sm:$0xff]  ;;  %v3338_v47 = vld [vmem:[%s4348_s1 + $0x178] sm:$0xff] }
  0x11   :  { %v3343_v48 = vld [vmem:[%s4348_s1 + $0x180] sm:$0xff]  ;;  %v3348_v49 = vld [vmem:[%s4348_s1 + $0x188] sm:$0xff]  ;;  %v3353_v50 = vld [vmem:[%s4348_s1 + $0x190] sm:$0xff] }
  0x12   :  { %v3358_v51 = vld [vmem:[%s4348_s1 + $0x198] sm:$0xff]  ;;  %v3363_v52 = vld [vmem:[%s4348_s1 + $0x1a0] sm:$0xff]  ;;  %v3368_v53 = vld [vmem:[%s4348_s1 + $0x1a8] sm:$0xff] }
  0x13   :  { %v3373_v54 = vld [vmem:[%s4348_s1 + $0x1b0] sm:$0xff]  ;;  %v3378_v55 = vld [vmem:[%s4348_s1 + $0x1b8] sm:$0xff]  ;;  %v3383_v56 = vld [vmem:[%s4348_s1 + $0x1c0] sm:$0xff] }
  0x14   :  { %4356 = vst [vmem:[#allocation10_spill] sm:$0xff] %v3383_v56  ;;  %v3388_v57 = vld [vmem:[%s4348_s1 + $0x1c8] sm:$0xff]  ;;  %v3393_v58 = vld [vmem:[%s4348_s1 + $0x1d0] sm:$0xff]  ;;  %v3398_v59 = vld [vmem:[%s4348_s1 + $0x1d8] sm:$0xff] }
  0x15   :  { %4357 = vst [vmem:[#allocation11_spill] sm:$0xff] %v3393_v58  ;;  %4358 = vst [vmem:[#allocation12_spill] sm:$0xff] %v3398_v59  ;;  %v3403_v60 = vld [vmem:[%s4348_s1 + $0x1e0] sm:$0xff]  ;;  %v3408_v61 = vld [vmem:[%s4348_s1 + $0x1e8] sm:$0xff] }
  0x16   :  { %4359 = vst [vmem:[#allocation13_spill] sm:$0xff] %v3403_v60  ;;  %v3413_v62 = vld [vmem:[%s4348_s1 + $0x1f0] sm:$0xff]  ;;  %v3418_v63 = vld [vmem:[%s4348_s1 + $0x1f8] sm:$0xff] }
  0x17   :  { %4360 = vst [vmem:[#allocation14_spill] sm:$0xff] %v3413_v62  ;;  %4361 = vst [vmem:[#allocation15_spill] sm:$0xff] %v3418_v63 }
  0x18   :  { %193 = vsyncadd [#allocation5], 8192  ;;  %v3423_v58 = vld [vmem:[%s4349_s2] sm:$0xff]  ;;  %v3428_v60 = vld [vmem:[%s4349_s2 + $0x8] sm:$0xff] }
  0x19   :  { %4362 = vst [vmem:[#allocation16_spill] sm:$0xff] %v3423_v58  ;;  %4363 = vst [vmem:[#allocation17_spill] sm:$0xff] %v3428_v60  ;;  %v3433_v62 = vld [vmem:[%s4349_s2 + $0x10] sm:$0xff]  ;;  %v3438_v56 = vld [vmem:[%s4349_s2 + $0x18] sm:$0xff] }
  0x1a   :  { %4364 = vst [vmem:[#allocation18_spill] sm:$0xff] %v3433_v62  ;;  %4365 = vst [vmem:[#allocation19_spill] sm:$0xff] %v3438_v56  ;;  %v3443_v63 = vld [vmem:[%s4349_s2 + $0x20] sm:$0xff]  ;;  %v3448_v58 = vld [vmem:[%s4349_s2 + $0x28] sm:$0xff] }
  0x1b   :  { %4366 = vst [vmem:[#allocation20_spill] sm:$0xff] %v3443_v63  ;;  %4367 = vst [vmem:[#allocation21_spill] sm:$0xff] %v3448_v58  ;;  %v3453_v60 = vld [vmem:[%s4349_s2 + $0x30] sm:$0xff]  ;;  %v3458_v62 = vld [vmem:[%s4349_s2 + $0x38] sm:$0xff] }
  0x1c   :  { %4368 = vst [vmem:[#allocation22_spill] sm:$0xff] %v3453_v60  ;;  %4369 = vst [vmem:[#allocation23_spill] sm:$0xff] %v3458_v62  ;;  %v3463_v56 = vld [vmem:[%s4349_s2 + $0x40] sm:$0xff]  ;;  %v3468_v63 = vld [vmem:[%s4349_s2 + $0x48] sm:$0xff] }
  0x1d   :  { %4370 = vst [vmem:[#allocation24_spill] sm:$0xff] %v3463_v56  ;;  %4371 = vst [vmem:[#allocation25_spill] sm:$0xff] %v3468_v63  ;;  %v3473_v58 = vld [vmem:[%s4349_s2 + $0x50] sm:$0xff]  ;;  %v3478_v60 = vld [vmem:[%s4349_s2 + $0x58] sm:$0xff] }
  0x1e   :  { %4372 = vst [vmem:[#allocation26_spill] sm:$0xff] %v3473_v58  ;;  %4373 = vst [vmem:[#allocation27_spill] sm:$0xff] %v3478_v60  ;;  %v3483_v62 = vld [vmem:[%s4349_s2 + $0x60] sm:$0xff]  ;;  %v3488_v56 = vld [vmem:[%s4349_s2 + $0x68] sm:$0xff] }
  0x1f   :  { %4374 = vst [vmem:[#allocation28_spill] sm:$0xff] %v3483_v62  ;;  %4375 = vst [vmem:[#allocation29_spill] sm:$0xff] %v3488_v56  ;;  %v3493_v63 = vld [vmem:[%s4349_s2 + $0x70] sm:$0xff]  ;;  %v3498_v58 = vld [vmem:[%s4349_s2 + $0x78] sm:$0xff] }
  0x20   :  { %4376 = vst [vmem:[#allocation30_spill] sm:$0xff] %v3493_v63  ;;  %4377 = vst [vmem:[#allocation31_spill] sm:$0xff] %v3498_v58  ;;  %v3503_v60 = vld [vmem:[%s4349_s2 + $0x80] sm:$0xff]  ;;  %v3508_v62 = vld [vmem:[%s4349_s2 + $0x88] sm:$0xff] }
  0x21   :  { %4378 = vst [vmem:[#allocation32_spill] sm:$0xff] %v3503_v60  ;;  %4379 = vst [vmem:[#allocation33_spill] sm:$0xff] %v3508_v62  ;;  %v3513_v56 = vld [vmem:[%s4349_s2 + $0x90] sm:$0xff]  ;;  %v3518_v63 = vld [vmem:[%s4349_s2 + $0x98] sm:$0xff] }
  0x22   :  { %4380 = vst [vmem:[#allocation34_spill] sm:$0xff] %v3513_v56  ;;  %4381 = vst [vmem:[#allocation35_spill] sm:$0xff] %v3518_v63  ;;  %v3523_v58 = vld [vmem:[%s4349_s2 + $0xa0] sm:$0xff]  ;;  %v3528_v60 = vld [vmem:[%s4349_s2 + $0xa8] sm:$0xff] }
  0x23   :  { %4382 = vst [vmem:[#allocation36_spill] sm:$0xff] %v3523_v58  ;;  %4383 = vst [vmem:[#allocation37_spill] sm:$0xff] %v3528_v60  ;;  %v3533_v62 = vld [vmem:[%s4349_s2 + $0xb0] sm:$0xff]  ;;  %v3538_v56 = vld [vmem:[%s4349_s2 + $0xb8] sm:$0xff] }
  0x24   :  { %4384 = vst [vmem:[#allocation38_spill] sm:$0xff] %v3533_v62  ;;  %4385 = vst [vmem:[#allocation39_spill] sm:$0xff] %v3538_v56  ;;  %v3543_v63 = vld [vmem:[%s4349_s2 + $0xc0] sm:$0xff]  ;;  %v3548_v58 = vld [vmem:[%s4349_s2 + $0xc8] sm:$0xff] }
  0x25   :  { %4386 = vst [vmem:[#allocation40_spill] sm:$0xff] %v3543_v63  ;;  %4387 = vst [vmem:[#allocation41_spill] sm:$0xff] %v3548_v58  ;;  %v3553_v60 = vld [vmem:[%s4349_s2 + $0xd0] sm:$0xff]  ;;  %v3558_v62 = vld [vmem:[%s4349_s2 + $0xd8] sm:$0xff] }
  0x26   :  { %4388 = vst [vmem:[#allocation42_spill] sm:$0xff] %v3553_v60  ;;  %4389 = vst [vmem:[#allocation43_spill] sm:$0xff] %v3558_v62  ;;  %v3563_v56 = vld [vmem:[%s4349_s2 + $0xe0] sm:$0xff]  ;;  %v3568_v63 = vld [vmem:[%s4349_s2 + $0xe8] sm:$0xff] }
  0x27   :  { %4390 = vst [vmem:[#allocation44_spill] sm:$0xff] %v3563_v56  ;;  %4391 = vst [vmem:[#allocation45_spill] sm:$0xff] %v3568_v63  ;;  %v3573_v58 = vld [vmem:[%s4349_s2 + $0xf0] sm:$0xff]  ;;  %v3578_v60 = vld [vmem:[%s4349_s2 + $0xf8] sm:$0xff] }
  0x28   :  { %4392 = vst [vmem:[#allocation46_spill] sm:$0xff] %v3573_v58  ;;  %4393 = vst [vmem:[#allocation47_spill] sm:$0xff] %v3578_v60  ;;  %v3583_v62 = vld [vmem:[%s4349_s2 + $0x100] sm:$0xff]  ;;  %v3588_v56 = vld [vmem:[%s4349_s2 + $0x108] sm:$0xff] }
  0x29   :  { %4394 = vst [vmem:[#allocation48_spill] sm:$0xff] %v3583_v62  ;;  %4395 = vst [vmem:[#allocation49_spill] sm:$0xff] %v3588_v56  ;;  %v3593_v63 = vld [vmem:[%s4349_s2 + $0x110] sm:$0xff]  ;;  %v3598_v58 = vld [vmem:[%s4349_s2 + $0x118] sm:$0xff] }
  0x2a   :  { %4396 = vst [vmem:[#allocation50_spill] sm:$0xff] %v3593_v63  ;;  %4397 = vst [vmem:[#allocation51_spill] sm:$0xff] %v3598_v58  ;;  %v3603_v60 = vld [vmem:[%s4349_s2 + $0x120] sm:$0xff]  ;;  %v3608_v62 = vld [vmem:[%s4349_s2 + $0x128] sm:$0xff] }
  0x2b   :  { %4398 = vst [vmem:[#allocation52_spill] sm:$0xff] %v3603_v60  ;;  %4399 = vst [vmem:[#allocation53_spill] sm:$0xff] %v3608_v62  ;;  %v3613_v56 = vld [vmem:[%s4349_s2 + $0x130] sm:$0xff]  ;;  %v3618_v63 = vld [vmem:[%s4349_s2 + $0x138] sm:$0xff] }
  0x2c   :  { %4400 = vst [vmem:[#allocation54_spill] sm:$0xff] %v3613_v56  ;;  %4401 = vst [vmem:[#allocation55_spill] sm:$0xff] %v3618_v63  ;;  %v3623_v58 = vld [vmem:[%s4349_s2 + $0x140] sm:$0xff]  ;;  %v3628_v60 = vld [vmem:[%s4349_s2 + $0x148] sm:$0xff] }
  0x2d   :  { %4402 = vst [vmem:[#allocation56_spill] sm:$0xff] %v3623_v58  ;;  %4403 = vst [vmem:[#allocation57_spill] sm:$0xff] %v3628_v60  ;;  %v3633_v62 = vld [vmem:[%s4349_s2 + $0x150] sm:$0xff]  ;;  %v3638_v56 = vld [vmem:[%s4349_s2 + $0x158] sm:$0xff] }
  0x2e   :  { %4404 = vst [vmem:[#allocation58_spill] sm:$0xff] %v3633_v62  ;;  %4405 = vst [vmem:[#allocation59_spill] sm:$0xff] %v3638_v56  ;;  %v3643_v63 = vld [vmem:[%s4349_s2 + $0x160] sm:$0xff]  ;;  %v3648_v58 = vld [vmem:[%s4349_s2 + $0x168] sm:$0xff] }
  0x2f   :  { %4406 = vst [vmem:[#allocation60_spill] sm:$0xff] %v3643_v63  ;;  %4407 = vst [vmem:[#allocation61_spill] sm:$0xff] %v3648_v58  ;;  %v3653_v60 = vld [vmem:[%s4349_s2 + $0x170] sm:$0xff]  ;;  %v3658_v62 = vld [vmem:[%s4349_s2 + $0x178] sm:$0xff] }
  0x30   :  { %4408 = vst [vmem:[#allocation62_spill] sm:$0xff] %v3653_v60  ;;  %4409 = vst [vmem:[#allocation63_spill] sm:$0xff] %v3658_v62  ;;  %v3663_v56 = vld [vmem:[%s4349_s2 + $0x180] sm:$0xff]  ;;  %v3668_v63 = vld [vmem:[%s4349_s2 + $0x188] sm:$0xff] }
  0x31   :  { %4410 = vst [vmem:[#allocation64_spill] sm:$0xff] %v3663_v56  ;;  %4411 = vst [vmem:[#allocation65_spill] sm:$0xff] %v3668_v63  ;;  %v3673_v58 = vld [vmem:[%s4349_s2 + $0x190] sm:$0xff]  ;;  %v3678_v60 = vld [vmem:[%s4349_s2 + $0x198] sm:$0xff] }
  0x32   :  { %4412 = vst [vmem:[#allocation66_spill] sm:$0xff] %v3673_v58  ;;  %4413 = vst [vmem:[#allocation67_spill] sm:$0xff] %v3678_v60  ;;  %v3683_v62 = vld [vmem:[%s4349_s2 + $0x1a0] sm:$0xff]  ;;  %v3688_v56 = vld [vmem:[%s4349_s2 + $0x1a8] sm:$0xff] }
  0x33   :  { %4414 = vst [vmem:[#allocation68_spill] sm:$0xff] %v3683_v62  ;;  %4415 = vst [vmem:[#allocation69_spill] sm:$0xff] %v3688_v56  ;;  %v3693_v63 = vld [vmem:[%s4349_s2 + $0x1b0] sm:$0xff]  ;;  %v3698_v58 = vld [vmem:[%s4349_s2 + $0x1b8] sm:$0xff] }
  0x34   :  { %4416 = vst [vmem:[#allocation70_spill] sm:$0xff] %v3693_v63  ;;  %4417 = vst [vmem:[#allocation71_spill] sm:$0xff] %v3698_v58  ;;  %v3703_v60 = vld [vmem:[%s4349_s2 + $0x1c0] sm:$0xff]  ;;  %v3708_v62 = vld [vmem:[%s4349_s2 + $0x1c8] sm:$0xff] }
  0x35   :  { %4418 = vst [vmem:[#allocation72_spill] sm:$0xff] %v3703_v60  ;;  %4419 = vst [vmem:[#allocation73_spill] sm:$0xff] %v3708_v62  ;;  %v3713_v56 = vld [vmem:[%s4349_s2 + $0x1d0] sm:$0xff]  ;;  %v3718_v63 = vld [vmem:[%s4349_s2 + $0x1d8] sm:$0xff] }
  0x36   :  { %4420 = vst [vmem:[#allocation74_spill] sm:$0xff] %v3713_v56  ;;  %4421 = vst [vmem:[#allocation75_spill] sm:$0xff] %v3718_v63  ;;  %v3723_v58 = vld [vmem:[%s4349_s2 + $0x1e0] sm:$0xff]  ;;  %v3728_v60 = vld [vmem:[%s4349_s2 + $0x1e8] sm:$0xff] }
  0x37   :  { %4422 = vst [vmem:[#allocation76_spill] sm:$0xff] %v3723_v58  ;;  %4423 = vst [vmem:[#allocation77_spill] sm:$0xff] %v3728_v60  ;;  %v3733_v62 = vld [vmem:[%s4349_s2 + $0x1f0] sm:$0xff]  ;;  %v3738_v56 = vld [vmem:[%s4349_s2 + $0x1f8] sm:$0xff] }
  0x38   :  { %4424 = vst [vmem:[#allocation78_spill] sm:$0xff] %v3733_v62  ;;  %4425 = vst [vmem:[#allocation79_spill] sm:$0xff] %v3738_v56 }
  0x39   :  { %362 = vsyncadd [#allocation5 + $0x1], 8192 }
  0x3a   :  { %3050 = dma.done.wait [#allocation5], 8192 }
  0x3b   :  { %3051 = vsyncadd [#allocation5], 4294959104  ;;  %v2281_v58 = vpack.c.bf16 %v3128_v5, %v3108_v1  ;;  %v2313_v63 = vpack.c.bf16 %v3138_v7, %v3118_v3  ;;  %v2283_v60 = vpack.c.bf16 %v3123_v4, %v3103_v0  ;;  %v2315_v62 = vpack.c.bf16 %v3133_v6, %v3113_v2 }
  0x3c   :  { %3052 = dma.done.wait [#allocation5 + $0x1], 8192 }
  0x3d   :  { %3053 = vsyncadd [#allocation5 + $0x1], 4294959104  ;;  %v2285_v56 = vpack.c.bf16 %v3168_v13, %v3148_v9  ;;  %v2317_v59 = vpack.c.bf16 %v3178_v15, %v3158_v11  ;;  %2282 = vmatprep.subr.bf16.mxu0 %v2281_v58  ;;  %2314 = vmatprep.subr.bf16.mxu1 %v2313_v63  ;;  %v2287_v1 = vpack.c.bf16 %v3163_v12, %v3143_v8  ;;  %v3054_v4 = vmov 0.0   ;;  %v4451_v63 = vld [vmem:[#allocation39_spill] sm:$0xff] }
  0x3e   :  { %2284 = vmatpush1.bf16.msra.mxu0 %v2283_v60  ;;  %2316 = vmatpush1.bf16.msra.mxu1 %v2315_v62  ;;  %v2319_v0 = vpack.c.bf16 %v3173_v14, %v3153_v10  ;;  %v2289_v2 = vpack.c.bf16 %v3208_v21, %v3188_v17  ;;  %v2321_v3 = vpack.c.bf16 %v3218_v23, %v3198_v19  ;;  %v4449_v60 = vld [vmem:[#allocation37_spill] sm:$0xff]  ;;  %v4450_v62 = vld [vmem:[#allocation35_spill] sm:$0xff] }
  0x3f   :  { %2286 = vmatprep.subr.bf16.mxu0 %v2285_v56  ;;  %2318 = vmatprep.subr.bf16.mxu1 %v2317_v59  ;;  %v2291_v5 = vpack.c.bf16 %v3203_v20, %v3183_v16  ;;  %v2323_v6 = vpack.c.bf16 %v3213_v22, %v3193_v18  ;;  %v2293_v7 = vpack.c.bf16 %v3248_v29, %v3228_v25  ;;  %v4427_v25 = vld [vmem:[#allocation15_spill] sm:$0xff]  ;;  %v4446_v56 = vld [vmem:[#allocation26_spill] sm:$0xff]  ;;  %v4448_v59 = vld [vmem:[#allocation33_spill] sm:$0xff] }
  0x40   :  { %531 = vmatprep.mubr.f32.mxu0 %v3054_v4  ;;  %644 = vmatprep.mubr.f32.mxu1 %v3054_v4  ;;  %v2325_v8 = vpack.c.bf16 %v3258_v31, %v3238_v27  ;;  %v2295_v9 = vpack.c.bf16 %v3243_v28, %v3223_v24  ;;  %v2327_v10 = vpack.c.bf16 %v3253_v30, %v3233_v26  ;;  %v4426_v24 = vld [vmem:[#allocation12_spill] sm:$0xff]  ;;  %v4428_v27 = vld [vmem:[#allocation10_spill] sm:$0xff]  ;;  %v4429_v28 = vld [vmem:[#allocation13_spill] sm:$0xff] }
  0x41   :  { %v2297_v11 = vpack.c.bf16 %v3288_v37, %v3268_v33  ;;  %v2329_v12 = vpack.c.bf16 %v3298_v39, %v3278_v35  ;;  %v2299_v13 = vpack.c.bf16 %v3283_v36, %v3263_v32  ;;  %v2331_v14 = vpack.c.bf16 %v3293_v38, %v3273_v34  ;;  %v4430_v30 = vld [vmem:[#allocation11_spill] sm:$0xff]  ;;  %v4431_v31 = vld [vmem:[#allocation14_spill] sm:$0xff]  ;;  %v4432_v33 = vld [vmem:[#allocation17_spill] sm:$0xff] }
  0x42   :  { %2288 = vmatpush1.bf16.msra.mxu0 %v2287_v1  ;;  %2320 = vmatpush1.bf16.msra.mxu1 %v2319_v0  ;;  %v2301_v15 = vpack.c.bf16 %v3328_v45, %v3308_v41  ;;  %v2333_v16 = vpack.c.bf16 %v3338_v47, %v3318_v43  ;;  %v2303_v17 = vpack.c.bf16 %v3323_v44, %v3303_v40  ;;  %v4433_v34 = vld [vmem:[#allocation21_spill] sm:$0xff]  ;;  %v4434_v36 = vld [vmem:[#allocation19_spill] sm:$0xff]  ;;  %v437_v39 = vld [vmem:[%s4347_s0] sm:$0xff] }
  0x43   :  { %2290 = vmatprep.subr.bf16.mxu0 %v2289_v2  ;;  %2322 = vmatprep.subr.bf16.mxu1 %v2321_v3  ;;  %v2335_v18 = vpack.c.bf16 %v3333_v46, %v3313_v42  ;;  %v2305_v19 = vpack.c.bf16 %v3368_v53, %v3348_v49  ;;  %v2337_v20 = vpack.c.bf16 %v3378_v55, %v3358_v51  ;;  %v4435_v37 = vld [vmem:[#allocation23_spill] sm:$0xff]  ;;  %v4436_v40 = vld [vmem:[#allocation16_spill] sm:$0xff]  ;;  %v4438_v43 = vld [vmem:[#allocation18_spill] sm:$0xff] }
  0x44   :  { %v2307_v21 = vpack.c.bf16 %v3363_v52, %v3343_v48  ;;  %v2339_v22 = vpack.c.bf16 %v3373_v54, %v3353_v50  ;;  %v2309_v23 = vpack.c.bf16 %v3408_v61, %v3388_v57  ;;  %v2341_v26 = vpack.c.bf16 %v4427_v25, %v4426_v24  ;;  %v4437_v41 = vld [vmem:[#allocation20_spill] sm:$0xff]  ;;  %v4439_v44 = vld [vmem:[#allocation22_spill] sm:$0xff]  ;;  %v4440_v46 = vld [vmem:[#allocation25_spill] sm:$0xff] }
  0x45   :  { %v2311_v29 = vpack.c.bf16 %v4429_v28, %v4428_v27  ;;  %v2343_v32 = vpack.c.bf16 %v4431_v31, %v4430_v30  ;;  %v3808_v35 = vpack.c.bf16 %v4433_v34, %v4432_v33  ;;  %v3812_v38 = vpack.c.bf16 %v4435_v37, %v4434_v36  ;;  %v4441_v47 = vld [vmem:[#allocation29_spill] sm:$0xff]  ;;  %v4442_v49 = vld [vmem:[#allocation27_spill] sm:$0xff]  ;;  %v4444_v53 = vld [vmem:[#allocation24_spill] sm:$0xff] }
  0x46   :  { %2292 = vmatpush1.bf16.msra.mxu0 %v2291_v5  ;;  %2324 = vmatpush1.bf16.msra.mxu1 %v2323_v6  ;;  %v3819_v42 = vpack.c.bf16 %v4437_v41, %v4436_v40  ;;  %v3823_v45 = vpack.c.bf16 %v4439_v44, %v4438_v43  ;;  %v3829_v48 = vpack.c.bf16 %v4441_v47, %v4440_v46  ;;  %v4443_v50 = vld [vmem:[#allocation31_spill] sm:$0xff]  ;;  %v4445_v54 = vld [vmem:[#allocation28_spill] sm:$0xff]  ;;  %v4447_v57 = vld [vmem:[#allocation30_spill] sm:$0xff] }
  0x47   :  { %2294 = vmatprep.subr.bf16.mxu0 %v2293_v7  ;;  %2326 = vmatprep.subr.bf16.mxu1 %v2325_v8  ;;  %v3833_v51 = vpack.c.bf16 %v4443_v50, %v4442_v49  ;;  %v438_v52 = vld [vmem:[%s4347_s0 + $0x8] sm:$0xff]  ;;  %v3842_v55 = vpack.c.bf16 %v4445_v54, %v4444_v53  ;;  %v3846_v58 = vpack.c.bf16 %v4447_v57, %v4446_v56  ;;  %v439_v0 = vld [vmem:[%s4347_s0 + $0x10] sm:$0xff]  ;;  %v4454_v6 = vld [vmem:[#allocation34_spill] sm:$0xff] }
  0x48   :  { %v3854_v61 = vpack.c.bf16 %v4449_v60, %v4448_v59  ;;  %v3858_v1 = vpack.c.bf16 %v4451_v63, %v4450_v62  ;;  %v4452_v2 = vld [vmem:[#allocation32_spill] sm:$0xff]  ;;  %v4455_v7 = vld [vmem:[#allocation38_spill] sm:$0xff]  ;;  %v4466_v25 = vld [vmem:[#allocation51_spill] sm:$0xff] }
  0x49   :  { %v4453_v3 = vld [vmem:[#allocation36_spill] sm:$0xff]  ;;  %v3871_v8 = vpack.c.bf16 %v4455_v7, %v4454_v6  ;;  %v441_v28 = vld [vmem:[%s4347_s0 + $0x20] sm:$0xff]  ;;  %v4472_v36 = vld [vmem:[#allocation57_spill] sm:$0xff] }
  0x4a   :  { %2296 = vmatpush1.bf16.msra.mxu0 %v2295_v9  ;;  %2328 = vmatpush1.bf16.msra.mxu1 %v2327_v10  ;;  %v3867_v5 = vpack.c.bf16 %v4453_v3, %v4452_v2  ;;  %v4456_v9 = vld [vmem:[#allocation41_spill] sm:$0xff]  ;;  %v4469_v30 = vld [vmem:[#allocation52_spill] sm:$0xff]  ;;  %v4471_v33 = vld [vmem:[#allocation54_spill] sm:$0xff] }
  0x4b   :  { %2298 = vmatprep.subr.bf16.mxu0 %v2297_v11  ;;  %2330 = vmatprep.subr.bf16.mxu1 %v2329_v12  ;;  %v4457_v10 = vld [vmem:[#allocation45_spill] sm:$0xff]  ;;  %v4458_v12 = vld [vmem:[#allocation43_spill] sm:$0xff]  ;;  %v4476_v46 = vld [vmem:[#allocation56_spill] sm:$0xff] }
  0x4c   :  { %v3879_v11 = vpack.c.bf16 %v4457_v10, %v4456_v9  ;;  %v4473_v37 = vld [vmem:[#allocation61_spill] sm:$0xff]  ;;  %v4474_v40 = vld [vmem:[#allocation59_spill] sm:$0xff]  ;;  %v4477_v47 = vld [vmem:[#allocation60_spill] sm:$0xff] }
  0x4d   :  { %v4475_v41 = vld [vmem:[#allocation63_spill] sm:$0xff]  ;;  %v3942_v49 = vpack.c.bf16 %v4477_v47, %v4476_v46  ;;  %v4478_v50 = vld [vmem:[#allocation58_spill] sm:$0xff]  ;;  %v4480_v54 = vld [vmem:[#allocation65_spill] sm:$0xff] }
  0x4e   :  { %2300 = vmatpush1.bf16.msra.mxu0 %v2299_v13  ;;  %2332 = vmatpush1.bf16.msra.mxu1 %v2331_v14  ;;  %v4459_v13 = vld [vmem:[#allocation47_spill] sm:$0xff]  ;;  %v3933_v43 = vpack.c.bf16 %v4475_v41, %v4474_v40  ;;  %v4481_v56 = vld [vmem:[#allocation69_spill] sm:$0xff]  ;;  %v443_v63 = vld [vmem:[%s4347_s0 + $0x30] sm:$0xff] }
  0x4f   :  { %2302 = vmatprep.subr.bf16.mxu0 %v2301_v15  ;;  %2334 = vmatprep.subr.bf16.mxu1 %v2333_v16  ;;  %v3883_v14 = vpack.c.bf16 %v4459_v13, %v4458_v12  ;;  %v440_v15 = vld [vmem:[%s4347_s0 + $0x18] sm:$0xff]  ;;  %v4460_v16 = vld [vmem:[#allocation40_spill] sm:$0xff]  ;;  %v442_v44 = vld [vmem:[%s4347_s0 + $0x28] sm:$0xff]  ;;  %v3954_v57 = vpack.c.bf16 %v4481_v56, %v4480_v54 }
  0x50   :  { %v4482_v59 = vld [vmem:[#allocation67_spill] sm:$0xff]  ;;  %v4485_v2 = vld [vmem:[#allocation68_spill] sm:$0xff]  ;;  %v4486_v6 = vld [vmem:[#allocation66_spill] sm:$0xff] }
  0x51   :  { %v4483_v60 = vld [vmem:[#allocation71_spill] sm:$0xff]  ;;  %v4487_v7 = vld [vmem:[#allocation70_spill] sm:$0xff]  ;;  %v4488_v10 = vld [vmem:[#allocation73_spill] sm:$0xff] }
  0x52   :  { %2304 = vmatpush1.bf16.msra.mxu0 %v2303_v17  ;;  %2336 = vmatpush1.bf16.msra.mxu1 %v2335_v18  ;;  %v4461_v17 = vld [vmem:[#allocation44_spill] sm:$0xff]  ;;  %v3958_v62 = vpack.c.bf16 %v4483_v60, %v4482_v59  ;;  %v3971_v9 = vpack.c.bf16 %v4487_v7, %v4486_v6  ;;  %v4489_v12 = vld [vmem:[#allocation77_spill] sm:$0xff] }
  0x53   :  { %2306 = vmatprep.subr.bf16.mxu0 %v2305_v19  ;;  %2338 = vmatprep.subr.bf16.mxu1 %v2337_v20  ;;  %v3892_v18 = vpack.c.bf16 %v4461_v17, %v4460_v16  ;;  %v4462_v19 = vld [vmem:[#allocation42_spill] sm:$0xff]  ;;  %v3979_v13 = vpack.c.bf16 %v4489_v12, %v4488_v10  ;;  %v4491_v16 = vld [vmem:[#allocation79_spill] sm:$0xff] }
  0x54   :  { %v4463_v20 = vld [vmem:[#allocation46_spill] sm:$0xff] }
  0x56   :  { %2308 = vmatpush1.bf16.msra.mxu0 %v2307_v21  ;;  %2340 = vmatpush1.bf16.msra.mxu1 %v2339_v22  ;;  %v3896_v21 = vpack.c.bf16 %v4463_v20, %v4462_v19  ;;  %v4464_v22 = vld [vmem:[#allocation49_spill] sm:$0xff]  ;;  %v4492_v20 = vld [vmem:[#allocation72_spill] sm:$0xff] }
  0x57   :  { %2310 = vmatprep.subr.bf16.mxu0 %v2309_v23  ;;  %2342 = vmatprep.subr.bf16.mxu1 %v2341_v26  ;;  %v4465_v23 = vld [vmem:[#allocation53_spill] sm:$0xff]  ;;  %v4467_v26 = vld [vmem:[#allocation55_spill] sm:$0xff] }
  0x58   :  { %v3904_v24 = vpack.c.bf16 %v4465_v23, %v4464_v22  ;;  %v3908_v27 = vpack.c.bf16 %v4467_v26, %v4466_v25  ;;  %v444_v19 = vld [vmem:[%s4347_s0 + $0x38] sm:$0xff]  ;;  %v4493_v22 = vld [vmem:[#allocation76_spill] sm:$0xff]  ;;  %v4494_v25 = vld [vmem:[#allocation74_spill] sm:$0xff] }
  0x59   :  { %v3992_v23 = vpack.c.bf16 %v4493_v22, %v4492_v20  ;;  %v4495_v26 = vld [vmem:[#allocation78_spill] sm:$0xff] }
  0x5a   :  { %2312 = vmatpush1.bf16.msra.mxu0 %v2311_v29  ;;  %2344 = vmatpush1.bf16.msra.mxu1 %v2343_v32  ;;  %v4468_v29 = vld [vmem:[#allocation48_spill] sm:$0xff]  ;;  %v4470_v32 = vld [vmem:[#allocation50_spill] sm:$0xff] }
  0x5b   :  { %2346 = vmatprep.subr.bf16.mxu0 %v3808_v35  ;;  %2378 = vmatprep.subr.bf16.mxu1 %v3812_v38  ;;  %v3917_v31 = vpack.c.bf16 %v4469_v30, %v4468_v29  ;;  %v3921_v34 = vpack.c.bf16 %v4471_v33, %v4470_v32  ;;  %v369_v29 = vld [vmem:[%s4351_s4] sm:$0xff]  ;;  %v447_v30 = vlaneseq }
  0x5d   :  { %532 = vmatmul.mubr.f32.vlgmr.msra.gmra.mrb[0].mxu0 %v437_v39  ;;  %645 = vmatmul.mubr.f32.vlgmr.msra.gmra.mrb[0].mxu1 %v437_v39  ;;  %v3929_v39 = vpack.c.bf16 %v4473_v37, %v4472_v36  ;;  %v448_v32 = vshrl.u32 %v447_v30, 7  ;;  %v445_v36 = vld [vmem:[%s4350_s3] sm:$0xf] }
  0x5e   :  { %2348 = vmatpush1.bf16.msra.mxu0 %v3819_v42  ;;  %2380 = vmatpush1.bf16.msra.mxu1 %v3823_v45 }
  0x5f   :  { %537 = vmatprep.mubr.f32.mxu0 %v3054_v4  ;;  %650 = vmatprep.mubr.f32.mxu1 %v3054_v4  ;;  %v449_v33 = vsub.s32 0, %v448_v32  ;;  %v453_v37 = vsub.s32 1, %v448_v32 }
  0x60   :  { %2350 = vmatprep.subr.bf16.mxu0 %v3829_v48  ;;  %2382 = vmatprep.subr.bf16.mxu1 %v3833_v51 }
  0x61   :  { %538 = vmatmul.mubr.f32.gmra.mrb[2].mxu0 %v438_v52  ;;  %651 = vmatmul.mubr.f32.gmra.mrb[2].mxu1 %v438_v52  ;;  %v4479_v52 = vld [vmem:[#allocation62_spill] sm:$0xff]  ;;  %v4048_v40 = vrot.slane %v445_v36, %v449_v33  ;;  %v4050_v41 = vrot.slane %v445_v36, %v453_v37 }
  0x62   :  { %2352 = vmatpush1.bf16.msra.mxu0 %v3842_v55  ;;  %2384 = vmatpush1.bf16.msra.mxu1 %v3846_v58  ;;  %v3946_v53 = vpack.c.bf16 %v4479_v52, %v4478_v50  ;;  %v457_v50 = vsub.s32 2, %v448_v32 }
  0x63   :  { %543 = vmatprep.mubr.f32.mxu0 %v3054_v4  ;;  %656 = vmatprep.mubr.f32.mxu1 %v3054_v4 }
  0x64   :  { %2354 = vmatprep.subr.bf16.mxu0 %v3854_v61  ;;  %2386 = vmatprep.subr.bf16.mxu1 %v3858_v1 }
  0x65   :  { %544 = vmatmul.mubr.f32.gmra.mrb[4].mxu0 %v439_v0  ;;  %657 = vmatmul.mubr.f32.gmra.mrb[4].mxu1 %v439_v0  ;;  %v4484_v0 = vld [vmem:[#allocation64_spill] sm:$0xff] }
  0x66   :  { %2356 = vmatpush1.bf16.msra.mxu0 %v3867_v5  ;;  %2388 = vmatpush1.bf16.msra.mxu1 %v3871_v8  ;;  %v3967_v3 = vpack.c.bf16 %v4485_v2, %v4484_v0  ;;  %v4054_v0 = vrot.slane %v445_v36, %v457_v50 }
  0x67   :  { %549 = vmatprep.mubr.f32.mxu0 %v3054_v4  ;;  %662 = vmatprep.mubr.f32.mxu1 %v3054_v4 }
  0x68   :  { %2358 = vmatprep.subr.bf16.mxu0 %v3879_v11  ;;  %2390 = vmatprep.subr.bf16.mxu1 %v3883_v14 }
  0x69   :  { %550 = vmatmul.mubr.f32.gmra.mrb[6].mxu0 %v440_v15  ;;  %663 = vmatmul.mubr.f32.gmra.mrb[6].mxu1 %v440_v15  ;;  %v4490_v15 = vld [vmem:[#allocation75_spill] sm:$0xff] }
  0x6a   :  { %2360 = vmatpush1.bf16.msra.mxu0 %v3892_v18  ;;  %2392 = vmatpush1.bf16.msra.mxu1 %v3896_v21  ;;  %v3983_v17 = vpack.c.bf16 %v4491_v16, %v4490_v15 }
  0x6b   :  { %555 = vmatprep.mubr.f32.mxu0 %v3054_v4  ;;  %668 = vmatprep.mubr.f32.mxu1 %v3054_v4 }
  0x6c   :  { %2362 = vmatprep.subr.bf16.mxu0 %v3904_v24  ;;  %2394 = vmatprep.subr.bf16.mxu1 %v3908_v27 }
  0x6d   :  { %556 = vmatmul.mubr.f32.gmra.mrb[8].mxu0 %v441_v28  ;;  %669 = vmatmul.mubr.f32.gmra.mrb[8].mxu1 %v441_v28  ;;  %v3996_v28 = vpack.c.bf16 %v4495_v26, %v4494_v25  ;;  %v371_v26 = vld [vmem:[%s4352_s5] sm:$0xff] }
  0x6e   :  { %2364 = vmatpush1.bf16.msra.mxu0 %v3917_v31  ;;  %2396 = vmatpush1.bf16.msra.mxu1 %v3921_v34 }
  0x6f   :  { %561 = vmatprep.mubr.f32.mxu0 %v3054_v4  ;;  %674 = vmatprep.mubr.f32.mxu1 %v3054_v4 }
  0x70   :  { %2366 = vmatprep.subr.bf16.mxu0 %v3929_v39  ;;  %2398 = vmatprep.subr.bf16.mxu1 %v3933_v43 }
  0x71   :  { %562 = vmatmul.mubr.f32.gmra.mrb[10].mxu0 %v442_v44  ;;  %675 = vmatmul.mubr.f32.gmra.mrb[10].mxu1 %v442_v44 }
  0x72   :  { %2368 = vmatpush1.bf16.msra.mxu0 %v3942_v49  ;;  %2400 = vmatpush1.bf16.msra.mxu1 %v3946_v53 }
  0x73   :  { %567 = vmatprep.mubr.f32.mxu0 %v3054_v4  ;;  %680 = vmatprep.mubr.f32.mxu1 %v3054_v4 }
  0x74   :  { %2370 = vmatprep.subr.bf16.mxu0 %v3954_v57  ;;  %2402 = vmatprep.subr.bf16.mxu1 %v3958_v62 }
  0x75   :  { %568 = vmatmul.mubr.f32.gmra.mrb[12].mxu0 %v443_v63  ;;  %681 = vmatmul.mubr.f32.gmra.mrb[12].mxu1 %v443_v63  ;;  %v461_v63 = vsub.s32 3, %v448_v32 }
  0x76   :  { %2372 = vmatpush1.bf16.msra.mxu0 %v3967_v3  ;;  %2404 = vmatpush1.bf16.msra.mxu1 %v3971_v9 }
  0x77   :  { %573 = vmatprep.mubr.f32.mxu0 %v3054_v4  ;;  %686 = vmatprep.mubr.f32.mxu1 %v3054_v4  ;;  %v4056_v2 = vrot.slane %v445_v36, %v461_v63 }
  0x78   :  { %2374 = vmatprep.subr.bf16.mxu0 %v3979_v13  ;;  %2406 = vmatprep.subr.bf16.mxu1 %v3983_v17 }
  0x79   :  { %574 = vmatmul.mubr.f32.gmra.mrb[14].mxu0 %v444_v19  ;;  %687 = vmatmul.mubr.f32.gmra.mrb[14].mxu1 %v444_v19 }
  0x7a   :  { %2376 = vmatpush1.bf16.msra.mxu0 %v3992_v23  ;;  %2408 = vmatpush1.bf16.msra.mxu1 %v3996_v28 }
  0x7b   :  { %859 = vmatprep.mubr.f32.mxu0 %v3054_v4  ;;  %930 = vmatprep.mubr.f32.mxu1 %v3054_v4 }
  0x7c   :  { %2410 = vmatprep.subr.bf16.mxu0 %v3808_v35  ;;  %2442 = vmatprep.subr.bf16.mxu1 %v3812_v38 }
  0x7d   :  { %860 = vmatmul.mubr.f32.vlgmr.msra.gmra.mrb[0].mxu0 %v369_v29  ;;  %931 = vmatmul.mubr.f32.vlgmr.msra.gmra.mrb[0].mxu1 %v369_v29 }
  0x7e   :  { %2412 = vmatpush1.bf16.msra.mxu0 %v3819_v42  ;;  %2444 = vmatpush1.bf16.msra.mxu1 %v3823_v45 }
  0x7f   :  { %2414 = vmatprep.subr.bf16.mxu0 %v3829_v48  ;;  %2446 = vmatprep.subr.bf16.mxu1 %v3833_v51 }
  0x80   :  { %1035 = vmatprep.mubr.f32.mxu0 %v3054_v4  ;;  %1106 = vmatprep.mubr.f32.mxu1 %v3054_v4 }
  0x82   :  { %2416 = vmatpush1.bf16.msra.mxu0 %v3842_v55  ;;  %2448 = vmatpush1.bf16.msra.mxu1 %v3846_v58 }
  0x83   :  { %2418 = vmatprep.subr.bf16.mxu0 %v3854_v61  ;;  %2450 = vmatprep.subr.bf16.mxu1 %v3858_v1 }
  0x86   :  { %2420 = vmatpush1.bf16.msra.mxu0 %v3867_v5  ;;  %2452 = vmatpush1.bf16.msra.mxu1 %v3871_v8 }
  0x87   :  { %2422 = vmatprep.subr.bf16.mxu0 %v3879_v11  ;;  %2454 = vmatprep.subr.bf16.mxu1 %v3883_v14 }
  0x8a   :  { %2424 = vmatpush1.bf16.msra.mxu0 %v3892_v18  ;;  %2456 = vmatpush1.bf16.msra.mxu1 %v3896_v21 }
  0x8b   :  { %2426 = vmatprep.subr.bf16.mxu0 %v3904_v24  ;;  %2458 = vmatprep.subr.bf16.mxu1 %v3908_v27 }
  0x8e   :  { %2428 = vmatpush1.bf16.msra.mxu0 %v3917_v31  ;;  %2460 = vmatpush1.bf16.msra.mxu1 %v3921_v34 }
  0x8f   :  { %2430 = vmatprep.subr.bf16.mxu0 %v3929_v39  ;;  %2462 = vmatprep.subr.bf16.mxu1 %v3933_v43 }
  0x92   :  { %2432 = vmatpush1.bf16.msra.mxu0 %v3942_v49  ;;  %2464 = vmatpush1.bf16.msra.mxu1 %v3946_v53 }
  0x93   :  { %2434 = vmatprep.subr.bf16.mxu0 %v3954_v57  ;;  %2466 = vmatprep.subr.bf16.mxu1 %v3958_v62 }
  0x96   :  { %2436 = vmatpush1.bf16.msra.mxu0 %v3967_v3  ;;  %2468 = vmatpush1.bf16.msra.mxu1 %v3971_v9 }
  0x97   :  { %2438 = vmatprep.subr.bf16.mxu0 %v3979_v13  ;;  %2470 = vmatprep.subr.bf16.mxu1 %v3983_v17 }
  0x9a   :  { %2440 = vmatpush1.bf16.msra.mxu0 %v3992_v23  ;;  %2472 = vmatpush1.bf16.msra.mxu1 %v3996_v28 }
  0x9b   :  { %2474 = vmatprep.subr.bf16.mxu0 %v3808_v35  ;;  %2506 = vmatprep.subr.bf16.mxu1 %v3812_v38 }
 0x150   :  { %v861_v44 = vpop.f32.mrb[0].mxu0  ;;  %v932_v46 = vpop.f32.mrb[0].mxu1 }
 0x151   :  { %v2857_v47 = vadd.f32 %v861_v44, %v4048_v40  ;;  %v863_v52 = vpop.f32.mrb[1].mxu0  ;;  %v934_v54 = vpop.f32.mrb[1].mxu1  ;;  %v2873_v6 = vadd.f32 %v932_v46, %v4054_v0 }
 0x152   :  { %v2858_v56 = vadd.f32 %v863_v52, %v4050_v41  ;;  %v2874_v7 = vadd.f32 %v934_v54, %v4056_v2 }
 0x153   :  { %v2248_v59 = vmul.f32 -1.442695, %v2857_v47  ;;  %v2250_v10 = vmul.f32 -1.442695, %v2873_v6 }
 0x154   :  { %v2249_v60 = vmul.f32 -1.442695, %v2858_v56 }
 0x155   :  { %2922 = vpow2.f32 %v2248_v59 }
 0x156   :  { %2924 = vpow2.f32 %v2249_v60 }
 0x157   :  { %2926 = vtanh.f32 %v2874_v7 }
 0x158   :  { %2928 = vpow2.f32 %v2250_v10 }
 0x15f   :  { %v2923_v12 = vpop.eup %2922 }
 0x160   :  { %v950_v15 = vadd.f32 1.0, %v2923_v12  ;;  %v2925_v16 = vpop.eup %2924 }
 0x161   :  { %v951_v19 = vadd.f32 1.0, %v2925_v16  ;;  %v2927_v20 = vpop.eup %2926 }
 0x162   :  { %2930 = vrcp.f32 %v950_v15  ;;  %v2929_v22 = vpop.eup %2928 }
 0x163   :  { %2932 = vrcp.f32 %v951_v19  ;;  %v952_v32 = vadd.f32 1.0, %v2929_v22 }
 0x165   :  { %2934 = vrcp.f32 %v952_v32 }
 0x16c   :  { %v2931_v25 = vpop.eup %2930 }
 0x16d   :  { %v961_v29 = vmul.f32 %v2931_v25, %v2927_v20  ;;  %v2933_v30 = vpop.eup %2932 }
 0x16e   :  { %v960_v33 = vmul.f32 %v2933_v30, %v371_v26 }
 0x16f   :  { %v2935_v37 = vpop.eup %2934 }
 0x170   :  { %v4063_v36 = vadd.f32 %v961_v29, %v960_v33 }
 0x172   :  { %2936 = vtanh.f32 %v4063_v36 }
 0x17c   :  { %v2937_v44 = vpop.eup %2936 }
 0x17d   :  { %v964_v46 = vmul.f32 %v2937_v44, %v2935_v37 }
 0x17f   :  { %965 = vst [vmem:[%s4353_s6] sm:$0xff] %v964_v46  ;;  %1036 = vmatmul.mubr.f32.vlgmr.msra.gmra.mrb[2].mxu0 %v964_v46  ;;  %1107 = vmatmul.mubr.f32.vlgmr.msra.gmra.mrb[2].mxu1 %v964_v46 }
 0x180   :  { %2476 = vmatpush1.bf16.msra.mxu0 %v3819_v42  ;;  %2508 = vmatpush1.bf16.msra.mxu1 %v3823_v45 }
 0x181   :  { %2478 = vmatprep.subr.bf16.mxu0 %v3829_v48  ;;  %2510 = vmatprep.subr.bf16.mxu1 %v3833_v51 }
 0x182   :  { %1212 = vmatprep.mubr.f32.mxu0 %v3054_v4  ;;  %1283 = vmatprep.mubr.f32.mxu1 %v3054_v4 }
 0x184   :  { %2480 = vmatpush1.bf16.msra.mxu0 %v3842_v55  ;;  %2512 = vmatpush1.bf16.msra.mxu1 %v3846_v58 }
 0x185   :  { %2482 = vmatprep.subr.bf16.mxu0 %v3854_v61  ;;  %2514 = vmatprep.subr.bf16.mxu1 %v3858_v1 }
 0x188   :  { %2484 = vmatpush1.bf16.msra.mxu0 %v3867_v5  ;;  %2516 = vmatpush1.bf16.msra.mxu1 %v3871_v8 }
 0x189   :  { %2486 = vmatprep.subr.bf16.mxu0 %v3879_v11  ;;  %2518 = vmatprep.subr.bf16.mxu1 %v3883_v14 }
 0x18c   :  { %2488 = vmatpush1.bf16.msra.mxu0 %v3892_v18  ;;  %2520 = vmatpush1.bf16.msra.mxu1 %v3896_v21 }
 0x18d   :  { %2490 = vmatprep.subr.bf16.mxu0 %v3904_v24  ;;  %2522 = vmatprep.subr.bf16.mxu1 %v3908_v27 }
 0x190   :  { %2492 = vmatpush1.bf16.msra.mxu0 %v3917_v31  ;;  %2524 = vmatpush1.bf16.msra.mxu1 %v3921_v34 }
 0x191   :  { %2494 = vmatprep.subr.bf16.mxu0 %v3929_v39  ;;  %2526 = vmatprep.subr.bf16.mxu1 %v3933_v43 }
 0x194   :  { %2496 = vmatpush1.bf16.msra.mxu0 %v3942_v49  ;;  %2528 = vmatpush1.bf16.msra.mxu1 %v3946_v53 }
 0x195   :  { %2498 = vmatprep.subr.bf16.mxu0 %v3954_v57  ;;  %2530 = vmatprep.subr.bf16.mxu1 %v3958_v62 }
 0x198   :  { %2500 = vmatpush1.bf16.msra.mxu0 %v3967_v3  ;;  %2532 = vmatpush1.bf16.msra.mxu1 %v3971_v9 }
 0x199   :  { %2502 = vmatprep.subr.bf16.mxu0 %v3979_v13  ;;  %2534 = vmatprep.subr.bf16.mxu1 %v3983_v17 }
 0x19c   :  { %2504 = vmatpush1.bf16.msra.mxu0 %v3992_v23  ;;  %2536 = vmatpush1.bf16.msra.mxu1 %v3996_v28 }
 0x19d   :  { %2538 = vmatprep.subr.bf16.mxu0 %v3808_v35  ;;  %2570 = vmatprep.subr.bf16.mxu1 %v3812_v38 }
 0x252   :  { %v1037_v47 = vpop.f32.mrb[2].mxu0  ;;  %v1108_v50 = vpop.f32.mrb[2].mxu1 }
 0x253   :  { %v2859_v52 = vadd.f32 %v1037_v47, %v4048_v40  ;;  %v1039_v54 = vpop.f32.mrb[3].mxu0  ;;  %v1110_v56 = vpop.f32.mrb[3].mxu1  ;;  %v2875_v6 = vadd.f32 %v1108_v50, %v4054_v0 }
 0x254   :  { %v2860_v59 = vadd.f32 %v1039_v54, %v4050_v41  ;;  %v2876_v7 = vadd.f32 %v1110_v56, %v4056_v2 }
 0x255   :  { %v2251_v60 = vmul.f32 -1.442695, %v2859_v52  ;;  %v2253_v10 = vmul.f32 -1.442695, %v2875_v6 }
 0x256   :  { %v2252_v63 = vmul.f32 -1.442695, %v2860_v59 }
 0x257   :  { %2938 = vpow2.f32 %v2251_v60 }
 0x258   :  { %2940 = vpow2.f32 %v2252_v63 }
 0x259   :  { %2942 = vtanh.f32 %v2876_v7 }
 0x25a   :  { %2944 = vpow2.f32 %v2253_v10 }
 0x261   :  { %v2939_v12 = vpop.eup %2938 }
 0x262   :  { %v1126_v15 = vadd.f32 1.0, %v2939_v12  ;;  %v2941_v16 = vpop.eup %2940 }
 0x263   :  { %v1127_v19 = vadd.f32 1.0, %v2941_v16  ;;  %v2943_v20 = vpop.eup %2942 }
 0x264   :  { %2946 = vrcp.f32 %v1126_v15  ;;  %v2945_v22 = vpop.eup %2944 }
 0x265   :  { %2948 = vrcp.f32 %v1127_v19  ;;  %v1128_v30 = vadd.f32 1.0, %v2945_v22 }
 0x267   :  { %2950 = vrcp.f32 %v1128_v30 }
 0x26e   :  { %v2947_v25 = vpop.eup %2946 }
 0x26f   :  { %v1137_v26 = vmul.f32 %v2947_v25, %v2943_v20  ;;  %v2949_v29 = vpop.eup %2948 }
 0x270   :  { %v1136_v32 = vmul.f32 %v2949_v29, %v4063_v36 }
 0x271   :  { %v2951_v37 = vpop.eup %2950 }
 0x272   :  { %v4108_v33 = vadd.f32 %v1137_v26, %v1136_v32 }
 0x274   :  { %2952 = vtanh.f32 %v4108_v33 }
 0x27e   :  { %v2953_v44 = vpop.eup %2952 }
 0x27f   :  { %v1140_v46 = vmul.f32 %v2953_v44, %v2951_v37 }
 0x281   :  { %2254 = vst [vmem:[%s4353_s6 + $0x8] sm:$0xff] %v1140_v46  ;;  %1213 = vmatmul.mubr.f32.vlgmr.msra.gmra.mrb[4].mxu0 %v1140_v46  ;;  %1284 = vmatmul.mubr.f32.vlgmr.msra.gmra.mrb[4].mxu1 %v1140_v46 }
 0x282   :  { %2540 = vmatpush1.bf16.msra.mxu0 %v3819_v42  ;;  %2572 = vmatpush1.bf16.msra.mxu1 %v3823_v45 }
 0x283   :  { %2542 = vmatprep.subr.bf16.mxu0 %v3829_v48  ;;  %2574 = vmatprep.subr.bf16.mxu1 %v3833_v51 }
 0x284   :  { %1389 = vmatprep.mubr.f32.mxu0 %v3054_v4  ;;  %1460 = vmatprep.mubr.f32.mxu1 %v3054_v4 }
 0x286   :  { %2544 = vmatpush1.bf16.msra.mxu0 %v3842_v55  ;;  %2576 = vmatpush1.bf16.msra.mxu1 %v3846_v58 }
 0x287   :  { %2546 = vmatprep.subr.bf16.mxu0 %v3854_v61  ;;  %2578 = vmatprep.subr.bf16.mxu1 %v3858_v1 }
 0x28a   :  { %2548 = vmatpush1.bf16.msra.mxu0 %v3867_v5  ;;  %2580 = vmatpush1.bf16.msra.mxu1 %v3871_v8 }
 0x28b   :  { %2550 = vmatprep.subr.bf16.mxu0 %v3879_v11  ;;  %2582 = vmatprep.subr.bf16.mxu1 %v3883_v14 }
 0x28e   :  { %2552 = vmatpush1.bf16.msra.mxu0 %v3892_v18  ;;  %2584 = vmatpush1.bf16.msra.mxu1 %v3896_v21 }
 0x28f   :  { %2554 = vmatprep.subr.bf16.mxu0 %v3904_v24  ;;  %2586 = vmatprep.subr.bf16.mxu1 %v3908_v27 }
 0x292   :  { %2556 = vmatpush1.bf16.msra.mxu0 %v3917_v31  ;;  %2588 = vmatpush1.bf16.msra.mxu1 %v3921_v34 }
 0x293   :  { %2558 = vmatprep.subr.bf16.mxu0 %v3929_v39  ;;  %2590 = vmatprep.subr.bf16.mxu1 %v3933_v43 }
 0x296   :  { %2560 = vmatpush1.bf16.msra.mxu0 %v3942_v49  ;;  %2592 = vmatpush1.bf16.msra.mxu1 %v3946_v53 }
 0x297   :  { %2562 = vmatprep.subr.bf16.mxu0 %v3954_v57  ;;  %2594 = vmatprep.subr.bf16.mxu1 %v3958_v62 }
 0x29a   :  { %2564 = vmatpush1.bf16.msra.mxu0 %v3967_v3  ;;  %2596 = vmatpush1.bf16.msra.mxu1 %v3971_v9 }
 0x29b   :  { %2566 = vmatprep.subr.bf16.mxu0 %v3979_v13  ;;  %2598 = vmatprep.subr.bf16.mxu1 %v3983_v17 }
 0x29e   :  { %2568 = vmatpush1.bf16.msra.mxu0 %v3992_v23  ;;  %2600 = vmatpush1.bf16.msra.mxu1 %v3996_v28 }
 0x29f   :  { %2602 = vmatprep.subr.bf16.mxu0 %v3808_v35  ;;  %2634 = vmatprep.subr.bf16.mxu1 %v3812_v38 }
 0x354   :  { %v1214_v36 = vpop.f32.mrb[4].mxu0  ;;  %v1285_v47 = vpop.f32.mrb[4].mxu1 }
 0x355   :  { %v2861_v50 = vadd.f32 %v1214_v36, %v4048_v40  ;;  %v1216_v52 = vpop.f32.mrb[5].mxu0  ;;  %v1287_v54 = vpop.f32.mrb[5].mxu1  ;;  %v2877_v63 = vadd.f32 %v1285_v47, %v4054_v0 }
 0x356   :  { %v2862_v56 = vadd.f32 %v1216_v52, %v4050_v41  ;;  %v2878_v6 = vadd.f32 %v1287_v54, %v4056_v2 }
 0x357   :  { %v2255_v59 = vmul.f32 -1.442695, %v2861_v50  ;;  %v2257_v7 = vmul.f32 -1.442695, %v2877_v63 }
 0x358   :  { %v2256_v60 = vmul.f32 -1.442695, %v2862_v56 }
 0x359   :  { %2954 = vpow2.f32 %v2255_v59 }
 0x35a   :  { %2956 = vpow2.f32 %v2256_v60 }
 0x35b   :  { %2958 = vtanh.f32 %v2878_v6 }
 0x35c   :  { %2960 = vpow2.f32 %v2257_v7 }
 0x363   :  { %v2955_v10 = vpop.eup %2954 }
 0x364   :  { %v1303_v12 = vadd.f32 1.0, %v2955_v10  ;;  %v2957_v15 = vpop.eup %2956 }
 0x365   :  { %v1304_v16 = vadd.f32 1.0, %v2957_v15  ;;  %v2959_v19 = vpop.eup %2958 }
 0x366   :  { %2962 = vrcp.f32 %v1303_v12  ;;  %v2961_v20 = vpop.eup %2960 }
 0x367   :  { %2964 = vrcp.f32 %v1304_v16  ;;  %v1305_v29 = vadd.f32 1.0, %v2961_v20 }
 0x369   :  { %2966 = vrcp.f32 %v1305_v29 }
 0x370   :  { %v2963_v22 = vpop.eup %2962 }
 0x371   :  { %v1314_v25 = vmul.f32 %v2963_v22, %v2959_v19  ;;  %v2965_v26 = vpop.eup %2964 }
 0x372   :  { %v1313_v30 = vmul.f32 %v2965_v26, %v4108_v33 }
 0x373   :  { %v2967_v37 = vpop.eup %2966 }
 0x374   :  { %v4153_v32 = vadd.f32 %v1314_v25, %v1313_v30 }
 0x376   :  { %2968 = vtanh.f32 %v4153_v32 }
 0x380   :  { %v2969_v44 = vpop.eup %2968 }
 0x381   :  { %v1317_v46 = vmul.f32 %v2969_v44, %v2967_v37 }
 0x383   :  { %2258 = vst [vmem:[%s4353_s6 + $0x10] sm:$0xff] %v1317_v46  ;;  %1390 = vmatmul.mubr.f32.vlgmr.msra.gmra.mrb[6].mxu0 %v1317_v46  ;;  %1461 = vmatmul.mubr.f32.vlgmr.msra.gmra.mrb[6].mxu1 %v1317_v46 }
 0x384   :  { %2604 = vmatpush1.bf16.msra.mxu0 %v3819_v42  ;;  %2636 = vmatpush1.bf16.msra.mxu1 %v3823_v45 }
 0x385   :  { %2606 = vmatprep.subr.bf16.mxu0 %v3829_v48  ;;  %2638 = vmatprep.subr.bf16.mxu1 %v3833_v51 }
 0x386   :  { %1566 = vmatprep.mubr.f32.mxu0 %v3054_v4  ;;  %1637 = vmatprep.mubr.f32.mxu1 %v3054_v4 }
 0x388   :  { %2608 = vmatpush1.bf16.msra.mxu0 %v3842_v55  ;;  %2640 = vmatpush1.bf16.msra.mxu1 %v3846_v58 }
 0x389   :  { %2610 = vmatprep.subr.bf16.mxu0 %v3854_v61  ;;  %2642 = vmatprep.subr.bf16.mxu1 %v3858_v1 }
 0x38c   :  { %2612 = vmatpush1.bf16.msra.mxu0 %v3867_v5  ;;  %2644 = vmatpush1.bf16.msra.mxu1 %v3871_v8 }
 0x38d   :  { %2614 = vmatprep.subr.bf16.mxu0 %v3879_v11  ;;  %2646 = vmatprep.subr.bf16.mxu1 %v3883_v14 }
 0x390   :  { %2616 = vmatpush1.bf16.msra.mxu0 %v3892_v18  ;;  %2648 = vmatpush1.bf16.msra.mxu1 %v3896_v21 }
 0x391   :  { %2618 = vmatprep.subr.bf16.mxu0 %v3904_v24  ;;  %2650 = vmatprep.subr.bf16.mxu1 %v3908_v27 }
 0x394   :  { %2620 = vmatpush1.bf16.msra.mxu0 %v3917_v31  ;;  %2652 = vmatpush1.bf16.msra.mxu1 %v3921_v34 }
 0x395   :  { %2622 = vmatprep.subr.bf16.mxu0 %v3929_v39  ;;  %2654 = vmatprep.subr.bf16.mxu1 %v3933_v43 }
 0x398   :  { %2624 = vmatpush1.bf16.msra.mxu0 %v3942_v49  ;;  %2656 = vmatpush1.bf16.msra.mxu1 %v3946_v53 }
 0x399   :  { %2626 = vmatprep.subr.bf16.mxu0 %v3954_v57  ;;  %2658 = vmatprep.subr.bf16.mxu1 %v3958_v62 }
 0x39c   :  { %2628 = vmatpush1.bf16.msra.mxu0 %v3967_v3  ;;  %2660 = vmatpush1.bf16.msra.mxu1 %v3971_v9 }
 0x39d   :  { %2630 = vmatprep.subr.bf16.mxu0 %v3979_v13  ;;  %2662 = vmatprep.subr.bf16.mxu1 %v3983_v17 }
 0x3a0   :  { %2632 = vmatpush1.bf16.msra.mxu0 %v3992_v23  ;;  %2664 = vmatpush1.bf16.msra.mxu1 %v3996_v28 }
 0x3a1   :  { %2666 = vmatprep.subr.bf16.mxu0 %v3808_v35  ;;  %2698 = vmatprep.subr.bf16.mxu1 %v3812_v38 }
 0x456   :  { %v1391_v33 = vpop.f32.mrb[6].mxu0  ;;  %v1462_v36 = vpop.f32.mrb[6].mxu1 }
 0x457   :  { %v2863_v47 = vadd.f32 %v1391_v33, %v4048_v40  ;;  %v1393_v50 = vpop.f32.mrb[7].mxu0  ;;  %v1464_v52 = vpop.f32.mrb[7].mxu1  ;;  %v2879_v60 = vadd.f32 %v1462_v36, %v4054_v0 }
 0x458   :  { %v2864_v54 = vadd.f32 %v1393_v50, %v4050_v41  ;;  %v2880_v63 = vadd.f32 %v1464_v52, %v4056_v2 }
 0x459   :  { %v2259_v56 = vmul.f32 -1.442695, %v2863_v47  ;;  %v2261_v6 = vmul.f32 -1.442695, %v2879_v60 }
 0x45a   :  { %v2260_v59 = vmul.f32 -1.442695, %v2864_v54 }
 0x45b   :  { %2970 = vpow2.f32 %v2259_v56 }
 0x45c   :  { %2972 = vpow2.f32 %v2260_v59 }
 0x45d   :  { %2974 = vtanh.f32 %v2880_v63 }
 0x45e   :  { %2976 = vpow2.f32 %v2261_v6 }
 0x465   :  { %v2971_v7 = vpop.eup %2970 }
 0x466   :  { %v1480_v10 = vadd.f32 1.0, %v2971_v7  ;;  %v2973_v12 = vpop.eup %2972 }
 0x467   :  { %v1481_v15 = vadd.f32 1.0, %v2973_v12  ;;  %v2975_v16 = vpop.eup %2974 }
 0x468   :  { %2978 = vrcp.f32 %v1480_v10  ;;  %v2977_v19 = vpop.eup %2976 }
 0x469   :  { %2980 = vrcp.f32 %v1481_v15  ;;  %v1482_v26 = vadd.f32 1.0, %v2977_v19 }
 0x46b   :  { %2982 = vrcp.f32 %v1482_v26 }
 0x472   :  { %v2979_v20 = vpop.eup %2978 }
 0x473   :  { %v1491_v22 = vmul.f32 %v2979_v20, %v2975_v16  ;;  %v2981_v25 = vpop.eup %2980 }
 0x474   :  { %v1490_v29 = vmul.f32 %v2981_v25, %v4153_v32 }
 0x475   :  { %v2983_v37 = vpop.eup %2982 }
 0x476   :  { %v4198_v30 = vadd.f32 %v1491_v22, %v1490_v29 }
 0x478   :  { %2984 = vtanh.f32 %v4198_v30 }
 0x482   :  { %v2985_v44 = vpop.eup %2984 }
 0x483   :  { %v1494_v46 = vmul.f32 %v2985_v44, %v2983_v37 }
 0x485   :  { %2262 = vst [vmem:[%s4353_s6 + $0x18] sm:$0xff] %v1494_v46  ;;  %1567 = vmatmul.mubr.f32.vlgmr.msra.gmra.mrb[8].mxu0 %v1494_v46  ;;  %1638 = vmatmul.mubr.f32.vlgmr.msra.gmra.mrb[8].mxu1 %v1494_v46 }
 0x486   :  { %2668 = vmatpush1.bf16.msra.mxu0 %v3819_v42  ;;  %2700 = vmatpush1.bf16.msra.mxu1 %v3823_v45 }
 0x487   :  { %2670 = vmatprep.subr.bf16.mxu0 %v3829_v48  ;;  %2702 = vmatprep.subr.bf16.mxu1 %v3833_v51 }
 0x488   :  { %1743 = vmatprep.mubr.f32.mxu0 %v3054_v4  ;;  %1814 = vmatprep.mubr.f32.mxu1 %v3054_v4 }
 0x48a   :  { %2672 = vmatpush1.bf16.msra.mxu0 %v3842_v55  ;;  %2704 = vmatpush1.bf16.msra.mxu1 %v3846_v58 }
 0x48b   :  { %2674 = vmatprep.subr.bf16.mxu0 %v3854_v61  ;;  %2706 = vmatprep.subr.bf16.mxu1 %v3858_v1 }
 0x48e   :  { %2676 = vmatpush1.bf16.msra.mxu0 %v3867_v5  ;;  %2708 = vmatpush1.bf16.msra.mxu1 %v3871_v8 }
 0x48f   :  { %2678 = vmatprep.subr.bf16.mxu0 %v3879_v11  ;;  %2710 = vmatprep.subr.bf16.mxu1 %v3883_v14 }
 0x492   :  { %2680 = vmatpush1.bf16.msra.mxu0 %v3892_v18  ;;  %2712 = vmatpush1.bf16.msra.mxu1 %v3896_v21 }
 0x493   :  { %2682 = vmatprep.subr.bf16.mxu0 %v3904_v24  ;;  %2714 = vmatprep.subr.bf16.mxu1 %v3908_v27 }
 0x496   :  { %2684 = vmatpush1.bf16.msra.mxu0 %v3917_v31  ;;  %2716 = vmatpush1.bf16.msra.mxu1 %v3921_v34 }
 0x497   :  { %2686 = vmatprep.subr.bf16.mxu0 %v3929_v39  ;;  %2718 = vmatprep.subr.bf16.mxu1 %v3933_v43 }
 0x49a   :  { %2688 = vmatpush1.bf16.msra.mxu0 %v3942_v49  ;;  %2720 = vmatpush1.bf16.msra.mxu1 %v3946_v53 }
 0x49b   :  { %2690 = vmatprep.subr.bf16.mxu0 %v3954_v57  ;;  %2722 = vmatprep.subr.bf16.mxu1 %v3958_v62 }
 0x49e   :  { %2692 = vmatpush1.bf16.msra.mxu0 %v3967_v3  ;;  %2724 = vmatpush1.bf16.msra.mxu1 %v3971_v9 }
 0x49f   :  { %2694 = vmatprep.subr.bf16.mxu0 %v3979_v13  ;;  %2726 = vmatprep.subr.bf16.mxu1 %v3983_v17 }
 0x4a2   :  { %2696 = vmatpush1.bf16.msra.mxu0 %v3992_v23  ;;  %2728 = vmatpush1.bf16.msra.mxu1 %v3996_v28 }
 0x4a3   :  { %2730 = vmatprep.subr.bf16.mxu0 %v3808_v35  ;;  %2762 = vmatprep.subr.bf16.mxu1 %v3812_v38 }
 0x558   :  { %v1568_v32 = vpop.f32.mrb[8].mxu0  ;;  %v1639_v33 = vpop.f32.mrb[8].mxu1 }
 0x559   :  { %v2865_v36 = vadd.f32 %v1568_v32, %v4048_v40  ;;  %v1570_v47 = vpop.f32.mrb[9].mxu0  ;;  %v1641_v50 = vpop.f32.mrb[9].mxu1  ;;  %v2881_v59 = vadd.f32 %v1639_v33, %v4054_v0 }
 0x55a   :  { %v2866_v52 = vadd.f32 %v1570_v47, %v4050_v41  ;;  %v2882_v60 = vadd.f32 %v1641_v50, %v4056_v2 }
 0x55b   :  { %v2263_v54 = vmul.f32 -1.442695, %v2865_v36  ;;  %v2265_v63 = vmul.f32 -1.442695, %v2881_v59 }
 0x55c   :  { %v2264_v56 = vmul.f32 -1.442695, %v2866_v52 }
 0x55d   :  { %2986 = vpow2.f32 %v2263_v54 }
 0x55e   :  { %2988 = vpow2.f32 %v2264_v56 }
 0x55f   :  { %2990 = vtanh.f32 %v2882_v60 }
 0x560   :  { %2992 = vpow2.f32 %v2265_v63 }
 0x567   :  { %v2987_v6 = vpop.eup %2986 }
 0x568   :  { %v1657_v7 = vadd.f32 1.0, %v2987_v6  ;;  %v2989_v10 = vpop.eup %2988 }
 0x569   :  { %v1658_v12 = vadd.f32 1.0, %v2989_v10  ;;  %v2991_v15 = vpop.eup %2990 }
 0x56a   :  { %2994 = vrcp.f32 %v1657_v7  ;;  %v2993_v16 = vpop.eup %2992 }
 0x56b   :  { %2996 = vrcp.f32 %v1658_v12  ;;  %v1659_v25 = vadd.f32 1.0, %v2993_v16 }
 0x56d   :  { %2998 = vrcp.f32 %v1659_v25 }
 0x574   :  { %v2995_v19 = vpop.eup %2994 }
 0x575   :  { %v1668_v20 = vmul.f32 %v2995_v19, %v2991_v15  ;;  %v2997_v22 = vpop.eup %2996 }
 0x576   :  { %v1667_v26 = vmul.f32 %v2997_v22, %v4198_v30 }
 0x577   :  { %v2999_v37 = vpop.eup %2998 }
 0x578   :  { %v4243_v29 = vadd.f32 %v1668_v20, %v1667_v26 }
 0x57a   :  { %3000 = vtanh.f32 %v4243_v29 }
 0x584   :  { %v3001_v44 = vpop.eup %3000 }
 0x585   :  { %v1671_v46 = vmul.f32 %v3001_v44, %v2999_v37 }
 0x587   :  { %2266 = vst [vmem:[%s4353_s6 + $0x20] sm:$0xff] %v1671_v46  ;;  %1744 = vmatmul.mubr.f32.vlgmr.msra.gmra.mrb[10].mxu0 %v1671_v46  ;;  %1815 = vmatmul.mubr.f32.vlgmr.msra.gmra.mrb[10].mxu1 %v1671_v46 }
 0x588   :  { %2732 = vmatpush1.bf16.msra.mxu0 %v3819_v42  ;;  %2764 = vmatpush1.bf16.msra.mxu1 %v3823_v45 }
 0x589   :  { %2734 = vmatprep.subr.bf16.mxu0 %v3829_v48  ;;  %2766 = vmatprep.subr.bf16.mxu1 %v3833_v51 }
 0x58a   :  { %1920 = vmatprep.mubr.f32.mxu0 %v3054_v4  ;;  %1991 = vmatprep.mubr.f32.mxu1 %v3054_v4 }
 0x58c   :  { %2736 = vmatpush1.bf16.msra.mxu0 %v3842_v55  ;;  %2768 = vmatpush1.bf16.msra.mxu1 %v3846_v58 }
 0x58d   :  { %2738 = vmatprep.subr.bf16.mxu0 %v3854_v61  ;;  %2770 = vmatprep.subr.bf16.mxu1 %v3858_v1 }
 0x590   :  { %2740 = vmatpush1.bf16.msra.mxu0 %v3867_v5  ;;  %2772 = vmatpush1.bf16.msra.mxu1 %v3871_v8 }
 0x591   :  { %2742 = vmatprep.subr.bf16.mxu0 %v3879_v11  ;;  %2774 = vmatprep.subr.bf16.mxu1 %v3883_v14 }
 0x594   :  { %2744 = vmatpush1.bf16.msra.mxu0 %v3892_v18  ;;  %2776 = vmatpush1.bf16.msra.mxu1 %v3896_v21 }
 0x595   :  { %2746 = vmatprep.subr.bf16.mxu0 %v3904_v24  ;;  %2778 = vmatprep.subr.bf16.mxu1 %v3908_v27 }
 0x598   :  { %2748 = vmatpush1.bf16.msra.mxu0 %v3917_v31  ;;  %2780 = vmatpush1.bf16.msra.mxu1 %v3921_v34 }
 0x599   :  { %2750 = vmatprep.subr.bf16.mxu0 %v3929_v39  ;;  %2782 = vmatprep.subr.bf16.mxu1 %v3933_v43 }
 0x59c   :  { %2752 = vmatpush1.bf16.msra.mxu0 %v3942_v49  ;;  %2784 = vmatpush1.bf16.msra.mxu1 %v3946_v53 }
 0x59d   :  { %2754 = vmatprep.subr.bf16.mxu0 %v3954_v57  ;;  %2786 = vmatprep.subr.bf16.mxu1 %v3958_v62 }
 0x5a0   :  { %2756 = vmatpush1.bf16.msra.mxu0 %v3967_v3  ;;  %2788 = vmatpush1.bf16.msra.mxu1 %v3971_v9 }
 0x5a1   :  { %2758 = vmatprep.subr.bf16.mxu0 %v3979_v13  ;;  %2790 = vmatprep.subr.bf16.mxu1 %v3983_v17 }
 0x5a4   :  { %2760 = vmatpush1.bf16.msra.mxu0 %v3992_v23  ;;  %2792 = vmatpush1.bf16.msra.mxu1 %v3996_v28 }
 0x5a5   :  { %2794 = vmatprep.subr.bf16.mxu0 %v3808_v35  ;;  %2826 = vmatprep.subr.bf16.mxu1 %v3812_v38 }
 0x65a   :  { %v1745_v30 = vpop.f32.mrb[10].mxu0  ;;  %v1816_v32 = vpop.f32.mrb[10].mxu1 }
 0x65b   :  { %v2867_v33 = vadd.f32 %v1745_v30, %v4048_v40  ;;  %v1747_v36 = vpop.f32.mrb[11].mxu0  ;;  %v1818_v47 = vpop.f32.mrb[11].mxu1  ;;  %v2883_v56 = vadd.f32 %v1816_v32, %v4054_v0 }
 0x65c   :  { %v2868_v50 = vadd.f32 %v1747_v36, %v4050_v41  ;;  %v2884_v59 = vadd.f32 %v1818_v47, %v4056_v2 }
 0x65d   :  { %v2267_v52 = vmul.f32 -1.442695, %v2867_v33  ;;  %v2269_v60 = vmul.f32 -1.442695, %v2883_v56 }
 0x65e   :  { %v2268_v54 = vmul.f32 -1.442695, %v2868_v50 }
 0x65f   :  { %3002 = vpow2.f32 %v2267_v52 }
 0x660   :  { %3004 = vpow2.f32 %v2268_v54 }
 0x661   :  { %3006 = vtanh.f32 %v2884_v59 }
 0x662   :  { %3008 = vpow2.f32 %v2269_v60 }
 0x669   :  { %v3003_v35 = vpop.eup %3002 }
 0x66a   :  { %v1834_v63 = vadd.f32 1.0, %v3003_v35  ;;  %v3005_v38 = vpop.eup %3004 }
 0x66b   :  { %v1835_v6 = vadd.f32 1.0, %v3005_v38  ;;  %v3007_v7 = vpop.eup %3006 }
 0x66c   :  { %3010 = vrcp.f32 %v1834_v63  ;;  %v3009_v10 = vpop.eup %3008 }
 0x66d   :  { %3012 = vrcp.f32 %v1835_v6  ;;  %v1836_v19 = vadd.f32 1.0, %v3009_v10 }
 0x66f   :  { %3014 = vrcp.f32 %v1836_v19 }
 0x676   :  { %v3011_v12 = vpop.eup %3010 }
 0x677   :  { %v1845_v15 = vmul.f32 %v3011_v12, %v3007_v7  ;;  %v3013_v16 = vpop.eup %3012 }
 0x678   :  { %v1844_v20 = vmul.f32 %v3013_v16, %v4243_v29 }
 0x679   :  { %v3015_v25 = vpop.eup %3014 }
 0x67a   :  { %v4288_v22 = vadd.f32 %v1845_v15, %v1844_v20 }
 0x67c   :  { %3016 = vtanh.f32 %v4288_v22 }
 0x686   :  { %v3017_v26 = vpop.eup %3016 }
 0x687   :  { %v1848_v37 = vmul.f32 %v3017_v26, %v3015_v25 }
 0x689   :  { %2270 = vst [vmem:[%s4353_s6 + $0x28] sm:$0xff] %v1848_v37  ;;  %1921 = vmatmul.mubr.f32.vlgmr.msra.gmra.mrb[12].mxu0 %v1848_v37  ;;  %1992 = vmatmul.mubr.f32.vlgmr.msra.gmra.mrb[12].mxu1 %v1848_v37 }
 0x68a   :  { %2796 = vmatpush1.bf16.msra.mxu0 %v3819_v42  ;;  %2828 = vmatpush1.bf16.msra.mxu1 %v3823_v45 }
 0x68b   :  { %2798 = vmatprep.subr.bf16.mxu0 %v3829_v48  ;;  %2830 = vmatprep.subr.bf16.mxu1 %v3833_v51 }
 0x68c   :  { %2097 = vmatprep.mubr.f32.mxu0 %v3054_v4  ;;  %2168 = vmatprep.mubr.f32.mxu1 %v3054_v4 }
 0x68e   :  { %2800 = vmatpush1.bf16.msra.mxu0 %v3842_v55  ;;  %2832 = vmatpush1.bf16.msra.mxu1 %v3846_v58 }
 0x68f   :  { %2802 = vmatprep.subr.bf16.mxu0 %v3854_v61  ;;  %2834 = vmatprep.subr.bf16.mxu1 %v3858_v1 }
 0x692   :  { %2804 = vmatpush1.bf16.msra.mxu0 %v3867_v5  ;;  %2836 = vmatpush1.bf16.msra.mxu1 %v3871_v8 }
 0x693   :  { %2806 = vmatprep.subr.bf16.mxu0 %v3879_v11  ;;  %2838 = vmatprep.subr.bf16.mxu1 %v3883_v14 }
 0x696   :  { %2808 = vmatpush1.bf16.msra.mxu0 %v3892_v18  ;;  %2840 = vmatpush1.bf16.msra.mxu1 %v3896_v21 }
 0x697   :  { %2810 = vmatprep.subr.bf16.mxu0 %v3904_v24  ;;  %2842 = vmatprep.subr.bf16.mxu1 %v3908_v27 }
 0x69a   :  { %2812 = vmatpush1.bf16.msra.mxu0 %v3917_v31  ;;  %2844 = vmatpush1.bf16.msra.mxu1 %v3921_v34 }
 0x69b   :  { %2814 = vmatprep.subr.bf16.mxu0 %v3929_v39  ;;  %2846 = vmatprep.subr.bf16.mxu1 %v3933_v43 }
 0x69e   :  { %2816 = vmatpush1.bf16.msra.mxu0 %v3942_v49  ;;  %2848 = vmatpush1.bf16.msra.mxu1 %v3946_v53 }
 0x69f   :  { %2818 = vmatprep.subr.bf16.mxu0 %v3954_v57  ;;  %2850 = vmatprep.subr.bf16.mxu1 %v3958_v62 }
 0x6a2   :  { %2820 = vmatpush1.bf16.msra.mxu0 %v3967_v3  ;;  %2852 = vmatpush1.bf16.msra.mxu1 %v3971_v9 }
 0x6a3   :  { %2822 = vmatprep.subr.bf16.mxu0 %v3979_v13  ;;  %2854 = vmatprep.subr.bf16.mxu1 %v3983_v17 }
 0x6a6   :  { %2824 = vmatpush1.bf16.msra.mxu0 %v3992_v23  ;;  %2856 = vmatpush1.bf16.msra.mxu1 %v3996_v28 }
 0x75c   :  { %v1922_v4 = vpop.f32.mrb[12].mxu0  ;;  %v1993_v42 = vpop.f32.mrb[12].mxu1 }
 0x75d   :  { %v2869_v45 = vadd.f32 %v1922_v4, %v4048_v40  ;;  %v1924_v48 = vpop.f32.mrb[13].mxu0  ;;  %v1995_v51 = vpop.f32.mrb[13].mxu1  ;;  %v2885_v1 = vadd.f32 %v1993_v42, %v4054_v0 }
 0x75e   :  { %v2870_v55 = vadd.f32 %v1924_v48, %v4050_v41  ;;  %v2886_v5 = vadd.f32 %v1995_v51, %v4056_v2 }
 0x75f   :  { %v2271_v58 = vmul.f32 -1.442695, %v2869_v45  ;;  %v2273_v8 = vmul.f32 -1.442695, %v2885_v1 }
 0x760   :  { %v2272_v61 = vmul.f32 -1.442695, %v2870_v55 }
 0x761   :  { %3018 = vpow2.f32 %v2271_v58 }
 0x762   :  { %3020 = vpow2.f32 %v2272_v61 }
 0x763   :  { %3022 = vtanh.f32 %v2886_v5 }
 0x764   :  { %3024 = vpow2.f32 %v2273_v8 }
 0x76b   :  { %v3019_v11 = vpop.eup %3018 }
 0x76c   :  { %v2011_v14 = vadd.f32 1.0, %v3019_v11  ;;  %v3021_v18 = vpop.eup %3020 }
 0x76d   :  { %v2012_v21 = vadd.f32 1.0, %v3021_v18  ;;  %v3023_v24 = vpop.eup %3022 }
 0x76e   :  { %3026 = vrcp.f32 %v2011_v14  ;;  %v3025_v27 = vpop.eup %3024 }
 0x76f   :  { %3028 = vrcp.f32 %v2012_v21  ;;  %v2013_v43 = vadd.f32 1.0, %v3025_v27 }
 0x771   :  { %3030 = vrcp.f32 %v2013_v43 }
 0x778   :  { %v3027_v31 = vpop.eup %3026 }
 0x779   :  { %v2022_v34 = vmul.f32 %v3027_v31, %v3023_v24  ;;  %v3029_v39 = vpop.eup %3028 }
 0x77a   :  { %v2021_v49 = vmul.f32 %v3029_v39, %v4288_v22 }
 0x77b   :  { %v3031_v57 = vpop.eup %3030 }
 0x77c   :  { %v2023_v53 = vadd.f32 %v2022_v34, %v2021_v49 }
 0x77e   :  { %3032 = vtanh.f32 %v2023_v53 }
 0x788   :  { %v3033_v62 = vpop.eup %3032 }
 0x789   :  { %v2025_v3 = vmul.f32 %v3033_v62, %v3031_v57 }
 0x78b   :  { %2274 = vst [vmem:[%s4353_s6 + $0x30] sm:$0xff] %v2025_v3  ;;  %2098 = vmatmul.mubr.f32.vlgmr.msra.gmra.mrb[14].mxu0 %v2025_v3  ;;  %2169 = vmatmul.mubr.f32.vlgmr.msra.gmra.mrb[14].mxu1 %v2025_v3 }
 0x85e   :  { %v2099_v9 = vpop.f32.mrb[14].mxu0  ;;  %v2170_v13 = vpop.f32.mrb[14].mxu1 }
 0x85f   :  { %v2871_v17 = vadd.f32 %v2099_v9, %v4048_v40  ;;  %v2101_v23 = vpop.f32.mrb[15].mxu0  ;;  %v2172_v28 = vpop.f32.mrb[15].mxu1  ;;  %v2887_v30 = vadd.f32 %v2170_v13, %v4054_v0 }
 0x860   :  { %v2872_v29 = vadd.f32 %v2101_v23, %v4050_v41  ;;  %v2888_v32 = vadd.f32 %v2172_v28, %v4056_v2 }
 0x861   :  { %v2275_v44 = vmul.f32 -1.442695, %v2871_v17  ;;  %v2277_v33 = vmul.f32 -1.442695, %v2887_v30 }
 0x862   :  { %v2276_v46 = vmul.f32 -1.442695, %v2872_v29 }
 0x863   :  { %3034 = vpow2.f32 %v2275_v44 }
 0x864   :  { %3036 = vpow2.f32 %v2276_v46 }
 0x865   :  { %3038 = vtanh.f32 %v2888_v32 }
 0x866   :  { %3040 = vpow2.f32 %v2277_v33 }
 0x86d   :  { %v3035_v36 = vpop.eup %3034 }
 0x86e   :  { %v2188_v47 = vadd.f32 1.0, %v3035_v36  ;;  %v3037_v50 = vpop.eup %3036 }
 0x86f   :  { %v2189_v40 = vadd.f32 1.0, %v3037_v50  ;;  %v3039_v52 = vpop.eup %3038 }
 0x870   :  { %3042 = vrcp.f32 %v2188_v47  ;;  %v3041_v54 = vpop.eup %3040 }
 0x871   :  { %3044 = vrcp.f32 %v2189_v40  ;;  %v2190_v60 = vadd.f32 1.0, %v3041_v54 }
 0x873   :  { %3046 = vrcp.f32 %v2190_v60 }
 0x87a   :  { %v3043_v41 = vpop.eup %3042 }
 0x87b   :  { %v2199_v56 = vmul.f32 %v3043_v41, %v3039_v52  ;;  %v3045_v59 = vpop.eup %3044 }
 0x87c   :  { %v2198_v35 = vmul.f32 %v3045_v59, %v2023_v53 }
 0x87d   :  { %v3047_v0 = vpop.eup %3046 }
 0x87e   :  { %v2200_v63 = vadd.f32 %v2199_v56, %v2198_v35 }
 0x880   :  { %3048 = vtanh.f32 %v2200_v63  ;;  %2206 = vst [vmem:[%s4355_s8] sm:$0xff] %v2200_v63 }
 0x88a   :  { %v3049_v2 = vpop.eup %3048 }
 0x88b   :  { %v2202_v38 = vmul.f32 %v3049_v2, %v3047_v0 }
 0x88d   :  { %2278 = vst [vmem:[%s4353_s6 + $0x38] sm:$0xff] %v2202_v38  ;;  %2205 = vst [vmem:[%s4354_s7] sm:$0xff] %v2202_v38 }
 0x88e   :  { %2219 = vsyncmov [#allocation5] }
 0x891   :  { %s2220_s26 = vpop.sfrf %2219 }
 0x892   :  { %p2279_p0 = scmp.ne.s32.totalorder %s2220_s26, 0 }
 0x894   :  { %2224 = shalt.err (%p2279_p0)  }
 0x895   :  { %2226 = vsyncmov [#allocation5 + $0x1] }
 0x898   :  { %s2227_s27 = vpop.sfrf %2226 }
 0x899   :  { %p2280_p1 = scmp.ne.s32.totalorder %s2227_s27, 0 }
 0x89b   :  { %2231 = shalt.err (%p2280_p1)  }

// kernel: language_model_forward.3
= control target key start
LH: loop header
LB: loop body
LE: loop exit
PB: predicated region body
PF: predicated region fallthrough
CT: control target
= control target key end

     0   :  { %s2770_s27 = smov [#allocation2]   ;;  %s2771_s29 = smov [#allocation3]   ;;  %s3321_s0 = inlined_call_operand.vmem [shape: f32[8,8,128], index: 0, kind: input, shape index: {}]   ;;  %s3322_s1 = inlined_call_operand.hbm [shape: f32[128,512], index: 1, kind: input, shape index: {}]   ;;  %s3323_s3 = inlined_call_operand.vmem [shape: f32[1,512], index: 3, kind: input, shape index: {}]   ;;  %s3324_s4 = inlined_call_operand.vmem [shape: f32[8,128], index: 4, kind: input, shape index: {}]   ;;  %s3325_s5 = inlined_call_operand.vmem [shape: f32[8,128], index: 5, kind: input, shape index: {}]   ;;  %s3326_s6 = inlined_call_operand.vmem [shape: f32[8,8,128], index: 6, kind: output, shape index: {0}]   ;;  %s3327_s7 = inlined_call_operand.vmem [shape: f32[8,128], index: 7, kind: output, shape index: {1}]   ;;  %s3328_s8 = inlined_call_operand.vmem [shape: f32[8,128], index: 8, kind: output, shape index: {2}]   ;;  %s3329_s2 = inlined_call_operand.hbm [shape: f32[128,512], index: 2, kind: input, shape index: {}]  }
   0x1   :  { %s33_s28 = sshll.u32 %s2770_s27, 4  ;;  %s45_s30 = sshll.u32 %s2771_s29, 4  ;;  %s34_s28 = int_to_ptr.vmem [resolvable:$true] %s33_s28  ;;  %s46_s30 = int_to_ptr.vmem [resolvable:$true] %s45_s30 }
   0x2   :  { %s2722_s11 = scalar_lea.hbm %s3322_s1, 8192 }
   0x3   :  { %p2723_p0 = scmp.ne.s32.totalorder %s3322_s1, %s2722_s11  ;;  %p2726_p1 = scmp.lt.u32.totalorder %s2722_s11, %s3322_s1 }
   0x5   :  { %p2728_p2 = pnand %p2726_p1, %p2723_p0 }
   0x7   :  { %2731 = shalt.err (!%p2728_p2)  }
   0x8   :  { %s2732_s16 = scalar_lea.vmem %s34_s28, 8192  ;;  %p2737_p4 = scmp.lt.s32.totalorder %s34_s28, %s34_s28 }
   0x9   :  { %p2733_p3 = scmp.ne.s32.totalorder %s34_s28, %s2732_s16  ;;  %p2738_p5 = scmp.lt.s32.totalorder %s2732_s16, %s2732_s16 }
   0xb   :  { %p2739_p6 = por %p2738_p5, %p2737_p4 }
   0xd   :  { %p2740_p7 = pnand %p2739_p6, %p2733_p3 }
   0xf   :  { %2743 = shalt.err (!%p2740_p7)  }
  0x10   :  { %36 = dma.hbm_to_vmem [thread:$0]  %s3322_s1, 8192, %s34_s28, [#allocation5] }
  0x11   :  { %s2744_s21 = scalar_lea.hbm %s3329_s2, 8192 }
  0x12   :  { %p2745_p8 = scmp.ne.s32.totalorder %s3329_s2, %s2744_s21  ;;  %p2748_p9 = scmp.lt.u32.totalorder %s2744_s21, %s3329_s2 }
  0x14   :  { %p2750_p10 = pnand %p2748_p9, %p2745_p8 }
  0x16   :  { %2753 = shalt.err (!%p2750_p10)  }
  0x17   :  { %s2754_s26 = scalar_lea.vmem %s46_s30, 8192  ;;  %p2759_p12 = scmp.lt.s32.totalorder %s46_s30, %s46_s30 }
  0x18   :  { %p2755_p11 = scmp.ne.s32.totalorder %s46_s30, %s2754_s26  ;;  %p2760_p13 = scmp.lt.s32.totalorder %s2754_s26, %s2754_s26 }
  0x1a   :  { %p2761_p0 = por %p2760_p13, %p2759_p12 }
  0x1c   :  { %p2762_p1 = pnand %p2761_p0, %p2755_p11 }
  0x1e   :  { %2765 = shalt.err (!%p2762_p1)  }
  0x1f   :  { %48 = dma.hbm_to_vmem [thread:$0]  %s3329_s2, 8192, %s46_s30, [#allocation5 + $0x1] }
  0x20   :  { %2766 = dma.done.wait [#allocation5], 8192 }
  0x21   :  { %2767 = vsyncadd [#allocation5], 4294959104 }
  0x22   :  { %2768 = dma.done.wait [#allocation5 + $0x1], 8192 }
  0x23   :  { %2769 = vsyncadd [#allocation5 + $0x1], 4294959104  ;;  %v2772_v0 = vmov 0.0   ;;  %v60_v1 = vld [vmem:[#allocation2 + $0x8] sm:$0xff]  ;;  %v62_v3 = vld [vmem:[#allocation2 + $0x18] sm:$0xff] }
  0x24   :  { %217 = vmatprep.mubr.f32.mxu0 %v2772_v0  ;;  %330 = vmatprep.mubr.f32.mxu1 %v2772_v0  ;;  %v64_v2 = vld [vmem:[#allocation2 + $0x28] sm:$0xff]  ;;  %v66_v5 = vld [vmem:[#allocation2 + $0x38] sm:$0xff]  ;;  %v59_v6 = vld [vmem:[#allocation2] sm:$0xff] }
  0x25   :  { %v1951_v4 = vpack.c.bf16 %v64_v2, %v60_v1  ;;  %v63_v7 = vld [vmem:[#allocation2 + $0x20] sm:$0xff]  ;;  %v1983_v8 = vpack.c.bf16 %v66_v5, %v62_v3  ;;  %v61_v10 = vld [vmem:[#allocation2 + $0x10] sm:$0xff]  ;;  %v68_v12 = vld [vmem:[#allocation2 + $0x48] sm:$0xff] }
  0x26   :  { %v1953_v9 = vpack.c.bf16 %v63_v7, %v59_v6  ;;  %v65_v11 = vld [vmem:[#allocation2 + $0x30] sm:$0xff]  ;;  %v72_v14 = vld [vmem:[#allocation2 + $0x68] sm:$0xff]  ;;  %v70_v15 = vld [vmem:[#allocation2 + $0x58] sm:$0xff] }
  0x27   :  { %1952 = vmatprep.subr.bf16.mxu0 %v1951_v4  ;;  %v1985_v13 = vpack.c.bf16 %v65_v11, %v61_v10  ;;  %v74_v16 = vld [vmem:[#allocation2 + $0x78] sm:$0xff]  ;;  %1984 = vmatprep.subr.bf16.mxu1 %v1983_v8  ;;  %v1955_v17 = vpack.c.bf16 %v72_v14, %v68_v12  ;;  %v67_v19 = vld [vmem:[#allocation2 + $0x40] sm:$0xff]  ;;  %v69_v21 = vld [vmem:[#allocation2 + $0x50] sm:$0xff] }
  0x28   :  { %1954 = vmatpush1.bf16.msra.mxu0 %v1953_v9  ;;  %v1987_v18 = vpack.c.bf16 %v74_v16, %v70_v15  ;;  %v71_v20 = vld [vmem:[#allocation2 + $0x60] sm:$0xff]  ;;  %v73_v23 = vld [vmem:[#allocation2 + $0x70] sm:$0xff]  ;;  %v76_v24 = vld [vmem:[#allocation2 + $0x88] sm:$0xff] }
  0x29   :  { %1986 = vmatpush1.bf16.msra.mxu1 %v1985_v13  ;;  %v1957_v22 = vpack.c.bf16 %v71_v20, %v67_v19  ;;  %v80_v25 = vld [vmem:[#allocation2 + $0xa8] sm:$0xff]  ;;  %1956 = vmatprep.subr.bf16.mxu0 %v1955_v17  ;;  %v1989_v26 = vpack.c.bf16 %v73_v23, %v69_v21  ;;  %v78_v28 = vld [vmem:[#allocation2 + $0x98] sm:$0xff]  ;;  %v75_v30 = vld [vmem:[#allocation2 + $0x80] sm:$0xff] }
  0x2a   :  { %1988 = vmatprep.subr.bf16.mxu1 %v1987_v18  ;;  %v1959_v27 = vpack.c.bf16 %v80_v25, %v76_v24  ;;  %v82_v29 = vld [vmem:[#allocation2 + $0xb8] sm:$0xff]  ;;  %v79_v32 = vld [vmem:[#allocation2 + $0xa0] sm:$0xff]  ;;  %v77_v33 = vld [vmem:[#allocation2 + $0x90] sm:$0xff] }
  0x2b   :  { %v1991_v31 = vpack.c.bf16 %v82_v29, %v78_v28  ;;  %v81_v34 = vld [vmem:[#allocation2 + $0xb0] sm:$0xff]  ;;  %v1961_v35 = vpack.c.bf16 %v79_v32, %v75_v30  ;;  %v84_v36 = vld [vmem:[#allocation2 + $0xc8] sm:$0xff]  ;;  %v86_v38 = vld [vmem:[#allocation2 + $0xd8] sm:$0xff] }
  0x2c   :  { %1958 = vmatpush1.bf16.msra.mxu0 %v1957_v22  ;;  %v88_v37 = vld [vmem:[#allocation2 + $0xe8] sm:$0xff]  ;;  %v1993_v39 = vpack.c.bf16 %v81_v34, %v77_v33  ;;  %v90_v41 = vld [vmem:[#allocation2 + $0xf8] sm:$0xff]  ;;  %v83_v42 = vld [vmem:[#allocation2 + $0xc0] sm:$0xff] }
  0x2d   :  { %1990 = vmatpush1.bf16.msra.mxu1 %v1989_v26  ;;  %1960 = vmatprep.subr.bf16.mxu0 %v1959_v27  ;;  %v1963_v40 = vpack.c.bf16 %v88_v37, %v84_v36  ;;  %v87_v43 = vld [vmem:[#allocation2 + $0xe0] sm:$0xff]  ;;  %v1995_v44 = vpack.c.bf16 %v90_v41, %v86_v38  ;;  %v85_v45 = vld [vmem:[#allocation2 + $0xd0] sm:$0xff]  ;;  %v92_v47 = vld [vmem:[#allocation2 + $0x108] sm:$0xff] }
  0x2e   :  { %1992 = vmatprep.subr.bf16.mxu1 %v1991_v31  ;;  %v89_v46 = vld [vmem:[#allocation2 + $0xf0] sm:$0xff]  ;;  %v96_v48 = vld [vmem:[#allocation2 + $0x128] sm:$0xff]  ;;  %v94_v49 = vld [vmem:[#allocation2 + $0x118] sm:$0xff]  ;;  %v1965_v51 = vpack.c.bf16 %v87_v43, %v83_v42 }
  0x2f   :  { %v98_v50 = vld [vmem:[#allocation2 + $0x138] sm:$0xff]  ;;  %v1997_v52 = vpack.c.bf16 %v89_v46, %v85_v45  ;;  %v1967_v53 = vpack.c.bf16 %v96_v48, %v92_v47  ;;  %v91_v54 = vld [vmem:[#allocation2 + $0x100] sm:$0xff]  ;;  %v93_v56 = vld [vmem:[#allocation2 + $0x110] sm:$0xff] }
  0x30   :  { %1962 = vmatpush1.bf16.msra.mxu0 %v1961_v35  ;;  %v95_v55 = vld [vmem:[#allocation2 + $0x120] sm:$0xff]  ;;  %v1999_v57 = vpack.c.bf16 %v98_v50, %v94_v49  ;;  %v97_v58 = vld [vmem:[#allocation2 + $0x130] sm:$0xff]  ;;  %v100_v59 = vld [vmem:[#allocation2 + $0x148] sm:$0xff] }
  0x31   :  { %1994 = vmatpush1.bf16.msra.mxu1 %v1993_v39  ;;  %1964 = vmatprep.subr.bf16.mxu0 %v1963_v40  ;;  %v104_v60 = vld [vmem:[#allocation2 + $0x168] sm:$0xff]  ;;  %v102_v61 = vld [vmem:[#allocation2 + $0x158] sm:$0xff]  ;;  %v1969_v63 = vpack.c.bf16 %v95_v55, %v91_v54  ;;  %v2001_v1 = vpack.c.bf16 %v97_v58, %v93_v56  ;;  %v99_v3 = vld [vmem:[#allocation2 + $0x140] sm:$0xff] }
  0x32   :  { %1996 = vmatprep.subr.bf16.mxu1 %v1995_v44  ;;  %v106_v62 = vld [vmem:[#allocation2 + $0x178] sm:$0xff]  ;;  %v1971_v2 = vpack.c.bf16 %v104_v60, %v100_v59  ;;  %v103_v4 = vld [vmem:[#allocation2 + $0x160] sm:$0xff]  ;;  %v101_v5 = vld [vmem:[#allocation2 + $0x150] sm:$0xff] }
  0x33   :  { %v2003_v6 = vpack.c.bf16 %v106_v62, %v102_v61  ;;  %v105_v7 = vld [vmem:[#allocation2 + $0x170] sm:$0xff]  ;;  %v108_v8 = vld [vmem:[#allocation2 + $0x188] sm:$0xff]  ;;  %v110_v10 = vld [vmem:[#allocation2 + $0x198] sm:$0xff]  ;;  %v1973_v12 = vpack.c.bf16 %v103_v4, %v99_v3 }
  0x34   :  { %1966 = vmatpush1.bf16.msra.mxu0 %v1965_v51  ;;  %v112_v9 = vld [vmem:[#allocation2 + $0x1a8] sm:$0xff]  ;;  %v114_v11 = vld [vmem:[#allocation2 + $0x1b8] sm:$0xff]  ;;  %v2005_v13 = vpack.c.bf16 %v105_v7, %v101_v5  ;;  %v107_v15 = vld [vmem:[#allocation2 + $0x180] sm:$0xff] }
  0x35   :  { %1998 = vmatpush1.bf16.msra.mxu1 %v1997_v52  ;;  %1968 = vmatprep.subr.bf16.mxu0 %v1967_v53  ;;  %v1975_v14 = vpack.c.bf16 %v112_v9, %v108_v8  ;;  %v111_v16 = vld [vmem:[#allocation2 + $0x1a0] sm:$0xff]  ;;  %v109_v17 = vld [vmem:[#allocation2 + $0x190] sm:$0xff]  ;;  %v2007_v18 = vpack.c.bf16 %v114_v11, %v110_v10  ;;  %v116_v20 = vld [vmem:[#allocation2 + $0x1c8] sm:$0xff] }
  0x36   :  { %2000 = vmatprep.subr.bf16.mxu1 %v1999_v57  ;;  %v113_v19 = vld [vmem:[#allocation2 + $0x1b0] sm:$0xff]  ;;  %v120_v21 = vld [vmem:[#allocation2 + $0x1e8] sm:$0xff]  ;;  %v118_v22 = vld [vmem:[#allocation2 + $0x1d8] sm:$0xff]  ;;  %v1977_v24 = vpack.c.bf16 %v111_v16, %v107_v15 }
  0x37   :  { %v122_v23 = vld [vmem:[#allocation2 + $0x1f8] sm:$0xff]  ;;  %v2009_v25 = vpack.c.bf16 %v113_v19, %v109_v17  ;;  %v1979_v26 = vpack.c.bf16 %v120_v21, %v116_v20  ;;  %v115_v27 = vld [vmem:[#allocation2 + $0x1c0] sm:$0xff]  ;;  %v117_v29 = vld [vmem:[#allocation2 + $0x1d0] sm:$0xff] }
  0x38   :  { %1970 = vmatpush1.bf16.msra.mxu0 %v1969_v63  ;;  %v119_v28 = vld [vmem:[#allocation2 + $0x1e0] sm:$0xff]  ;;  %v2011_v30 = vpack.c.bf16 %v122_v23, %v118_v22  ;;  %v121_v31 = vld [vmem:[#allocation2 + $0x1f0] sm:$0xff]  ;;  %v412_v32 = vld [vmem:[#allocation3 + $0x8] sm:$0xff] }
  0x39   :  { %2002 = vmatpush1.bf16.msra.mxu1 %v2001_v1  ;;  %1972 = vmatprep.subr.bf16.mxu0 %v1971_v2  ;;  %v416_v33 = vld [vmem:[#allocation3 + $0x28] sm:$0xff]  ;;  %v414_v34 = vld [vmem:[#allocation3 + $0x18] sm:$0xff]  ;;  %v1981_v36 = vpack.c.bf16 %v119_v28, %v115_v27  ;;  %v2013_v37 = vpack.c.bf16 %v121_v31, %v117_v29  ;;  %v411_v39 = vld [vmem:[#allocation3] sm:$0xff] }
  0x3a   :  { %2004 = vmatprep.subr.bf16.mxu1 %v2003_v6  ;;  %v418_v35 = vld [vmem:[#allocation3 + $0x38] sm:$0xff]  ;;  %v2844_v38 = vpack.c.bf16 %v416_v33, %v412_v32  ;;  %v415_v40 = vld [vmem:[#allocation3 + $0x20] sm:$0xff]  ;;  %v413_v42 = vld [vmem:[#allocation3 + $0x10] sm:$0xff] }
  0x3b   :  { %v2846_v41 = vpack.c.bf16 %v418_v35, %v414_v34  ;;  %v417_v43 = vld [vmem:[#allocation3 + $0x30] sm:$0xff]  ;;  %v420_v44 = vld [vmem:[#allocation3 + $0x48] sm:$0xff]  ;;  %v123_v46 = vld [vmem:[%s3321_s0] sm:$0xff]  ;;  %v2851_v47 = vpack.c.bf16 %v415_v40, %v411_v39 }
  0x3c   :  { %1974 = vmatpush1.bf16.msra.mxu0 %v1973_v12  ;;  %v424_v45 = vld [vmem:[#allocation3 + $0x68] sm:$0xff]  ;;  %v422_v48 = vld [vmem:[#allocation3 + $0x58] sm:$0xff]  ;;  %v2854_v50 = vpack.c.bf16 %v417_v43, %v413_v42  ;;  %v419_v51 = vld [vmem:[#allocation3 + $0x40] sm:$0xff] }
  0x3d   :  { %2006 = vmatpush1.bf16.msra.mxu1 %v2005_v13  ;;  %1976 = vmatprep.subr.bf16.mxu0 %v1975_v14  ;;  %v426_v49 = vld [vmem:[#allocation3 + $0x78] sm:$0xff]  ;;  %v423_v52 = vld [vmem:[#allocation3 + $0x60] sm:$0xff]  ;;  %v2857_v53 = vpack.c.bf16 %v424_v45, %v420_v44  ;;  %v421_v54 = vld [vmem:[#allocation3 + $0x50] sm:$0xff] }
  0x3e   :  { %2008 = vmatprep.subr.bf16.mxu1 %v2007_v18  ;;  %v425_v55 = vld [vmem:[#allocation3 + $0x70] sm:$0xff]  ;;  %v2859_v56 = vpack.c.bf16 %v426_v49, %v422_v48  ;;  %v428_v57 = vld [vmem:[#allocation3 + $0x88] sm:$0xff]  ;;  %v2865_v60 = vpack.c.bf16 %v423_v52, %v419_v51  ;;  %v430_v61 = vld [vmem:[#allocation3 + $0x98] sm:$0xff] }
  0x3f   :  { %v432_v58 = vld [vmem:[#allocation3 + $0xa8] sm:$0xff]  ;;  %v434_v62 = vld [vmem:[#allocation3 + $0xb8] sm:$0xff]  ;;  %v2869_v63 = vpack.c.bf16 %v425_v55, %v421_v54  ;;  %v427_v1 = vld [vmem:[#allocation3 + $0x80] sm:$0xff] }
  0x40   :  { %1978 = vmatpush1.bf16.msra.mxu0 %v1977_v24  ;;  %v124_v59 = vld [vmem:[%s3321_s0 + $0x8] sm:$0xff]  ;;  %v431_v2 = vld [vmem:[#allocation3 + $0xa0] sm:$0xff]  ;;  %v2873_v3 = vpack.c.bf16 %v432_v58, %v428_v57  ;;  %v429_v4 = vld [vmem:[#allocation3 + $0x90] sm:$0xff]  ;;  %v2876_v6 = vpack.c.bf16 %v434_v62, %v430_v61 }
  0x41   :  { %2010 = vmatpush1.bf16.msra.mxu1 %v2009_v25  ;;  %1980 = vmatprep.subr.bf16.mxu0 %v1979_v26  ;;  %v433_v5 = vld [vmem:[#allocation3 + $0xb0] sm:$0xff]  ;;  %v436_v7 = vld [vmem:[#allocation3 + $0xc8] sm:$0xff]  ;;  %v2882_v10 = vpack.c.bf16 %v431_v2, %v427_v1  ;;  %v438_v11 = vld [vmem:[#allocation3 + $0xd8] sm:$0xff] }
  0x42   :  { %2012 = vmatprep.subr.bf16.mxu1 %v2011_v30  ;;  %v440_v8 = vld [vmem:[#allocation3 + $0xe8] sm:$0xff]  ;;  %v125_v9 = vld [vmem:[%s3321_s0 + $0x10] sm:$0xff]  ;;  %v442_v12 = vld [vmem:[#allocation3 + $0xf8] sm:$0xff]  ;;  %v2886_v13 = vpack.c.bf16 %v433_v5, %v429_v4 }
  0x43   :  { %v435_v14 = vld [vmem:[#allocation3 + $0xc0] sm:$0xff]  ;;  %v2890_v16 = vpack.c.bf16 %v440_v8, %v436_v7  ;;  %v437_v17 = vld [vmem:[#allocation3 + $0xd0] sm:$0xff]  ;;  %v2893_v19 = vpack.c.bf16 %v442_v12, %v438_v11  ;;  %v444_v20 = vld [vmem:[#allocation3 + $0x108] sm:$0xff] }
  0x44   :  { %1982 = vmatpush1.bf16.msra.mxu0 %v1981_v36  ;;  %v439_v15 = vld [vmem:[#allocation3 + $0xe0] sm:$0xff]  ;;  %v441_v18 = vld [vmem:[#allocation3 + $0xf0] sm:$0xff]  ;;  %v448_v21 = vld [vmem:[#allocation3 + $0x128] sm:$0xff] }
  0x45   :  { %2014 = vmatpush1.bf16.msra.mxu1 %v2013_v37  ;;  %2016 = vmatprep.subr.bf16.mxu0 %v2844_v38  ;;  %v126_v22 = vld [vmem:[%s3321_s0 + $0x18] sm:$0xff]  ;;  %v2899_v23 = vpack.c.bf16 %v439_v15, %v435_v14  ;;  %v2903_v26 = vpack.c.bf16 %v441_v18, %v437_v17  ;;  %v443_v27 = vld [vmem:[#allocation3 + $0x100] sm:$0xff]  ;;  %v2907_v29 = vpack.c.bf16 %v448_v21, %v444_v20  ;;  %v445_v30 = vld [vmem:[#allocation3 + $0x110] sm:$0xff] }
  0x46   :  { %2048 = vmatprep.subr.bf16.mxu1 %v2846_v41  ;;  %v446_v24 = vld [vmem:[#allocation3 + $0x118] sm:$0xff]  ;;  %v447_v28 = vld [vmem:[#allocation3 + $0x120] sm:$0xff]  ;;  %v449_v31 = vld [vmem:[#allocation3 + $0x130] sm:$0xff] }
  0x47   :  { %218 = vmatmul.mubr.f32.vlgmr.msra.gmra.mrb[0].mxu0 %v123_v46  ;;  %v450_v25 = vld [vmem:[#allocation3 + $0x138] sm:$0xff]  ;;  %v452_v33 = vld [vmem:[#allocation3 + $0x148] sm:$0xff]  ;;  %v127_v35 = vld [vmem:[%s3321_s0 + $0x20] sm:$0xff]  ;;  %v2916_v36 = vpack.c.bf16 %v447_v28, %v443_v27  ;;  %v2920_v40 = vpack.c.bf16 %v449_v31, %v445_v30  ;;  %v133_v30 = vlaneseq }
  0x48   :  { %331 = vmatmul.mubr.f32.vlgmr.msra.gmra.mrb[0].mxu1 %v123_v46  ;;  %2018 = vmatpush1.bf16.msra.mxu0 %v2851_v47  ;;  %v2910_v32 = vpack.c.bf16 %v450_v25, %v446_v24  ;;  %v456_v34 = vld [vmem:[#allocation3 + $0x168] sm:$0xff]  ;;  %v454_v37 = vld [vmem:[#allocation3 + $0x158] sm:$0xff]  ;;  %v451_v42 = vld [vmem:[#allocation3 + $0x140] sm:$0xff] }
  0x49   :  { %2050 = vmatpush1.bf16.msra.mxu1 %v2854_v50  ;;  %223 = vmatprep.mubr.f32.mxu0 %v2772_v0  ;;  %v458_v39 = vld [vmem:[#allocation3 + $0x178] sm:$0xff]  ;;  %v455_v43 = vld [vmem:[#allocation3 + $0x160] sm:$0xff]  ;;  %v2924_v44 = vpack.c.bf16 %v456_v34, %v452_v33  ;;  %v453_v45 = vld [vmem:[#allocation3 + $0x150] sm:$0xff]  ;;  %v134_v31 = vshrl.u32 %v133_v30, 7 }
  0x4a   :  { %336 = vmatprep.mubr.f32.mxu1 %v2772_v0  ;;  %2020 = vmatprep.subr.bf16.mxu0 %v2857_v53  ;;  %v457_v46 = vld [vmem:[#allocation3 + $0x170] sm:$0xff]  ;;  %v2927_v48 = vpack.c.bf16 %v458_v39, %v454_v37  ;;  %v460_v49 = vld [vmem:[#allocation3 + $0x188] sm:$0xff]  ;;  %v2933_v54 = vpack.c.bf16 %v455_v43, %v451_v42  ;;  %v462_v55 = vld [vmem:[#allocation3 + $0x198] sm:$0xff] }
  0x4b   :  { %224 = vmatmul.mubr.f32.gmra.mrb[2].mxu0 %v124_v59  ;;  %2052 = vmatprep.subr.bf16.mxu1 %v2859_v56  ;;  %v464_v51 = vld [vmem:[#allocation3 + $0x1a8] sm:$0xff]  ;;  %v466_v57 = vld [vmem:[#allocation3 + $0x1b8] sm:$0xff]  ;;  %v2937_v58 = vpack.c.bf16 %v457_v46, %v453_v45  ;;  %v463_v61 = vld [vmem:[#allocation3 + $0x1a0] sm:$0xff]  ;;  %v135_v33 = vsub.s32 0, %v134_v31  ;;  %v143_v43 = vsub.s32 2, %v134_v31 }
  0x4c   :  { %337 = vmatmul.mubr.f32.gmra.mrb[2].mxu1 %v124_v59  ;;  %2022 = vmatpush1.bf16.msra.mxu0 %v2865_v60  ;;  %v128_v52 = vld [vmem:[%s3321_s0 + $0x28] sm:$0xff]  ;;  %v459_v59 = vld [vmem:[#allocation3 + $0x180] sm:$0xff]  ;;  %v2941_v62 = vpack.c.bf16 %v464_v51, %v460_v49  ;;  %v461_v1 = vld [vmem:[#allocation3 + $0x190] sm:$0xff]  ;;  %v2944_v4 = vpack.c.bf16 %v466_v57, %v462_v55 }
  0x4d   :  { %2054 = vmatpush1.bf16.msra.mxu1 %v2869_v63  ;;  %229 = vmatprep.mubr.f32.mxu0 %v2772_v0  ;;  %v465_v2 = vld [vmem:[#allocation3 + $0x1b0] sm:$0xff]  ;;  %v468_v5 = vld [vmem:[#allocation3 + $0x1c8] sm:$0xff]  ;;  %v470_v11 = vld [vmem:[#allocation3 + $0x1d8] sm:$0xff] }
  0x4e   :  { %342 = vmatprep.mubr.f32.mxu1 %v2772_v0  ;;  %2024 = vmatprep.subr.bf16.mxu0 %v2873_v3  ;;  %v472_v7 = vld [vmem:[#allocation3 + $0x1e8] sm:$0xff]  ;;  %v129_v8 = vld [vmem:[%s3321_s0 + $0x30] sm:$0xff]  ;;  %v474_v12 = vld [vmem:[#allocation3 + $0x1f8] sm:$0xff]  ;;  %v2954_v14 = vpack.c.bf16 %v465_v2, %v461_v1 }
  0x4f   :  { %230 = vmatmul.mubr.f32.gmra.mrb[4].mxu0 %v125_v9  ;;  %2056 = vmatprep.subr.bf16.mxu1 %v2876_v6  ;;  %v467_v15 = vld [vmem:[#allocation3 + $0x1c0] sm:$0xff]  ;;  %v2958_v18 = vpack.c.bf16 %v472_v7, %v468_v5  ;;  %v469_v20 = vld [vmem:[#allocation3 + $0x1d0] sm:$0xff]  ;;  %v130_v24 = vld [vmem:[%s3321_s0 + $0x38] sm:$0xff] }
  0x50   :  { %343 = vmatmul.mubr.f32.gmra.mrb[4].mxu1 %v125_v9  ;;  %2026 = vmatpush1.bf16.msra.mxu0 %v2882_v10  ;;  %v2950_v9 = vpack.c.bf16 %v463_v61, %v459_v59  ;;  %v471_v17 = vld [vmem:[#allocation3 + $0x1e0] sm:$0xff]  ;;  %v473_v21 = vld [vmem:[#allocation3 + $0x1f0] sm:$0xff]  ;;  %v147_v61 = vsub.s32 3, %v134_v31 }
  0x51   :  { %2058 = vmatpush1.bf16.msra.mxu1 %v2886_v13  ;;  %235 = vmatprep.mubr.f32.mxu0 %v2772_v0  ;;  %v2967_v25 = vpack.c.bf16 %v471_v17, %v467_v15  ;;  %v2971_v27 = vpack.c.bf16 %v473_v21, %v469_v20  ;;  %v55_v28 = vld [vmem:[%s3324_s4] sm:$0xff] }
  0x52   :  { %348 = vmatprep.mubr.f32.mxu1 %v2772_v0  ;;  %2028 = vmatprep.subr.bf16.mxu0 %v2890_v16  ;;  %v131_v34 = vld [vmem:[%s3323_s3] sm:$0xf] }
  0x53   :  { %236 = vmatmul.mubr.f32.gmra.mrb[6].mxu0 %v126_v22  ;;  %2060 = vmatprep.subr.bf16.mxu1 %v2893_v19  ;;  %v3022_v37 = vrot.slane %v131_v34, %v135_v33  ;;  %v3028_v57 = vrot.slane %v131_v34, %v143_v43  ;;  %v3031_v2 = vrot.slane %v131_v34, %v147_v61 }
  0x54   :  { %349 = vmatmul.mubr.f32.gmra.mrb[6].mxu1 %v126_v22  ;;  %2030 = vmatpush1.bf16.msra.mxu0 %v2899_v23  ;;  %v2961_v22 = vpack.c.bf16 %v474_v12, %v470_v11 }
  0x55   :  { %2062 = vmatpush1.bf16.msra.mxu1 %v2903_v26  ;;  %241 = vmatprep.mubr.f32.mxu0 %v2772_v0 }
  0x56   :  { %354 = vmatprep.mubr.f32.mxu1 %v2772_v0  ;;  %2032 = vmatprep.subr.bf16.mxu0 %v2907_v29 }
  0x57   :  { %242 = vmatmul.mubr.f32.gmra.mrb[8].mxu0 %v127_v35  ;;  %2064 = vmatprep.subr.bf16.mxu1 %v2910_v32 }
  0x58   :  { %355 = vmatmul.mubr.f32.gmra.mrb[8].mxu1 %v127_v35  ;;  %2034 = vmatpush1.bf16.msra.mxu0 %v2916_v36  ;;  %v139_v35 = vsub.s32 1, %v134_v31 }
  0x59   :  { %2066 = vmatpush1.bf16.msra.mxu1 %v2920_v40  ;;  %247 = vmatprep.mubr.f32.mxu0 %v2772_v0 }
  0x5a   :  { %360 = vmatprep.mubr.f32.mxu1 %v2772_v0  ;;  %2036 = vmatprep.subr.bf16.mxu0 %v2924_v44  ;;  %v3024_v39 = vrot.slane %v131_v34, %v139_v35 }
  0x5b   :  { %248 = vmatmul.mubr.f32.gmra.mrb[10].mxu0 %v128_v52  ;;  %2068 = vmatprep.subr.bf16.mxu1 %v2927_v48 }
  0x5c   :  { %361 = vmatmul.mubr.f32.gmra.mrb[10].mxu1 %v128_v52  ;;  %2038 = vmatpush1.bf16.msra.mxu0 %v2933_v54 }
  0x5d   :  { %2070 = vmatpush1.bf16.msra.mxu1 %v2937_v58  ;;  %253 = vmatprep.mubr.f32.mxu0 %v2772_v0 }
  0x5e   :  { %366 = vmatprep.mubr.f32.mxu1 %v2772_v0  ;;  %2040 = vmatprep.subr.bf16.mxu0 %v2941_v62 }
  0x5f   :  { %254 = vmatmul.mubr.f32.gmra.mrb[12].mxu0 %v129_v8  ;;  %2072 = vmatprep.subr.bf16.mxu1 %v2944_v4 }
  0x60   :  { %367 = vmatmul.mubr.f32.gmra.mrb[12].mxu1 %v129_v8  ;;  %2042 = vmatpush1.bf16.msra.mxu0 %v2950_v9 }
  0x61   :  { %2074 = vmatpush1.bf16.msra.mxu1 %v2954_v14  ;;  %259 = vmatprep.mubr.f32.mxu0 %v2772_v0 }
  0x62   :  { %372 = vmatprep.mubr.f32.mxu1 %v2772_v0  ;;  %2044 = vmatprep.subr.bf16.mxu0 %v2958_v18 }
  0x63   :  { %260 = vmatmul.mubr.f32.gmra.mrb[14].mxu0 %v130_v24  ;;  %2076 = vmatprep.subr.bf16.mxu1 %v2961_v22 }
  0x64   :  { %373 = vmatmul.mubr.f32.gmra.mrb[14].mxu1 %v130_v24  ;;  %2046 = vmatpush1.bf16.msra.mxu0 %v2967_v25  ;;  %v57_v24 = vld [vmem:[%s3325_s5] sm:$0xff] }
  0x65   :  { %2078 = vmatpush1.bf16.msra.mxu1 %v2971_v27  ;;  %545 = vmatprep.mubr.f32.mxu0 %v2772_v0 }
  0x66   :  { %616 = vmatprep.mubr.f32.mxu1 %v2772_v0  ;;  %2080 = vmatprep.subr.bf16.mxu0 %v2844_v38 }
  0x67   :  { %546 = vmatmul.mubr.f32.vlgmr.msra.gmra.mrb[0].mxu0 %v55_v28  ;;  %2112 = vmatprep.subr.bf16.mxu1 %v2846_v41 }
  0x68   :  { %617 = vmatmul.mubr.f32.vlgmr.msra.gmra.mrb[0].mxu1 %v55_v28  ;;  %2082 = vmatpush1.bf16.msra.mxu0 %v2851_v47 }
  0x69   :  { %2114 = vmatpush1.bf16.msra.mxu1 %v2854_v50  ;;  %2084 = vmatprep.subr.bf16.mxu0 %v2857_v53 }
  0x6a   :  { %2116 = vmatprep.subr.bf16.mxu1 %v2859_v56  ;;  %721 = vmatprep.mubr.f32.mxu0 %v2772_v0 }
  0x6b   :  { %792 = vmatprep.mubr.f32.mxu1 %v2772_v0 }
  0x6c   :  { %2086 = vmatpush1.bf16.msra.mxu0 %v2865_v60 }
  0x6d   :  { %2118 = vmatpush1.bf16.msra.mxu1 %v2869_v63  ;;  %2088 = vmatprep.subr.bf16.mxu0 %v2873_v3 }
  0x6e   :  { %2120 = vmatprep.subr.bf16.mxu1 %v2876_v6 }
  0x70   :  { %2090 = vmatpush1.bf16.msra.mxu0 %v2882_v10 }
  0x71   :  { %2122 = vmatpush1.bf16.msra.mxu1 %v2886_v13  ;;  %2092 = vmatprep.subr.bf16.mxu0 %v2890_v16 }
  0x72   :  { %2124 = vmatprep.subr.bf16.mxu1 %v2893_v19 }
  0x74   :  { %2094 = vmatpush1.bf16.msra.mxu0 %v2899_v23 }
  0x75   :  { %2126 = vmatpush1.bf16.msra.mxu1 %v2903_v26  ;;  %2096 = vmatprep.subr.bf16.mxu0 %v2907_v29 }
  0x76   :  { %2128 = vmatprep.subr.bf16.mxu1 %v2910_v32 }
  0x78   :  { %2098 = vmatpush1.bf16.msra.mxu0 %v2916_v36 }
  0x79   :  { %2130 = vmatpush1.bf16.msra.mxu1 %v2920_v40  ;;  %2100 = vmatprep.subr.bf16.mxu0 %v2924_v44 }
  0x7a   :  { %2132 = vmatprep.subr.bf16.mxu1 %v2927_v48 }
  0x7c   :  { %2102 = vmatpush1.bf16.msra.mxu0 %v2933_v54 }
  0x7d   :  { %2134 = vmatpush1.bf16.msra.mxu1 %v2937_v58  ;;  %2104 = vmatprep.subr.bf16.mxu0 %v2941_v62 }
  0x7e   :  { %2136 = vmatprep.subr.bf16.mxu1 %v2944_v4 }
  0x80   :  { %2106 = vmatpush1.bf16.msra.mxu0 %v2950_v9 }
  0x81   :  { %2138 = vmatpush1.bf16.msra.mxu1 %v2954_v14  ;;  %2108 = vmatprep.subr.bf16.mxu0 %v2958_v18 }
  0x82   :  { %2140 = vmatprep.subr.bf16.mxu1 %v2961_v22 }
  0x84   :  { %2110 = vmatpush1.bf16.msra.mxu0 %v2967_v25 }
  0x85   :  { %2142 = vmatpush1.bf16.msra.mxu1 %v2971_v27  ;;  %2144 = vmatprep.subr.bf16.mxu0 %v2844_v38 }
  0x86   :  { %2176 = vmatprep.subr.bf16.mxu1 %v2846_v41 }
 0x13a   :  { %v547_v42 = vpop.f32.mrb[0].mxu0 }
 0x13b   :  { %v2527_v45 = vadd.f32 %v547_v42, %v3022_v37  ;;  %v618_v46 = vpop.f32.mrb[0].mxu1  ;;  %v549_v49 = vpop.f32.mrb[1].mxu0 }
 0x13c   :  { %v2528_v51 = vadd.f32 %v549_v49, %v3024_v39  ;;  %v620_v52 = vpop.f32.mrb[1].mxu1  ;;  %v2543_v1 = vadd.f32 %v618_v46, %v3028_v57 }
 0x13d   :  { %v1918_v55 = vmul.f32 -1.442695, %v2527_v45  ;;  %v2544_v7 = vadd.f32 %v620_v52, %v3031_v2 }
 0x13e   :  { %v1919_v59 = vmul.f32 -1.442695, %v2528_v51  ;;  %v1920_v5 = vmul.f32 -1.442695, %v2543_v1 }
 0x13f   :  { %2594 = vpow2.f32 %v1918_v55 }
 0x140   :  { %2596 = vpow2.f32 %v1919_v59 }
 0x141   :  { %2598 = vpow2.f32 %v1920_v5 }
 0x142   :  { %2600 = vtanh.f32 %v2544_v7 }
 0x149   :  { %v2595_v8 = vpop.eup %2594 }
 0x14a   :  { %v636_v11 = vadd.f32 1.0, %v2595_v8  ;;  %v2597_v12 = vpop.eup %2596 }
 0x14b   :  { %v637_v15 = vadd.f32 1.0, %v2597_v12  ;;  %v2599_v17 = vpop.eup %2598 }
 0x14c   :  { %2602 = vrcp.f32 %v636_v11  ;;  %v2601_v20 = vpop.eup %2600  ;;  %v638_v31 = vadd.f32 1.0, %v2599_v17 }
 0x14d   :  { %2604 = vrcp.f32 %v637_v15 }
 0x14e   :  { %2606 = vrcp.f32 %v638_v31 }
 0x156   :  { %v2603_v21 = vpop.eup %2602 }
 0x157   :  { %v647_v28 = vmul.f32 %v2603_v21, %v2601_v20  ;;  %v2605_v30 = vpop.eup %2604 }
 0x158   :  { %v646_v33 = vmul.f32 %v2605_v30, %v57_v24  ;;  %v2607_v35 = vpop.eup %2606 }
 0x15a   :  { %v3037_v34 = vadd.f32 %v647_v28, %v646_v33 }
 0x15c   :  { %2608 = vtanh.f32 %v3037_v34 }
 0x166   :  { %v2609_v42 = vpop.eup %2608 }
 0x167   :  { %v650_v43 = vmul.f32 %v2609_v42, %v2607_v35 }
 0x169   :  { %651 = vst [vmem:[%s3326_s6] sm:$0xff] %v650_v43  ;;  %722 = vmatmul.mubr.f32.vlgmr.msra.gmra.mrb[2].mxu0 %v650_v43  ;;  %793 = vmatmul.mubr.f32.vlgmr.msra.gmra.mrb[2].mxu1 %v650_v43 }
 0x16a   :  { %2146 = vmatpush1.bf16.msra.mxu0 %v2851_v47  ;;  %2178 = vmatpush1.bf16.msra.mxu1 %v2854_v50 }
 0x16b   :  { %2148 = vmatprep.subr.bf16.mxu0 %v2857_v53  ;;  %2180 = vmatprep.subr.bf16.mxu1 %v2859_v56 }
 0x16c   :  { %898 = vmatprep.mubr.f32.mxu0 %v2772_v0  ;;  %969 = vmatprep.mubr.f32.mxu1 %v2772_v0 }
 0x16e   :  { %2150 = vmatpush1.bf16.msra.mxu0 %v2865_v60  ;;  %2182 = vmatpush1.bf16.msra.mxu1 %v2869_v63 }
 0x16f   :  { %2152 = vmatprep.subr.bf16.mxu0 %v2873_v3  ;;  %2184 = vmatprep.subr.bf16.mxu1 %v2876_v6 }
 0x172   :  { %2154 = vmatpush1.bf16.msra.mxu0 %v2882_v10  ;;  %2186 = vmatpush1.bf16.msra.mxu1 %v2886_v13 }
 0x173   :  { %2156 = vmatprep.subr.bf16.mxu0 %v2890_v16  ;;  %2188 = vmatprep.subr.bf16.mxu1 %v2893_v19 }
 0x176   :  { %2158 = vmatpush1.bf16.msra.mxu0 %v2899_v23  ;;  %2190 = vmatpush1.bf16.msra.mxu1 %v2903_v26 }
 0x177   :  { %2160 = vmatprep.subr.bf16.mxu0 %v2907_v29  ;;  %2192 = vmatprep.subr.bf16.mxu1 %v2910_v32 }
 0x17a   :  { %2162 = vmatpush1.bf16.msra.mxu0 %v2916_v36  ;;  %2194 = vmatpush1.bf16.msra.mxu1 %v2920_v40 }
 0x17b   :  { %2164 = vmatprep.subr.bf16.mxu0 %v2924_v44  ;;  %2196 = vmatprep.subr.bf16.mxu1 %v2927_v48 }
 0x17e   :  { %2166 = vmatpush1.bf16.msra.mxu0 %v2933_v54  ;;  %2198 = vmatpush1.bf16.msra.mxu1 %v2937_v58 }
 0x17f   :  { %2168 = vmatprep.subr.bf16.mxu0 %v2941_v62  ;;  %2200 = vmatprep.subr.bf16.mxu1 %v2944_v4 }
 0x182   :  { %2170 = vmatpush1.bf16.msra.mxu0 %v2950_v9  ;;  %2202 = vmatpush1.bf16.msra.mxu1 %v2954_v14 }
 0x183   :  { %2172 = vmatprep.subr.bf16.mxu0 %v2958_v18  ;;  %2204 = vmatprep.subr.bf16.mxu1 %v2961_v22 }
 0x186   :  { %2174 = vmatpush1.bf16.msra.mxu0 %v2967_v25  ;;  %2206 = vmatpush1.bf16.msra.mxu1 %v2971_v27 }
 0x187   :  { %2208 = vmatprep.subr.bf16.mxu0 %v2844_v38  ;;  %2240 = vmatprep.subr.bf16.mxu1 %v2846_v41 }
 0x23c   :  { %v723_v45 = vpop.f32.mrb[2].mxu0  ;;  %v794_v46 = vpop.f32.mrb[2].mxu1 }
 0x23d   :  { %v2529_v49 = vadd.f32 %v723_v45, %v3022_v37  ;;  %v725_v51 = vpop.f32.mrb[3].mxu0  ;;  %v796_v52 = vpop.f32.mrb[3].mxu1  ;;  %v2545_v1 = vadd.f32 %v794_v46, %v3028_v57 }
 0x23e   :  { %v2530_v55 = vadd.f32 %v725_v51, %v3024_v39  ;;  %v2546_v5 = vadd.f32 %v796_v52, %v3031_v2 }
 0x23f   :  { %v1921_v59 = vmul.f32 -1.442695, %v2529_v49  ;;  %v1923_v7 = vmul.f32 -1.442695, %v2545_v1 }
 0x240   :  { %v1922_v61 = vmul.f32 -1.442695, %v2530_v55 }
 0x241   :  { %2610 = vpow2.f32 %v1921_v59 }
 0x242   :  { %2612 = vpow2.f32 %v1922_v61 }
 0x243   :  { %2614 = vtanh.f32 %v2546_v5 }
 0x244   :  { %2616 = vpow2.f32 %v1923_v7 }
 0x24b   :  { %v2611_v8 = vpop.eup %2610 }
 0x24c   :  { %v812_v11 = vadd.f32 1.0, %v2611_v8  ;;  %v2613_v12 = vpop.eup %2612 }
 0x24d   :  { %v813_v15 = vadd.f32 1.0, %v2613_v12  ;;  %v2615_v17 = vpop.eup %2614 }
 0x24e   :  { %2618 = vrcp.f32 %v812_v11  ;;  %v2617_v20 = vpop.eup %2616 }
 0x24f   :  { %2620 = vrcp.f32 %v813_v15  ;;  %v814_v30 = vadd.f32 1.0, %v2617_v20 }
 0x251   :  { %2622 = vrcp.f32 %v814_v30 }
 0x258   :  { %v2619_v21 = vpop.eup %2618 }
 0x259   :  { %v823_v24 = vmul.f32 %v2619_v21, %v2615_v17  ;;  %v2621_v28 = vpop.eup %2620 }
 0x25a   :  { %v822_v31 = vmul.f32 %v2621_v28, %v3037_v34 }
 0x25b   :  { %v2623_v35 = vpop.eup %2622 }
 0x25c   :  { %v3082_v33 = vadd.f32 %v823_v24, %v822_v31 }
 0x25e   :  { %2624 = vtanh.f32 %v3082_v33 }
 0x268   :  { %v2625_v42 = vpop.eup %2624 }
 0x269   :  { %v826_v43 = vmul.f32 %v2625_v42, %v2623_v35 }
 0x26b   :  { %1924 = vst [vmem:[%s3326_s6 + $0x8] sm:$0xff] %v826_v43  ;;  %899 = vmatmul.mubr.f32.vlgmr.msra.gmra.mrb[4].mxu0 %v826_v43  ;;  %970 = vmatmul.mubr.f32.vlgmr.msra.gmra.mrb[4].mxu1 %v826_v43 }
 0x26c   :  { %2210 = vmatpush1.bf16.msra.mxu0 %v2851_v47  ;;  %2242 = vmatpush1.bf16.msra.mxu1 %v2854_v50 }
 0x26d   :  { %2212 = vmatprep.subr.bf16.mxu0 %v2857_v53  ;;  %2244 = vmatprep.subr.bf16.mxu1 %v2859_v56 }
 0x26e   :  { %1075 = vmatprep.mubr.f32.mxu0 %v2772_v0  ;;  %1146 = vmatprep.mubr.f32.mxu1 %v2772_v0 }
 0x270   :  { %2214 = vmatpush1.bf16.msra.mxu0 %v2865_v60  ;;  %2246 = vmatpush1.bf16.msra.mxu1 %v2869_v63 }
 0x271   :  { %2216 = vmatprep.subr.bf16.mxu0 %v2873_v3  ;;  %2248 = vmatprep.subr.bf16.mxu1 %v2876_v6 }
 0x274   :  { %2218 = vmatpush1.bf16.msra.mxu0 %v2882_v10  ;;  %2250 = vmatpush1.bf16.msra.mxu1 %v2886_v13 }
 0x275   :  { %2220 = vmatprep.subr.bf16.mxu0 %v2890_v16  ;;  %2252 = vmatprep.subr.bf16.mxu1 %v2893_v19 }
 0x278   :  { %2222 = vmatpush1.bf16.msra.mxu0 %v2899_v23  ;;  %2254 = vmatpush1.bf16.msra.mxu1 %v2903_v26 }
 0x279   :  { %2224 = vmatprep.subr.bf16.mxu0 %v2907_v29  ;;  %2256 = vmatprep.subr.bf16.mxu1 %v2910_v32 }
 0x27c   :  { %2226 = vmatpush1.bf16.msra.mxu0 %v2916_v36  ;;  %2258 = vmatpush1.bf16.msra.mxu1 %v2920_v40 }
 0x27d   :  { %2228 = vmatprep.subr.bf16.mxu0 %v2924_v44  ;;  %2260 = vmatprep.subr.bf16.mxu1 %v2927_v48 }
 0x280   :  { %2230 = vmatpush1.bf16.msra.mxu0 %v2933_v54  ;;  %2262 = vmatpush1.bf16.msra.mxu1 %v2937_v58 }
 0x281   :  { %2232 = vmatprep.subr.bf16.mxu0 %v2941_v62  ;;  %2264 = vmatprep.subr.bf16.mxu1 %v2944_v4 }
 0x284   :  { %2234 = vmatpush1.bf16.msra.mxu0 %v2950_v9  ;;  %2266 = vmatpush1.bf16.msra.mxu1 %v2954_v14 }
 0x285   :  { %2236 = vmatprep.subr.bf16.mxu0 %v2958_v18  ;;  %2268 = vmatprep.subr.bf16.mxu1 %v2961_v22 }
 0x288   :  { %2238 = vmatpush1.bf16.msra.mxu0 %v2967_v25  ;;  %2270 = vmatpush1.bf16.msra.mxu1 %v2971_v27 }
 0x289   :  { %2272 = vmatprep.subr.bf16.mxu0 %v2844_v38  ;;  %2304 = vmatprep.subr.bf16.mxu1 %v2846_v41 }
 0x33e   :  { %v900_v34 = vpop.f32.mrb[4].mxu0  ;;  %v971_v45 = vpop.f32.mrb[4].mxu1 }
 0x33f   :  { %v2531_v46 = vadd.f32 %v900_v34, %v3022_v37  ;;  %v902_v49 = vpop.f32.mrb[5].mxu0  ;;  %v973_v51 = vpop.f32.mrb[5].mxu1  ;;  %v2547_v61 = vadd.f32 %v971_v45, %v3028_v57 }
 0x340   :  { %v2532_v52 = vadd.f32 %v902_v49, %v3024_v39  ;;  %v2548_v1 = vadd.f32 %v973_v51, %v3031_v2 }
 0x341   :  { %v1925_v55 = vmul.f32 -1.442695, %v2531_v46  ;;  %v1927_v5 = vmul.f32 -1.442695, %v2547_v61 }
 0x342   :  { %v1926_v59 = vmul.f32 -1.442695, %v2532_v52 }
 0x343   :  { %2626 = vpow2.f32 %v1925_v55 }
 0x344   :  { %2628 = vpow2.f32 %v1926_v59 }
 0x345   :  { %2630 = vtanh.f32 %v2548_v1 }
 0x346   :  { %2632 = vpow2.f32 %v1927_v5 }
 0x34d   :  { %v2627_v7 = vpop.eup %2626 }
 0x34e   :  { %v989_v8 = vadd.f32 1.0, %v2627_v7  ;;  %v2629_v11 = vpop.eup %2628 }
 0x34f   :  { %v990_v12 = vadd.f32 1.0, %v2629_v11  ;;  %v2631_v15 = vpop.eup %2630 }
 0x350   :  { %2634 = vrcp.f32 %v989_v8  ;;  %v2633_v17 = vpop.eup %2632 }
 0x351   :  { %2636 = vrcp.f32 %v990_v12  ;;  %v991_v28 = vadd.f32 1.0, %v2633_v17 }
 0x353   :  { %2638 = vrcp.f32 %v991_v28 }
 0x35a   :  { %v2635_v20 = vpop.eup %2634 }
 0x35b   :  { %v1000_v21 = vmul.f32 %v2635_v20, %v2631_v15  ;;  %v2637_v24 = vpop.eup %2636 }
 0x35c   :  { %v999_v30 = vmul.f32 %v2637_v24, %v3082_v33 }
 0x35d   :  { %v2639_v35 = vpop.eup %2638 }
 0x35e   :  { %v3127_v31 = vadd.f32 %v1000_v21, %v999_v30 }
 0x360   :  { %2640 = vtanh.f32 %v3127_v31 }
 0x36a   :  { %v2641_v42 = vpop.eup %2640 }
 0x36b   :  { %v1003_v43 = vmul.f32 %v2641_v42, %v2639_v35 }
 0x36d   :  { %1928 = vst [vmem:[%s3326_s6 + $0x10] sm:$0xff] %v1003_v43  ;;  %1076 = vmatmul.mubr.f32.vlgmr.msra.gmra.mrb[6].mxu0 %v1003_v43  ;;  %1147 = vmatmul.mubr.f32.vlgmr.msra.gmra.mrb[6].mxu1 %v1003_v43 }
 0x36e   :  { %2274 = vmatpush1.bf16.msra.mxu0 %v2851_v47  ;;  %2306 = vmatpush1.bf16.msra.mxu1 %v2854_v50 }
 0x36f   :  { %2276 = vmatprep.subr.bf16.mxu0 %v2857_v53  ;;  %2308 = vmatprep.subr.bf16.mxu1 %v2859_v56 }
 0x370   :  { %1252 = vmatprep.mubr.f32.mxu0 %v2772_v0  ;;  %1323 = vmatprep.mubr.f32.mxu1 %v2772_v0 }
 0x372   :  { %2278 = vmatpush1.bf16.msra.mxu0 %v2865_v60  ;;  %2310 = vmatpush1.bf16.msra.mxu1 %v2869_v63 }
 0x373   :  { %2280 = vmatprep.subr.bf16.mxu0 %v2873_v3  ;;  %2312 = vmatprep.subr.bf16.mxu1 %v2876_v6 }
 0x376   :  { %2282 = vmatpush1.bf16.msra.mxu0 %v2882_v10  ;;  %2314 = vmatpush1.bf16.msra.mxu1 %v2886_v13 }
 0x377   :  { %2284 = vmatprep.subr.bf16.mxu0 %v2890_v16  ;;  %2316 = vmatprep.subr.bf16.mxu1 %v2893_v19 }
 0x37a   :  { %2286 = vmatpush1.bf16.msra.mxu0 %v2899_v23  ;;  %2318 = vmatpush1.bf16.msra.mxu1 %v2903_v26 }
 0x37b   :  { %2288 = vmatprep.subr.bf16.mxu0 %v2907_v29  ;;  %2320 = vmatprep.subr.bf16.mxu1 %v2910_v32 }
 0x37e   :  { %2290 = vmatpush1.bf16.msra.mxu0 %v2916_v36  ;;  %2322 = vmatpush1.bf16.msra.mxu1 %v2920_v40 }
 0x37f   :  { %2292 = vmatprep.subr.bf16.mxu0 %v2924_v44  ;;  %2324 = vmatprep.subr.bf16.mxu1 %v2927_v48 }
 0x382   :  { %2294 = vmatpush1.bf16.msra.mxu0 %v2933_v54  ;;  %2326 = vmatpush1.bf16.msra.mxu1 %v2937_v58 }
 0x383   :  { %2296 = vmatprep.subr.bf16.mxu0 %v2941_v62  ;;  %2328 = vmatprep.subr.bf16.mxu1 %v2944_v4 }
 0x386   :  { %2298 = vmatpush1.bf16.msra.mxu0 %v2950_v9  ;;  %2330 = vmatpush1.bf16.msra.mxu1 %v2954_v14 }
 0x387   :  { %2300 = vmatprep.subr.bf16.mxu0 %v2958_v18  ;;  %2332 = vmatprep.subr.bf16.mxu1 %v2961_v22 }
 0x38a   :  { %2302 = vmatpush1.bf16.msra.mxu0 %v2967_v25  ;;  %2334 = vmatpush1.bf16.msra.mxu1 %v2971_v27 }
 0x38b   :  { %2336 = vmatprep.subr.bf16.mxu0 %v2844_v38  ;;  %2368 = vmatprep.subr.bf16.mxu1 %v2846_v41 }
 0x440   :  { %v1077_v33 = vpop.f32.mrb[6].mxu0  ;;  %v1148_v34 = vpop.f32.mrb[6].mxu1 }
 0x441   :  { %v2533_v45 = vadd.f32 %v1077_v33, %v3022_v37  ;;  %v1079_v46 = vpop.f32.mrb[7].mxu0  ;;  %v1150_v49 = vpop.f32.mrb[7].mxu1  ;;  %v2549_v59 = vadd.f32 %v1148_v34, %v3028_v57 }
 0x442   :  { %v2534_v51 = vadd.f32 %v1079_v46, %v3024_v39  ;;  %v2550_v61 = vadd.f32 %v1150_v49, %v3031_v2 }
 0x443   :  { %v1929_v52 = vmul.f32 -1.442695, %v2533_v45  ;;  %v1931_v1 = vmul.f32 -1.442695, %v2549_v59 }
 0x444   :  { %v1930_v55 = vmul.f32 -1.442695, %v2534_v51 }
 0x445   :  { %2642 = vpow2.f32 %v1929_v52 }
 0x446   :  { %2644 = vpow2.f32 %v1930_v55 }
 0x447   :  { %2646 = vtanh.f32 %v2550_v61 }
 0x448   :  { %2648 = vpow2.f32 %v1931_v1 }
 0x44f   :  { %v2643_v5 = vpop.eup %2642 }
 0x450   :  { %v1166_v7 = vadd.f32 1.0, %v2643_v5  ;;  %v2645_v8 = vpop.eup %2644 }
 0x451   :  { %v1167_v11 = vadd.f32 1.0, %v2645_v8  ;;  %v2647_v12 = vpop.eup %2646 }
 0x452   :  { %2650 = vrcp.f32 %v1166_v7  ;;  %v2649_v15 = vpop.eup %2648 }
 0x453   :  { %2652 = vrcp.f32 %v1167_v11  ;;  %v1168_v24 = vadd.f32 1.0, %v2649_v15 }
 0x455   :  { %2654 = vrcp.f32 %v1168_v24 }
 0x45c   :  { %v2651_v17 = vpop.eup %2650 }
 0x45d   :  { %v1177_v20 = vmul.f32 %v2651_v17, %v2647_v12  ;;  %v2653_v21 = vpop.eup %2652 }
 0x45e   :  { %v1176_v28 = vmul.f32 %v2653_v21, %v3127_v31 }
 0x45f   :  { %v2655_v35 = vpop.eup %2654 }
 0x460   :  { %v3172_v30 = vadd.f32 %v1177_v20, %v1176_v28 }
 0x462   :  { %2656 = vtanh.f32 %v3172_v30 }
 0x46c   :  { %v2657_v42 = vpop.eup %2656 }
 0x46d   :  { %v1180_v43 = vmul.f32 %v2657_v42, %v2655_v35 }
 0x46f   :  { %1932 = vst [vmem:[%s3326_s6 + $0x18] sm:$0xff] %v1180_v43  ;;  %1253 = vmatmul.mubr.f32.vlgmr.msra.gmra.mrb[8].mxu0 %v1180_v43  ;;  %1324 = vmatmul.mubr.f32.vlgmr.msra.gmra.mrb[8].mxu1 %v1180_v43 }
 0x470   :  { %2338 = vmatpush1.bf16.msra.mxu0 %v2851_v47  ;;  %2370 = vmatpush1.bf16.msra.mxu1 %v2854_v50 }
 0x471   :  { %2340 = vmatprep.subr.bf16.mxu0 %v2857_v53  ;;  %2372 = vmatprep.subr.bf16.mxu1 %v2859_v56 }
 0x472   :  { %1429 = vmatprep.mubr.f32.mxu0 %v2772_v0  ;;  %1500 = vmatprep.mubr.f32.mxu1 %v2772_v0 }
 0x474   :  { %2342 = vmatpush1.bf16.msra.mxu0 %v2865_v60  ;;  %2374 = vmatpush1.bf16.msra.mxu1 %v2869_v63 }
 0x475   :  { %2344 = vmatprep.subr.bf16.mxu0 %v2873_v3  ;;  %2376 = vmatprep.subr.bf16.mxu1 %v2876_v6 }
 0x478   :  { %2346 = vmatpush1.bf16.msra.mxu0 %v2882_v10  ;;  %2378 = vmatpush1.bf16.msra.mxu1 %v2886_v13 }
 0x479   :  { %2348 = vmatprep.subr.bf16.mxu0 %v2890_v16  ;;  %2380 = vmatprep.subr.bf16.mxu1 %v2893_v19 }
 0x47c   :  { %2350 = vmatpush1.bf16.msra.mxu0 %v2899_v23  ;;  %2382 = vmatpush1.bf16.msra.mxu1 %v2903_v26 }
 0x47d   :  { %2352 = vmatprep.subr.bf16.mxu0 %v2907_v29  ;;  %2384 = vmatprep.subr.bf16.mxu1 %v2910_v32 }
 0x480   :  { %2354 = vmatpush1.bf16.msra.mxu0 %v2916_v36  ;;  %2386 = vmatpush1.bf16.msra.mxu1 %v2920_v40 }
 0x481   :  { %2356 = vmatprep.subr.bf16.mxu0 %v2924_v44  ;;  %2388 = vmatprep.subr.bf16.mxu1 %v2927_v48 }
 0x484   :  { %2358 = vmatpush1.bf16.msra.mxu0 %v2933_v54  ;;  %2390 = vmatpush1.bf16.msra.mxu1 %v2937_v58 }
 0x485   :  { %2360 = vmatprep.subr.bf16.mxu0 %v2941_v62  ;;  %2392 = vmatprep.subr.bf16.mxu1 %v2944_v4 }
 0x488   :  { %2362 = vmatpush1.bf16.msra.mxu0 %v2950_v9  ;;  %2394 = vmatpush1.bf16.msra.mxu1 %v2954_v14 }
 0x489   :  { %2364 = vmatprep.subr.bf16.mxu0 %v2958_v18  ;;  %2396 = vmatprep.subr.bf16.mxu1 %v2961_v22 }
 0x48c   :  { %2366 = vmatpush1.bf16.msra.mxu0 %v2967_v25  ;;  %2398 = vmatpush1.bf16.msra.mxu1 %v2971_v27 }
 0x48d   :  { %2400 = vmatprep.subr.bf16.mxu0 %v2844_v38  ;;  %2432 = vmatprep.subr.bf16.mxu1 %v2846_v41 }
 0x542   :  { %v1254_v31 = vpop.f32.mrb[8].mxu0  ;;  %v1325_v33 = vpop.f32.mrb[8].mxu1 }
 0x543   :  { %v2535_v34 = vadd.f32 %v1254_v31, %v3022_v37  ;;  %v1256_v45 = vpop.f32.mrb[9].mxu0  ;;  %v1327_v46 = vpop.f32.mrb[9].mxu1  ;;  %v2551_v55 = vadd.f32 %v1325_v33, %v3028_v57 }
 0x544   :  { %v2536_v49 = vadd.f32 %v1256_v45, %v3024_v39  ;;  %v2552_v59 = vadd.f32 %v1327_v46, %v3031_v2 }
 0x545   :  { %v1933_v51 = vmul.f32 -1.442695, %v2535_v34  ;;  %v1935_v61 = vmul.f32 -1.442695, %v2551_v55 }
 0x546   :  { %v1934_v52 = vmul.f32 -1.442695, %v2536_v49 }
 0x547   :  { %2658 = vpow2.f32 %v1933_v51 }
 0x548   :  { %2660 = vpow2.f32 %v1934_v52 }
 0x549   :  { %2662 = vtanh.f32 %v2552_v59 }
 0x54a   :  { %2664 = vpow2.f32 %v1935_v61 }
 0x551   :  { %v2659_v1 = vpop.eup %2658 }
 0x552   :  { %v1343_v5 = vadd.f32 1.0, %v2659_v1  ;;  %v2661_v7 = vpop.eup %2660 }
 0x553   :  { %v1344_v8 = vadd.f32 1.0, %v2661_v7  ;;  %v2663_v11 = vpop.eup %2662 }
 0x554   :  { %2666 = vrcp.f32 %v1343_v5  ;;  %v2665_v12 = vpop.eup %2664 }
 0x555   :  { %2668 = vrcp.f32 %v1344_v8  ;;  %v1345_v21 = vadd.f32 1.0, %v2665_v12 }
 0x557   :  { %2670 = vrcp.f32 %v1345_v21 }
 0x55e   :  { %v2667_v15 = vpop.eup %2666 }
 0x55f   :  { %v1354_v17 = vmul.f32 %v2667_v15, %v2663_v11  ;;  %v2669_v20 = vpop.eup %2668 }
 0x560   :  { %v1353_v24 = vmul.f32 %v2669_v20, %v3172_v30 }
 0x561   :  { %v2671_v35 = vpop.eup %2670 }
 0x562   :  { %v3217_v28 = vadd.f32 %v1354_v17, %v1353_v24 }
 0x564   :  { %2672 = vtanh.f32 %v3217_v28 }
 0x56e   :  { %v2673_v42 = vpop.eup %2672 }
 0x56f   :  { %v1357_v43 = vmul.f32 %v2673_v42, %v2671_v35 }
 0x571   :  { %1936 = vst [vmem:[%s3326_s6 + $0x20] sm:$0xff] %v1357_v43  ;;  %1430 = vmatmul.mubr.f32.vlgmr.msra.gmra.mrb[10].mxu0 %v1357_v43  ;;  %1501 = vmatmul.mubr.f32.vlgmr.msra.gmra.mrb[10].mxu1 %v1357_v43 }
 0x572   :  { %2402 = vmatpush1.bf16.msra.mxu0 %v2851_v47  ;;  %2434 = vmatpush1.bf16.msra.mxu1 %v2854_v50 }
 0x573   :  { %2404 = vmatprep.subr.bf16.mxu0 %v2857_v53  ;;  %2436 = vmatprep.subr.bf16.mxu1 %v2859_v56 }
 0x574   :  { %1606 = vmatprep.mubr.f32.mxu0 %v2772_v0  ;;  %1677 = vmatprep.mubr.f32.mxu1 %v2772_v0 }
 0x576   :  { %2406 = vmatpush1.bf16.msra.mxu0 %v2865_v60  ;;  %2438 = vmatpush1.bf16.msra.mxu1 %v2869_v63 }
 0x577   :  { %2408 = vmatprep.subr.bf16.mxu0 %v2873_v3  ;;  %2440 = vmatprep.subr.bf16.mxu1 %v2876_v6 }
 0x57a   :  { %2410 = vmatpush1.bf16.msra.mxu0 %v2882_v10  ;;  %2442 = vmatpush1.bf16.msra.mxu1 %v2886_v13 }
 0x57b   :  { %2412 = vmatprep.subr.bf16.mxu0 %v2890_v16  ;;  %2444 = vmatprep.subr.bf16.mxu1 %v2893_v19 }
 0x57e   :  { %2414 = vmatpush1.bf16.msra.mxu0 %v2899_v23  ;;  %2446 = vmatpush1.bf16.msra.mxu1 %v2903_v26 }
 0x57f   :  { %2416 = vmatprep.subr.bf16.mxu0 %v2907_v29  ;;  %2448 = vmatprep.subr.bf16.mxu1 %v2910_v32 }
 0x582   :  { %2418 = vmatpush1.bf16.msra.mxu0 %v2916_v36  ;;  %2450 = vmatpush1.bf16.msra.mxu1 %v2920_v40 }
 0x583   :  { %2420 = vmatprep.subr.bf16.mxu0 %v2924_v44  ;;  %2452 = vmatprep.subr.bf16.mxu1 %v2927_v48 }
 0x586   :  { %2422 = vmatpush1.bf16.msra.mxu0 %v2933_v54  ;;  %2454 = vmatpush1.bf16.msra.mxu1 %v2937_v58 }
 0x587   :  { %2424 = vmatprep.subr.bf16.mxu0 %v2941_v62  ;;  %2456 = vmatprep.subr.bf16.mxu1 %v2944_v4 }
 0x58a   :  { %2426 = vmatpush1.bf16.msra.mxu0 %v2950_v9  ;;  %2458 = vmatpush1.bf16.msra.mxu1 %v2954_v14 }
 0x58b   :  { %2428 = vmatprep.subr.bf16.mxu0 %v2958_v18  ;;  %2460 = vmatprep.subr.bf16.mxu1 %v2961_v22 }
 0x58e   :  { %2430 = vmatpush1.bf16.msra.mxu0 %v2967_v25  ;;  %2462 = vmatpush1.bf16.msra.mxu1 %v2971_v27 }
 0x58f   :  { %2464 = vmatprep.subr.bf16.mxu0 %v2844_v38  ;;  %2496 = vmatprep.subr.bf16.mxu1 %v2846_v41 }
 0x644   :  { %v1431_v30 = vpop.f32.mrb[10].mxu0  ;;  %v1502_v31 = vpop.f32.mrb[10].mxu1 }
 0x645   :  { %v2537_v33 = vadd.f32 %v1431_v30, %v3022_v37  ;;  %v1433_v34 = vpop.f32.mrb[11].mxu0  ;;  %v1504_v45 = vpop.f32.mrb[11].mxu1  ;;  %v2553_v52 = vadd.f32 %v1502_v31, %v3028_v57 }
 0x646   :  { %v2538_v46 = vadd.f32 %v1433_v34, %v3024_v39  ;;  %v2554_v55 = vadd.f32 %v1504_v45, %v3031_v2 }
 0x647   :  { %v1937_v49 = vmul.f32 -1.442695, %v2537_v33  ;;  %v1939_v59 = vmul.f32 -1.442695, %v2553_v52 }
 0x648   :  { %v1938_v51 = vmul.f32 -1.442695, %v2538_v46 }
 0x649   :  { %2674 = vpow2.f32 %v1937_v49 }
 0x64a   :  { %2676 = vpow2.f32 %v1938_v51 }
 0x64b   :  { %2678 = vtanh.f32 %v2554_v55 }
 0x64c   :  { %2680 = vpow2.f32 %v1939_v59 }
 0x653   :  { %v2675_v38 = vpop.eup %2674 }
 0x654   :  { %v1520_v61 = vadd.f32 1.0, %v2675_v38  ;;  %v2677_v41 = vpop.eup %2676 }
 0x655   :  { %v1521_v1 = vadd.f32 1.0, %v2677_v41  ;;  %v2679_v5 = vpop.eup %2678 }
 0x656   :  { %2682 = vrcp.f32 %v1520_v61  ;;  %v2681_v7 = vpop.eup %2680 }
 0x657   :  { %2684 = vrcp.f32 %v1521_v1  ;;  %v1522_v15 = vadd.f32 1.0, %v2681_v7 }
 0x659   :  { %2686 = vrcp.f32 %v1522_v15 }
 0x660   :  { %v2683_v8 = vpop.eup %2682 }
 0x661   :  { %v1531_v11 = vmul.f32 %v2683_v8, %v2679_v5  ;;  %v2685_v12 = vpop.eup %2684 }
 0x662   :  { %v1530_v17 = vmul.f32 %v2685_v12, %v3217_v28 }
 0x663   :  { %v2687_v21 = vpop.eup %2686 }
 0x664   :  { %v3262_v20 = vadd.f32 %v1531_v11, %v1530_v17 }
 0x666   :  { %2688 = vtanh.f32 %v3262_v20 }
 0x670   :  { %v2689_v24 = vpop.eup %2688 }
 0x671   :  { %v1534_v35 = vmul.f32 %v2689_v24, %v2687_v21 }
 0x673   :  { %1940 = vst [vmem:[%s3326_s6 + $0x28] sm:$0xff] %v1534_v35  ;;  %1607 = vmatmul.mubr.f32.vlgmr.msra.gmra.mrb[12].mxu0 %v1534_v35  ;;  %1678 = vmatmul.mubr.f32.vlgmr.msra.gmra.mrb[12].mxu1 %v1534_v35 }
 0x674   :  { %2466 = vmatpush1.bf16.msra.mxu0 %v2851_v47  ;;  %2498 = vmatpush1.bf16.msra.mxu1 %v2854_v50 }
 0x675   :  { %2468 = vmatprep.subr.bf16.mxu0 %v2857_v53  ;;  %2500 = vmatprep.subr.bf16.mxu1 %v2859_v56 }
 0x676   :  { %1783 = vmatprep.mubr.f32.mxu0 %v2772_v0  ;;  %1854 = vmatprep.mubr.f32.mxu1 %v2772_v0 }
 0x678   :  { %2470 = vmatpush1.bf16.msra.mxu0 %v2865_v60  ;;  %2502 = vmatpush1.bf16.msra.mxu1 %v2869_v63 }
 0x679   :  { %2472 = vmatprep.subr.bf16.mxu0 %v2873_v3  ;;  %2504 = vmatprep.subr.bf16.mxu1 %v2876_v6 }
 0x67c   :  { %2474 = vmatpush1.bf16.msra.mxu0 %v2882_v10  ;;  %2506 = vmatpush1.bf16.msra.mxu1 %v2886_v13 }
 0x67d   :  { %2476 = vmatprep.subr.bf16.mxu0 %v2890_v16  ;;  %2508 = vmatprep.subr.bf16.mxu1 %v2893_v19 }
 0x680   :  { %2478 = vmatpush1.bf16.msra.mxu0 %v2899_v23  ;;  %2510 = vmatpush1.bf16.msra.mxu1 %v2903_v26 }
 0x681   :  { %2480 = vmatprep.subr.bf16.mxu0 %v2907_v29  ;;  %2512 = vmatprep.subr.bf16.mxu1 %v2910_v32 }
 0x684   :  { %2482 = vmatpush1.bf16.msra.mxu0 %v2916_v36  ;;  %2514 = vmatpush1.bf16.msra.mxu1 %v2920_v40 }
 0x685   :  { %2484 = vmatprep.subr.bf16.mxu0 %v2924_v44  ;;  %2516 = vmatprep.subr.bf16.mxu1 %v2927_v48 }
 0x688   :  { %2486 = vmatpush1.bf16.msra.mxu0 %v2933_v54  ;;  %2518 = vmatpush1.bf16.msra.mxu1 %v2937_v58 }
 0x689   :  { %2488 = vmatprep.subr.bf16.mxu0 %v2941_v62  ;;  %2520 = vmatprep.subr.bf16.mxu1 %v2944_v4 }
 0x68c   :  { %2490 = vmatpush1.bf16.msra.mxu0 %v2950_v9  ;;  %2522 = vmatpush1.bf16.msra.mxu1 %v2954_v14 }
 0x68d   :  { %2492 = vmatprep.subr.bf16.mxu0 %v2958_v18  ;;  %2524 = vmatprep.subr.bf16.mxu1 %v2961_v22 }
 0x690   :  { %2494 = vmatpush1.bf16.msra.mxu0 %v2967_v25  ;;  %2526 = vmatpush1.bf16.msra.mxu1 %v2971_v27 }
 0x746   :  { %v1608_v0 = vpop.f32.mrb[12].mxu0  ;;  %v1679_v47 = vpop.f32.mrb[12].mxu1 }
 0x747   :  { %v2539_v50 = vadd.f32 %v1608_v0, %v3022_v37  ;;  %v1610_v53 = vpop.f32.mrb[13].mxu0  ;;  %v1681_v56 = vpop.f32.mrb[13].mxu1  ;;  %v2555_v6 = vadd.f32 %v1679_v47, %v3028_v57 }
 0x748   :  { %v2540_v60 = vadd.f32 %v1610_v53, %v3024_v39  ;;  %v2556_v10 = vadd.f32 %v1681_v56, %v3031_v2 }
 0x749   :  { %v1941_v63 = vmul.f32 -1.442695, %v2539_v50  ;;  %v1943_v13 = vmul.f32 -1.442695, %v2555_v6 }
 0x74a   :  { %v1942_v3 = vmul.f32 -1.442695, %v2540_v60 }
 0x74b   :  { %2690 = vpow2.f32 %v1941_v63 }
 0x74c   :  { %2692 = vpow2.f32 %v1942_v3 }
 0x74d   :  { %2694 = vtanh.f32 %v2556_v10 }
 0x74e   :  { %2696 = vpow2.f32 %v1943_v13 }
 0x755   :  { %v2691_v16 = vpop.eup %2690 }
 0x756   :  { %v1697_v19 = vadd.f32 1.0, %v2691_v16  ;;  %v2693_v23 = vpop.eup %2692 }
 0x757   :  { %v1698_v26 = vadd.f32 1.0, %v2693_v23  ;;  %v2695_v29 = vpop.eup %2694 }
 0x758   :  { %2698 = vrcp.f32 %v1697_v19  ;;  %v2697_v32 = vpop.eup %2696 }
 0x759   :  { %2700 = vrcp.f32 %v1698_v26  ;;  %v1699_v48 = vadd.f32 1.0, %v2697_v32 }
 0x75b   :  { %2702 = vrcp.f32 %v1699_v48 }
 0x762   :  { %v2699_v36 = vpop.eup %2698 }
 0x763   :  { %v1708_v40 = vmul.f32 %v2699_v36, %v2695_v29  ;;  %v2701_v44 = vpop.eup %2700 }
 0x764   :  { %v1707_v54 = vmul.f32 %v2701_v44, %v3262_v20 }
 0x765   :  { %v2703_v62 = vpop.eup %2702 }
 0x766   :  { %v1709_v58 = vadd.f32 %v1708_v40, %v1707_v54 }
 0x768   :  { %2704 = vtanh.f32 %v1709_v58 }
 0x772   :  { %v2705_v4 = vpop.eup %2704 }
 0x773   :  { %v1711_v9 = vmul.f32 %v2705_v4, %v2703_v62 }
 0x775   :  { %1944 = vst [vmem:[%s3326_s6 + $0x30] sm:$0xff] %v1711_v9  ;;  %1784 = vmatmul.mubr.f32.vlgmr.msra.gmra.mrb[14].mxu0 %v1711_v9  ;;  %1855 = vmatmul.mubr.f32.vlgmr.msra.gmra.mrb[14].mxu1 %v1711_v9 }
 0x848   :  { %v1785_v14 = vpop.f32.mrb[14].mxu0  ;;  %v1856_v18 = vpop.f32.mrb[14].mxu1 }
 0x849   :  { %v2541_v22 = vadd.f32 %v1785_v14, %v3022_v37  ;;  %v1787_v25 = vpop.f32.mrb[15].mxu0  ;;  %v1858_v27 = vpop.f32.mrb[15].mxu1  ;;  %v2557_v30 = vadd.f32 %v1856_v18, %v3028_v57 }
 0x84a   :  { %v2542_v28 = vadd.f32 %v1787_v25, %v3024_v39  ;;  %v2558_v31 = vadd.f32 %v1858_v27, %v3031_v2 }
 0x84b   :  { %v1945_v42 = vmul.f32 -1.442695, %v2541_v22  ;;  %v1947_v33 = vmul.f32 -1.442695, %v2557_v30 }
 0x84c   :  { %v1946_v43 = vmul.f32 -1.442695, %v2542_v28 }
 0x84d   :  { %2706 = vpow2.f32 %v1945_v42 }
 0x84e   :  { %2708 = vpow2.f32 %v1946_v43 }
 0x84f   :  { %2710 = vtanh.f32 %v2558_v31 }
 0x850   :  { %2712 = vpow2.f32 %v1947_v33 }
 0x857   :  { %v2707_v34 = vpop.eup %2706 }
 0x858   :  { %v1874_v45 = vadd.f32 1.0, %v2707_v34  ;;  %v2709_v46 = vpop.eup %2708 }
 0x859   :  { %v1875_v37 = vadd.f32 1.0, %v2709_v46  ;;  %v2711_v49 = vpop.eup %2710 }
 0x85a   :  { %2714 = vrcp.f32 %v1874_v45  ;;  %v2713_v51 = vpop.eup %2712 }
 0x85b   :  { %2716 = vrcp.f32 %v1875_v37  ;;  %v1876_v59 = vadd.f32 1.0, %v2713_v51 }
 0x85d   :  { %2718 = vrcp.f32 %v1876_v59 }
 0x864   :  { %v2715_v39 = vpop.eup %2714 }
 0x865   :  { %v1885_v52 = vmul.f32 %v2715_v39, %v2711_v49  ;;  %v2717_v55 = vpop.eup %2716 }
 0x866   :  { %v1884_v38 = vmul.f32 %v2717_v55, %v1709_v58 }
 0x867   :  { %v2719_v57 = vpop.eup %2718 }
 0x868   :  { %v1886_v61 = vadd.f32 %v1885_v52, %v1884_v38 }
 0x86a   :  { %2720 = vtanh.f32 %v1886_v61  ;;  %1892 = vst [vmem:[%s3328_s8] sm:$0xff] %v1886_v61 }
 0x874   :  { %v2721_v2 = vpop.eup %2720 }
 0x875   :  { %v1888_v41 = vmul.f32 %v2721_v2, %v2719_v57 }
 0x877   :  { %1948 = vst [vmem:[%s3326_s6 + $0x38] sm:$0xff] %v1888_v41  ;;  %1891 = vst [vmem:[%s3327_s7] sm:$0xff] %v1888_v41 }
 0x878   :  { %1905 = vsyncmov [#allocation5] }
 0x87b   :  { %s1906_s19 = vpop.sfrf %1905 }
 0x87c   :  { %p1949_p2 = scmp.ne.s32.totalorder %s1906_s19, 0 }
 0x87e   :  { %1910 = shalt.err (%p1949_p2)  }
 0x87f   :  { %1912 = vsyncmov [#allocation5 + $0x1] }
 0x882   :  { %s1913_s20 = vpop.sfrf %1912 }
 0x883   :  { %p1950_p3 = scmp.ne.s32.totalorder %s1913_s20, 0 }
 0x885   :  { %1917 = shalt.err (%p1950_p3)  }

</bundles_post_ra>
